<compile_context>
chip_gen: v7x
topology: tpu7x:2x2x1
jax: 0.10.0
libtpu: 0.0.40
codegen_flags: <defaults>
</compile_context>

<pallas_src>
import jax
import jax.numpy as jnp
from jax.experimental import pallas as pl
from jax.experimental.pallas import tpu as pltpu

C = 25          # fixed by nn.BatchNorm1d(25) inside SpectralMapBlock
EPS = 1e-5      # PyTorch BatchNorm1d default eps
KERNEL_MUL = 2.0
KERNEL_NUM = 5


def _idx2(i):
    return (0, 0)


def _idx3(i):
    return (0, 0, 0)


_COMPILER_PARAMS = pltpu.CompilerParams(
    dimension_semantics=("arbitrary",),
    vmem_limit_bytes=32 * 1024 * 1024,
)


# ---------------------------------------------------------------------------
# Shared in-kernel math: one SpectralMapBlock on channel-flattened activations
# ---------------------------------------------------------------------------
def _block_math(x, w_a, b_a, w_b, b_b, gamma_cg, beta_cg, ind, ind_t, qmat,
                n_batch, group_width, cos_mask=None):
    """x        : (R, W)  R = N*C rows in (n, c) order (c fastest), W = G*group_width
    w_a, b_a : (W, W) / (1, W) fused stage-1 params  [fc1 | fc2]
    w_b, b_b : (W, W) / (1, W) fused stage-2 params  blockdiag(fc12, fc22)
    gamma_cg, beta_cg : (C, G) BatchNorm1d affine params per (channel, lane group)
    ind      : (C, R) channel one-hot rows   ind[c, r] = [r % C == c]
    ind_t    : (R, C) transpose of ind
    qmat     : (G, W) lane-group one-hot     qmat[g, l] = [l // group_width == g]
    cos_mask : None  -> contiguous halves: cos on [:, :gw], relu on the rest
               (1,W) -> masked select (lane-packed layout, interleaved groups)
    """
    f32 = jnp.float32
    _, w = x.shape

    h = jnp.dot(x, w_a, preferred_element_type=f32) + b_a          # (R, W)
    z = jnp.dot(h, w_b, preferred_element_type=f32) + b_b          # (R, W)

    # --- BatchNorm1d(C), training-mode batch statistics --------------------
    # Channel sums of [z | z^2] in one MXU pass, then per-group lane sums.
    zz = jnp.concatenate([z, z * z], axis=1)                       # (R, 2W)
    cs = jnp.dot(ind, zz, preferred_element_type=f32)              # (C, 2W)
    dn_last = (((1,), (1,)), ((), ()))                             # contract lanes
    gsum = jax.lax.dot_general(cs[:, :w], qmat, dn_last,
                               preferred_element_type=f32)         # (C, G)
    gsq = jax.lax.dot_general(cs[:, w:], qmat, dn_last,
                              preferred_element_type=f32)          # (C, G)
    cnt = f32(n_batch * group_width)
    mean = gsum / cnt
    var = jnp.maximum(gsq / cnt - mean * mean, 0.0)                # biased variance
    sc = gamma_cg * jax.lax.rsqrt(var + EPS)
    sh = beta_cg - mean * sc

    # Scatter (channel, group) scale/shift back to (row, lane) via tiny matmuls.
    row_sc = jnp.dot(jnp.dot(ind_t, sc, preferred_element_type=f32), qmat,
                     preferred_element_type=f32)                   # (R, W)
    row_sh = jnp.dot(jnp.dot(ind_t, sh, preferred_element_type=f32), qmat,
                     preferred_element_type=f32)
    z_bn = z * row_sc + row_sh

    # --- activations: cos on X12 groups, relu on X22 groups ----------------
    if cos_mask is None:
        gw = group_width
        return jnp.concatenate(
            [jnp.cos(z_bn[:, :gw]), jnp.maximum(z_bn[:, gw:], 0.0)], axis=1)
    return jnp.where(cos_mask > 0.5, jnp.cos(z_bn), jnp.maximum(z_bn, 0.0))


# ---------------------------------------------------------------------------
# Kernel 1: standalone SpectralMapBlock (the spec module)
# ---------------------------------------------------------------------------
def _spectral_block_kernel(x_ref, wa_ref, wb_ref, b_ref, bn_ref,
                           ind_ref, indt_ref, q_ref, o_ref):
    r, u = x_ref.shape
    g = q_ref.shape[0] - 1                       # number of lane groups (=2)
    o_ref[...] = _block_math(
        x_ref[...], wa_ref[...], b_ref[0:1, :], wb_ref[...], b_ref[1:2, :],
        bn_ref[:, 0:g], bn_ref[:, g:2 * g],
        ind_ref[...], indt_ref[...], q_ref[0:g, :],
        n_batch=r // C, group_width=u // g, cos_mask=None)


# ---------------------------------------------------------------------------
# Kernel 2: fully fused AdvSKM forward (block1+block2 on [fX|sX] + RBF MMD)
# ---------------------------------------------------------------------------
def _advskm_fused_kernel(x_ref, w_ref, b_ref, bn_ref, ind_ref, indt_ref,
                         q_ref, s_ref, m_ref, loss_ref):
    f32 = jnp.float32
    r, wdt = x_ref.shape                         # (N*C, 2U)
    g = q_ref.shape[0] - 1                       # 4 lane groups of width U/2
    u = wdt // 2
    n = r // C
    ind, ind_t = ind_ref[...], indt_ref[...]
    qmat = q_ref[0:g, :]
    cmask = q_ref[g:g + 1, :]

    def block(x, blk):                           # blk is a static Python int
        c0 = 2 * g * blk
        return _block_math(
            x, w_ref[2 * blk], b_ref[2 * blk:2 * blk + 1, :],
            w_ref[2 * blk + 1], b_ref[2 * blk + 1:2 * blk + 2, :],
            bn_ref[:, c0:c0 + g], bn_ref[:, c0 + g:c0 + 2 * g],
            ind, ind_t, qmat, n_batch=n, group_width=wdt // g, cos_mask=cmask)

    # DSKN1 on lane-packed [fX | sX]: each stage is ONE dense (R,2U)x(2U,2U).
    # BN stats per lane quarter == independent batch stats for fX and sX.
    emb = block(block(x_ref[...], 0), 1)         # (R, 2U) = [emb_f | emb_s]
    ef, es = emb[:, :u], emb[:, u:]

    s_mat = s_ref[...]                           # (N, R) sample one-hot
    mmask = m_ref[...]                           # (R, R) same-channel mask
    dn_t = (((1,), (1,)), ((), ()))              # contract last dims (A @ B^T)

    def sample_gram(a, b):
        # <flat(a_i), flat(b_j)> without reshaping to (N, C*U): row Gram,
        # keep matching-channel pairs, aggregate rows per sample.
        gram = jax.lax.dot_general(a, b, dn_t, preferred_element_type=f32)      # (R, R)
        t = jnp.dot(s_mat, gram * mmask, preferred_element_type=f32)            # (N, R)
        return jax.lax.dot_general(t, s_mat, dn_t, preferred_element_type=f32)  # (N, N)

    gff = sample_gram(ef, ef)
    gss = sample_gram(es, es)
    gfs = sample_gram(ef, es)

    # Sample squared norms = diagonals of the tiny (N, N) sample Grams.
    eye_n = (jax.lax.broadcasted_iota(jnp.int32, (n, n), 0) ==
             jax.lax.broadcasted_iota(jnp.int32, (n, n), 1)).astype(f32)
    nf_c = jnp.sum(gff * eye_n, axis=1, keepdims=True)     # (N, 1)
    nf_r = jnp.sum(gff * eye_n, axis=0, keepdims=True)     # (1, N)
    ns_c = jnp.sum(gss * eye_n, axis=1, keepdims=True)
    ns_r = jnp.sum(gss * eye_n, axis=0, keepdims=True)

    dff = jnp.maximum(nf_c + nf_r - 2.0 * gff, 0.0)        # clamp cancellation
    dss = jnp.maximum(ns_c + ns_r - 2.0 * gss, 0.0)
    dfs = jnp.maximum(nf_c + ns_r - 2.0 * gfs, 0.0)

    m = 2 * n
    bw = (jnp.sum(dff) + jnp.sum(dss) + 2.0 * jnp.sum(dfs)) / f32(m * m - m)
    bw = jnp.maximum(bw, 1e-12) / (KERNEL_MUL ** (KERNEL_NUM // 2))   # NaN guard

    loss = jnp.float32(0.0)
    for i in range(KERNEL_NUM):                  # static unroll: 5 RBF scales
        bwi = bw * (KERNEL_MUL ** i)
        loss = loss + (jnp.mean(jnp.exp(-dff / bwi)) + jnp.mean(jnp.exp(-dss / bwi))
                       - 2.0 * jnp.mean(jnp.exp(-dfs / bwi)))
    loss_ref[...] = jnp.reshape(loss, (1, 1))


# ---------------------------------------------------------------------------
# Wrapper-side constants / parameter packing (branch fusion + lane packing)
# ---------------------------------------------------------------------------
def _make_indicators(n, groups, group_width):
    r = n * C
    rows = jnp.arange(r, dtype=jnp.int32)
    ch = rows % C
    ind = (ch[None, :] == jnp.arange(C, dtype=jnp.int32)[:, None]).astype(jnp.float32)
    ind_t = ind.T                                                  # (R, C)
    w = groups * group_width
    lane_g = jnp.arange(w, dtype=jnp.int32) // group_width
    q = (lane_g[None, :] ==
         jnp.arange(groups, dtype=jnp.int32)[:, None]).astype(jnp.float32)   # (G, W)
    cos_row = ((lane_g % 2) == 0).astype(jnp.float32)[None, :]               # (1, W)
    return ind, ind_t, jnp.concatenate([q, cos_row], axis=0)                 # (G+1, W)


def _pack_block_params(p, units):
    assert units % 2 == 0, "SpectralMapBlock packing assumes even Units"
    v = units // 2
    assert p["w1"].shape == (v, units) and p["w2"].shape == (v, units)
    assert p["w12"].shape == (v, v) and p["w22"].shape == (v, v)
    wa = jnp.concatenate([p["w1"].T, p["w2"].T], axis=1)                    # (U, U)
    zv = jnp.zeros((v, v), jnp.float32)
    wb = jnp.concatenate([jnp.concatenate([p["w12"].T, zv], axis=1),
                          jnp.concatenate([zv, p["w22"].T], axis=1)], axis=0)
    bias = jnp.stack([jnp.concatenate([p["b1"], p["b2"]]),
                      jnp.concatenate([p["b12"], p["b22"]])], axis=0)       # (2, U)
    bn = jnp.concatenate([jnp.stack([p["g1"], p["g2"]], axis=1),
                          jnp.stack([p["be1"], p["be2"]], axis=1)], axis=1)  # (C, 4)
    return wa, wb, bias, bn


def _pack_fused_params(p1, p2, units):
    def blockdiag(a, b):
        z01 = jnp.zeros((a.shape[0], b.shape[1]), jnp.float32)
        z10 = jnp.zeros((b.shape[0], a.shape[1]), jnp.float32)
        return jnp.concatenate([jnp.concatenate([a, z01], axis=1),
                                jnp.concatenate([z10, b], axis=1)], axis=0)

    def pack_block(p):
        wa, wb, bias, _ = _pack_block_params(p, units)
        WA = blockdiag(wa, wa)                                   # (2U, 2U)
        WB = blockdiag(wb, wb)
        ba = jnp.concatenate([bias[0], bias[0]])                 # (2U,)
        bb = jnp.concatenate([bias[1], bias[1]])
        gamma = jnp.stack([p["g1"], p["g2"], p["g1"], p["g2"]], axis=1)     # (C, 4)
        beta = jnp.stack([p["be1"], p["be2"], p["be1"], p["be2"]], axis=1)
        return WA, WB, ba, bb, gamma, beta

    WA1, WB1, ba1, bb1, g1, be1 = pack_block(p1)
    WA2, WB2, ba2, bb2, g2, be2 = pack_block(p2)
    W = jnp.stack([WA1, WB1, WA2, WB2], axis=0)                  # (4, 2U, 2U)
    B = jnp.stack([ba1, bb1, ba2, bb2], axis=0)                  # (4, 2U)
    BN = jnp.concatenate([g1, be1, g2, be2], axis=1)             # (C, 16)
    return W, B, BN


# ---------------------------------------------------------------------------
# Wrappers
# ---------------------------------------------------------------------------
@jax.jit
def spectral_map_block(x, params):
    """SpectralMapBlock.forward: (N, C, Units) -> (N, C, Units)."""
    n, c, u = x.shape
    assert c == C
    wa, wb, bias, bn = _pack_block_params(params, u)
    ind, ind_t, qm = _make_indicators(n, 2, u // 2)
    xf = x.reshape(n * c, u)                       # wrapper-side flatten (free)
    out = pl.pallas_call(
        _spectral_block_kernel,
        out_shape=jax.ShapeDtypeStruct((n * c, u), jnp.float32),
        grid=(1,),
        in_specs=[
            pl.BlockSpec((n * c, u), _idx2),
            pl.BlockSpec((u, u), _idx2),
            pl.BlockSpec((u, u), _idx2),
            pl.BlockSpec((2, u), _idx2),
            pl.BlockSpec((c, 4), _idx2),
            pl.BlockSpec((c, n * c), _idx2),
            pl.BlockSpec((n * c, c), _idx2),
            pl.BlockSpec((3, u), _idx2),
        ],
        out_specs=pl.BlockSpec((n * c, u), _idx2),
        compiler_params=_COMPILER_PARAMS,
    )(xf, wa, wb, bias, bn, ind, ind_t, qm)
    return out.reshape(n, c, u)                    # free: contiguous HBM buffer


@jax.jit
def advskm_forward(fX, sX, params1, params2):
    """AdvSKM_in forward: MMD( DSKN1(fX), DSKN1(sX) ) in one pallas_call."""
    n, c, u = fX.shape
    assert c == C and fX.shape == sX.shape
    r = n * c
    W, B, BN = _pack_fused_params(params1, params2, u)
    ind, ind_t, qm = _make_indicators(n, 4, u // 2)
    rows = jnp.arange(r, dtype=jnp.int32)
    samp = (rows[None, :] // c ==
            jnp.arange(n, dtype=jnp.int32)[:, None]).astype(jnp.float32)       # (N, R)
    chmatch = ((rows[None, :] % c) ==
               (rows[:, None] % c)).astype(jnp.float32)                        # (R, R)
    x = jnp.concatenate([fX.reshape(r, u), sX.reshape(r, u)], axis=1)          # (R, 2U)
    loss = pl.pallas_call(
        _advskm_fused_kernel,
        out_shape=jax.ShapeDtypeStruct((1, 1), jnp.float32),
        grid=(1,),
        in_specs=[
            pl.BlockSpec((r, 2 * u), _idx2),
            pl.BlockSpec((4, 2 * u, 2 * u), _idx3),
            pl.BlockSpec((4, 2 * u), _idx2),
            pl.BlockSpec((c, 16), _idx2),
            pl.BlockSpec((c, r), _idx2),
            pl.BlockSpec((r, c), _idx2),
            pl.BlockSpec((5, 2 * u), _idx2),
            pl.BlockSpec((n, r), _idx2),
            pl.BlockSpec((r, r), _idx2),
        ],
        out_specs=pl.BlockSpec((1, 1), _idx2),
        compiler_params=_COMPILER_PARAMS,
    )(x, W, B, BN, ind, ind_t, qm, samp, chmatch)
    return loss[0, 0]


# ---------------------------------------------------------------------------
# Pure-JAX references (for correctness assertion only)
# ---------------------------------------------------------------------------
def _bn_train_ref(z, g, b):
    mean = jnp.mean(z, axis=(0, 2), keepdims=True)
    var = jnp.mean((z - mean) ** 2, axis=(0, 2), keepdims=True)     # biased
    return (z - mean) * jax.lax.rsqrt(var + EPS) * g[None, :, None] + b[None, :, None]


def spectral_block_ref(x, p):
    x12 = (x @ p["w1"].T + p["b1"]) @ p["w12"].T + p["b12"]
    x22 = (x @ p["w2"].T + p["b2"]) @ p["w22"].T + p["b22"]
    return jnp.concatenate(
        [jnp.cos(_bn_train_ref(x12, p["g1"], p["be1"])),
         jnp.maximum(_bn_train_ref(x22, p["g2"], p["be2"]), 0.0)], axis=-1)


def advskm_ref(fX, sX, p1, p2):
    ef = spectral_block_ref(spectral_block_ref(fX, p1), p2).reshape(fX.shape[0], -1)
    es = spectral_block_ref(spectral_block_ref(sX, p1), p2).reshape(sX.shape[0], -1)
    total = jnp.concatenate([ef, es], axis=0)
    m = total.shape[0]
    d2 = jnp.sum((total[None, :, :] - total[:, None, :]) ** 2, axis=-1)
    bw = jnp.maximum(jnp.sum(d2) / (m * m - m), 1e-12) / (KERNEL_MUL ** (KERNEL_NUM // 2))
    k = sum(jnp.exp(-d2 / (bw * KERNEL_MUL ** i)) for i in range(KERNEL_NUM))
    nb = fX.shape[0]
    return (jnp.mean(k[:nb, :nb]) + jnp.mean(k[nb:, nb:])
            - jnp.mean(k[:nb, nb:]) - jnp.mean(k[nb:, :nb]))


# ---------------------------------------------------------------------------
# Parameter init (mirrors nn.Linear defaults; BN affine randomized slightly)
# ---------------------------------------------------------------------------
def init_block_params(key, units, c=C):
    v = units // 2
    ks = jax.random.split(key, 6)

    def linear(k, out_f, in_f):
        bound = 1.0 / (in_f ** 0.5)
        kw, kb = jax.random.split(k)
        w = jax.random.uniform(kw, (out_f, in_f), jnp.float32, -bound, bound)
        b = jax.random.uniform(kb, (out_f,), jnp.float32, -bound, bound)
        return w, b

    w1, b1 = linear(ks[0], v, units)     # fc1
    w12, b12 = linear(ks[1], v, v)       # fc12
    w2, b2 = linear(ks[2], v, units)     # fc2
    w22, b22 = linear(ks[3], v, v)       # fc22
    g_noise = 0.1 * jax.random.normal(ks[4], (2, c), jnp.float32)
    b_noise = 0.1 * jax.random.normal(ks[5], (2, c), jnp.float32)
    return dict(
        w1=w1, b1=b1, w12=w12, b12=b12, w2=w2, b2=b2, w22=w22, b22=b22,
        g1=1.0 + g_noise[0], be1=b_noise[0],
        g2=1.0 + g_noise[1], be2=b_noise[1],
    )


# ---------------------------------------------------------------------------
if __name__ == "__main__":
    key = jax.random.PRNGKey(0)
    k_p1, k_p2, k_f, k_s = jax.random.split(key, 4)

    units = 64      # Units_1 = Units_2 = 64 (AdvSKM_in defaults)
    batch = 4

    params1 = init_block_params(k_p1, units)
    params2 = init_block_params(k_p2, units)

    fX = jax.random.normal(k_f, (batch, C, units), jnp.float32)
    sX = jax.random.normal(k_s, (batch, C, units), jnp.float32)

    # Standalone SpectralMapBlock forward (the spec module).
    blk_out = jax.block_until_ready(spectral_map_block(fX, params1))
    blk_ref = jax.block_until_ready(spectral_block_ref(fX, params1))
    if not bool(jnp.allclose(blk_out, blk_ref, atol=2e-3, rtol=2e-3)):
        raise AssertionError(
            "SpectralMapBlock mismatch, max|err|="
            f"{float(jnp.max(jnp.abs(blk_out - blk_ref)))}")

    # Fully fused AdvSKM_in forward: DSKN1(fX), DSKN1(sX), RBF-MMD loss.
    loss = jax.block_until_ready(advskm_forward(fX, sX, params1, params2))
    loss_r = jax.block_until_ready(advskm_ref(fX, sX, params1, params2))
    if not bool(jnp.allclose(loss, loss_r, atol=5e-3, rtol=5e-3)):
        raise AssertionError(
            f"AdvSKM loss mismatch: kernel={float(loss)} ref={float(loss_r)}")

    print("KERNEL_OK")
</pallas_src>

<mosaic_0001>
module attributes {stable_mosaic.version = 11 : i64} {
  func.func @_spectral_block_kernel(%arg0: i32, %arg1: memref<100x64xf32, #tpu.memory_space<vmem>>, %arg2: memref<64x64xf32, #tpu.memory_space<vmem>>, %arg3: memref<64x64xf32, #tpu.memory_space<vmem>>, %arg4: memref<2x64xf32, #tpu.memory_space<vmem>>, %arg5: memref<25x4xf32, #tpu.memory_space<vmem>>, %arg6: memref<25x100xf32, #tpu.memory_space<vmem>>, %arg7: memref<100x25xf32, #tpu.memory_space<vmem>>, %arg8: memref<3x64xf32, #tpu.memory_space<vmem>>, %arg9: memref<100x64xf32, #tpu.memory_space<vmem>>) attributes {dimension_semantics = [#tpu.dimension_semantics<arbitrary>], iteration_bounds = array<i64: 1>, scalar_prefetch = 0 : i64, scratch_operands = 0 : i64, tpu.core_type = #tpu.core_type<tc>, window_params = [{pipeline_mode = #tpu.pipeline_mode<synchronous>, transform_indices = @transform_0, window_bounds = array<i64: 100, 64>}, {pipeline_mode = #tpu.pipeline_mode<synchronous>, transform_indices = @transform_1, window_bounds = array<i64: 64, 64>}, {pipeline_mode = #tpu.pipeline_mode<synchronous>, transform_indices = @transform_2, window_bounds = array<i64: 64, 64>}, {pipeline_mode = #tpu.pipeline_mode<synchronous>, transform_indices = @transform_3, window_bounds = array<i64: 2, 64>}, {pipeline_mode = #tpu.pipeline_mode<synchronous>, transform_indices = @transform_4, window_bounds = array<i64: 25, 4>}, {pipeline_mode = #tpu.pipeline_mode<synchronous>, transform_indices = @transform_5, window_bounds = array<i64: 25, 100>}, {pipeline_mode = #tpu.pipeline_mode<synchronous>, transform_indices = @transform_6, window_bounds = array<i64: 100, 25>}, {pipeline_mode = #tpu.pipeline_mode<synchronous>, transform_indices = @transform_7, window_bounds = array<i64: 3, 64>}, {pipeline_mode = #tpu.pipeline_mode<synchronous>, transform_indices = @transform_8, window_bounds = array<i64: 100, 64>}]} {
    %c0 = arith.constant 0 : index
    %c0_0 = arith.constant 0 : index
    %0 = vector.load %arg1[%c0, %c0_0] : memref<100x64xf32, #tpu.memory_space<vmem>>, vector<100x64xf32>
    %c0_1 = arith.constant 0 : index
    %c0_2 = arith.constant 0 : index
    %1 = vector.load %arg2[%c0_1, %c0_2] : memref<64x64xf32, #tpu.memory_space<vmem>>, vector<64x64xf32>
    %c0_3 = arith.constant 0 : index
    %c0_4 = arith.constant 0 : index
    %2 = vector.load %arg4[%c0_3, %c0_4] : memref<2x64xf32, #tpu.memory_space<vmem>>, vector<1x64xf32>
    %c0_5 = arith.constant 0 : index
    %c0_6 = arith.constant 0 : index
    %3 = vector.load %arg3[%c0_5, %c0_6] : memref<64x64xf32, #tpu.memory_space<vmem>>, vector<64x64xf32>
    %c1 = arith.constant 1 : index
    %c0_7 = arith.constant 0 : index
    %4 = vector.load %arg4[%c1, %c0_7] : memref<2x64xf32, #tpu.memory_space<vmem>>, vector<1x64xf32>
    %c0_8 = arith.constant 0 : index
    %c0_9 = arith.constant 0 : index
    %5 = vector.load %arg5[%c0_8, %c0_9] : memref<25x4xf32, #tpu.memory_space<vmem>>, vector<25x2xf32>
    %c0_10 = arith.constant 0 : index
    %c2 = arith.constant 2 : index
    %6 = vector.load %arg5[%c0_10, %c2] : memref<25x4xf32, #tpu.memory_space<vmem>>, vector<25x2xf32>
    %c0_11 = arith.constant 0 : index
    %c0_12 = arith.constant 0 : index
    %7 = vector.load %arg6[%c0_11, %c0_12] : memref<25x100xf32, #tpu.memory_space<vmem>>, vector<25x100xf32>
    %c0_13 = arith.constant 0 : index
    %c0_14 = arith.constant 0 : index
    %8 = vector.load %arg7[%c0_13, %c0_14] : memref<100x25xf32, #tpu.memory_space<vmem>>, vector<100x25xf32>
    %c0_15 = arith.constant 0 : index
    %c0_16 = arith.constant 0 : index
    %9 = vector.load %arg8[%c0_15, %c0_16] : memref<3x64xf32, #tpu.memory_space<vmem>>, vector<2x64xf32>
    %cst = arith.constant dense<0.000000e+00> : vector<100x64xf32>
    %10 = tpu.matmul %0, %1, %cst {dimension_numbers = #tpu.dot_dimension_numbers<[1], [0], [0], [1], [0, 0, 1, 1], [], []>} : vector<100x64xf32>, vector<64x64xf32>, vector<100x64xf32> -> vector<100x64xf32>
    %11 = vector.broadcast %2 : vector<1x64xf32> to vector<100x64xf32>
    %12 = arith.addf %10, %11 : vector<100x64xf32>
    %cst_17 = arith.constant dense<0.000000e+00> : vector<100x64xf32>
    %13 = tpu.matmul %12, %3, %cst_17 {dimension_numbers = #tpu.dot_dimension_numbers<[1], [0], [0], [1], [0, 0, 1, 1], [], []>} : vector<100x64xf32>, vector<64x64xf32>, vector<100x64xf32> -> vector<100x64xf32>
    %14 = vector.broadcast %4 : vector<1x64xf32> to vector<100x64xf32>
    %15 = arith.addf %13, %14 : vector<100x64xf32>
    %16 = arith.mulf %15, %15 : vector<100x64xf32>
    %17 = tpu.concatenate %15, %16 in 1 : vector<100x64xf32>, vector<100x64xf32> -> vector<100x128xf32>
    %cst_18 = arith.constant dense<0.000000e+00> : vector<25x128xf32>
    %18 = tpu.matmul %7, %17, %cst_18 {dimension_numbers = #tpu.dot_dimension_numbers<[1], [0], [0], [1], [0, 0, 1, 1], [], []>} : vector<25x100xf32>, vector<100x128xf32>, vector<25x128xf32> -> vector<25x128xf32>
    %19 = vector.extract_strided_slice %18 {offsets = [0, 0], sizes = [25, 64], strides = [1, 1]} : vector<25x128xf32> to vector<25x64xf32>
    %cst_19 = arith.constant dense<0.000000e+00> : vector<25x2xf32>
    %20 = tpu.matmul %19, %9, %cst_19 {dimension_numbers = #tpu.dot_dimension_numbers<[1], [1], [0], [0], [0, 0, 1, 0], [], []>} : vector<25x64xf32>, vector<2x64xf32>, vector<25x2xf32> -> vector<25x2xf32>
    %21 = vector.extract_strided_slice %18 {offsets = [0, 64], sizes = [25, 64], strides = [1, 1]} : vector<25x128xf32> to vector<25x64xf32>
    %cst_20 = arith.constant dense<0.000000e+00> : vector<25x2xf32>
    %22 = tpu.matmul %21, %9, %cst_20 {dimension_numbers = #tpu.dot_dimension_numbers<[1], [1], [0], [0], [0, 0, 1, 0], [], []>} : vector<25x64xf32>, vector<2x64xf32>, vector<25x2xf32> -> vector<25x2xf32>
    %cst_21 = arith.constant 1.280000e+02 : f32
    %23 = vector.broadcast %cst_21 : f32 to vector<25x2xf32>
    %24 = arith.divf %20, %23 : vector<25x2xf32>
    %cst_22 = arith.constant 1.280000e+02 : f32
    %25 = vector.broadcast %cst_22 : f32 to vector<25x2xf32>
    %26 = arith.divf %22, %25 : vector<25x2xf32>
    %27 = arith.mulf %24, %24 : vector<25x2xf32>
    %28 = arith.subf %26, %27 : vector<25x2xf32>
    %cst_23 = arith.constant 0.000000e+00 : f32
    %29 = vector.broadcast %cst_23 : f32 to vector<25x2xf32>
    %30 = arith.maximumf %28, %29 : vector<25x2xf32>
    %cst_24 = arith.constant 9.99999974E-6 : f32
    %31 = vector.broadcast %cst_24 : f32 to vector<25x2xf32>
    %32 = arith.addf %30, %31 : vector<25x2xf32>
    %33 = math.rsqrt %32 : vector<25x2xf32>
    %34 = arith.mulf %5, %33 : vector<25x2xf32>
    %35 = arith.mulf %24, %34 : vector<25x2xf32>
    %36 = arith.subf %6, %35 : vector<25x2xf32>
    %cst_25 = arith.constant dense<0.000000e+00> : vector<100x2xf32>
    %37 = tpu.matmul %8, %34, %cst_25 {dimension_numbers = #tpu.dot_dimension_numbers<[1], [0], [0], [1], [0, 0, 1, 1], [], []>} : vector<100x25xf32>, vector<25x2xf32>, vector<100x2xf32> -> vector<100x2xf32>
    %cst_26 = arith.constant dense<0.000000e+00> : vector<100x64xf32>
    %38 = tpu.matmul %37, %9, %cst_26 {dimension_numbers = #tpu.dot_dimension_numbers<[1], [0], [0], [1], [0, 0, 1, 1], [], []>} : vector<100x2xf32>, vector<2x64xf32>, vector<100x64xf32> -> vector<100x64xf32>
    %cst_27 = arith.constant dense<0.000000e+00> : vector<100x2xf32>
    %39 = tpu.matmul %8, %36, %cst_27 {dimension_numbers = #tpu.dot_dimension_numbers<[1], [0], [0], [1], [0, 0, 1, 1], [], []>} : vector<100x25xf32>, vector<25x2xf32>, vector<100x2xf32> -> vector<100x2xf32>
    %cst_28 = arith.constant dense<0.000000e+00> : vector<100x64xf32>
    %40 = tpu.matmul %39, %9, %cst_28 {dimension_numbers = #tpu.dot_dimension_numbers<[1], [0], [0], [1], [0, 0, 1, 1], [], []>} : vector<100x2xf32>, vector<2x64xf32>, vector<100x64xf32> -> vector<100x64xf32>
    %41 = arith.mulf %15, %38 : vector<100x64xf32>
    %42 = arith.addf %41, %40 : vector<100x64xf32>
    %43 = vector.extract_strided_slice %42 {offsets = [0, 0], sizes = [100, 32], strides = [1, 1]} : vector<100x64xf32> to vector<100x32xf32>
    %44 = math.cos %43 : vector<100x32xf32>
    %45 = vector.extract_strided_slice %42 {offsets = [0, 32], sizes = [100, 32], strides = [1, 1]} : vector<100x64xf32> to vector<100x32xf32>
    %cst_29 = arith.constant 0.000000e+00 : f32
    %46 = vector.broadcast %cst_29 : f32 to vector<100x32xf32>
    %47 = arith.maximumf %45, %46 : vector<100x32xf32>
    %48 = tpu.concatenate %44, %47 in 1 : vector<100x32xf32>, vector<100x32xf32> -> vector<100x64xf32>
    %c0_30 = arith.constant 0 : index
    %c0_31 = arith.constant 0 : index
    %49 = vector.load %arg9[%c0_30, %c0_31] : memref<100x64xf32, #tpu.memory_space<vmem>>, vector<100x64xf32>
    tpu.vector_store %arg9[%c0_30, %c0_31], %48 {strides = array<i32>} : memref<100x64xf32, #tpu.memory_space<vmem>>, vector<100x64xf32>,
    return
  }
  func.func @transform_0(%arg0: i32) -> (i32, i32) {
    %c0_i32 = arith.constant 0 : i32
    %c0_i32_0 = arith.constant 0 : i32
    %c0_i32_1 = arith.constant 0 : i32
    return %c0_i32, %c0_i32_0 : i32, i32
  }
  func.func @transform_1(%arg0: i32) -> (i32, i32) {
    %c0_i32 = arith.constant 0 : i32
    %c0_i32_0 = arith.constant 0 : i32
    %c0_i32_1 = arith.constant 0 : i32
    return %c0_i32, %c0_i32_0 : i32, i32
  }
  func.func @transform_2(%arg0: i32) -> (i32, i32) {
    %c0_i32 = arith.constant 0 : i32
    %c0_i32_0 = arith.constant 0 : i32
    %c0_i32_1 = arith.constant 0 : i32
    return %c0_i32, %c0_i32_0 : i32, i32
  }
  func.func @transform_3(%arg0: i32) -> (i32, i32) {
    %c0_i32 = arith.constant 0 : i32
    %c0_i32_0 = arith.constant 0 : i32
    %c0_i32_1 = arith.constant 0 : i32
    return %c0_i32, %c0_i32_0 : i32, i32
  }
  func.func @transform_4(%arg0: i32) -> (i32, i32) {
    %c0_i32 = arith.constant 0 : i32
    %c0_i32_0 = arith.constant 0 : i32
    %c0_i32_1 = arith.constant 0 : i32
    return %c0_i32, %c0_i32_0 : i32, i32
  }
  func.func @transform_5(%arg0: i32) -> (i32, i32) {
    %c0_i32 = arith.constant 0 : i32
    %c0_i32_0 = arith.constant 0 : i32
    %c0_i32_1 = arith.constant 0 : i32
    return %c0_i32, %c0_i32_0 : i32, i32
  }
  func.func @transform_6(%arg0: i32) -> (i32, i32) {
    %c0_i32 = arith.constant 0 : i32
    %c0_i32_0 = arith.constant 0 : i32
    %c0_i32_1 = arith.constant 0 : i32
    return %c0_i32, %c0_i32_0 : i32, i32
  }
  func.func @transform_7(%arg0: i32) -> (i32, i32) {
    %c0_i32 = arith.constant 0 : i32
    %c0_i32_0 = arith.constant 0 : i32
    %c0_i32_1 = arith.constant 0 : i32
    return %c0_i32, %c0_i32_0 : i32, i32
  }
  func.func @transform_8(%arg0: i32) -> (i32, i32) {
    %c0_i32 = arith.constant 0 : i32
    %c0_i32_0 = arith.constant 0 : i32
    %c0_i32_1 = arith.constant 0 : i32
    return %c0_i32, %c0_i32_0 : i32, i32
  }
}

</mosaic_0001>

<bundles_post_ra>
// kernel: spectral_map_block.1
= control target key start
LH: loop header
LB: loop body
LE: loop exit
PB: predicated region body
PF: predicated region fallthrough
CT: control target
= control target key end

     0   :  { %v3797_v0 = vmov 0.0|0.0   ;;  %vm3798_vm0 = vmmov 0   ;;  %v3799_v4 = vmov 0.0   ;;  %vm86_vm1 = vcmask 523264   ;;  %s3801_s12 = smov 2   ;;  %s5616_s1 = inlined_call_operand.vmem [shape: f32[64,64], index: 1, kind: input, shape index: {}]   ;;  %s5617_s2 = inlined_call_operand.vmem [shape: f32[64,64], index: 2, kind: input, shape index: {}]   ;;  %s5618_s0 = inlined_call_operand.vmem [shape: f32[100,64], index: 0, kind: input, shape index: {}]   ;;  %s5619_s3 = inlined_call_operand.vmem [shape: f32[2,64], index: 3, kind: input, shape index: {}]   ;;  %s5620_s5 = inlined_call_operand.vmem [shape: f32[25,100], index: 5, kind: input, shape index: {}]   ;;  %s5621_s7 = inlined_call_operand.vmem [shape: f32[3,64], index: 7, kind: input, shape index: {}]   ;;  %s5622_s4 = inlined_call_operand.vmem [shape: f32[25,4], index: 4, kind: input, shape index: {}]   ;;  %s5623_s6 = inlined_call_operand.vmem [shape: f32[100,25], index: 6, kind: input, shape index: {}]   ;;  %s5624_s8 = inlined_call_operand.vmem [shape: f32[100,64], index: 8, kind: output, shape index: {}]  }
   0x1   :  { %3556 = vmatprep.subr.bf16.mxu0 %v3797_v0  ;;  %v42_v1 = vld [vmem:[%s5616_s1] sm:$0xff]  ;;  %v43_v2 = vld [vmem:[%s5616_s1 + $0x8] sm:$0xff]  ;;  %v44_v3 = vld [vmem:[%s5616_s1 + $0x10] sm:$0xff]  ;;  %3238 = vmatprep.mubr.msk.f32.mxu0 %vm3798_vm0, %v3799_v4  ;;  %vm507_vm2 = vcmask 818176   ;;  %vm520_vm3 = vcmask 1043456   ;;  %vm907_vm4 = vcmask 1040384  }
   0x2   :  { %v3557_v5 = vpack.c.bf16 %v43_v2, %v42_v1  ;;  %v45_v6 = vld [vmem:[%s5616_s1 + $0x18] sm:$0xff]  ;;  %3568 = vmatprep.subr.bf16.mxu1 %v3797_v0  ;;  %3293 = vmatprep.mubr.msk.f32.mxu1 %vm3798_vm0, %v3799_v4  ;;  %v46_v8 = vld [vmem:[%s5616_s1 + $0x20] sm:$0xff]  ;;  %v47_v9 = vld [vmem:[%s5616_s1 + $0x28] sm:$0xff]  ;;  %vm3802_vm5 = vmmov 1   ;;  %vm867_vm7 = vcmask 203776   ;;  %vm1081_vm8 = vcmask 1041408  }
   0x3   :  { %v3560_v7 = vpack.c.bf16 %v45_v6, %v44_v3  ;;  %v3563_v10 = vpack.c.bf16 %v47_v9, %v46_v8  ;;  %v51_v11 = vld [vmem:[%s5617_s2] sm:$0xff]  ;;  %v52_v12 = vld [vmem:[%s5617_s2 + $0x8] sm:$0xff]  ;;  %v53_v13 = vld [vmem:[%s5617_s2 + $0x10] sm:$0xff]  ;;  %vm1041_vm9 = vcmask 15360  }
   0x4   :  { %3558 = vmatpush3.bf16.msra.mxu0 %v3557_v5  ;;  %v48_v14 = vld [vmem:[%s5616_s1 + $0x30] sm:$0xff]  ;;  %v49_v15 = vld [vmem:[%s5616_s1 + $0x38] sm:$0xff]  ;;  %v3569_v16 = vpack.c.bf16 %v52_v12, %v51_v11  ;;  %v55_v20 = vld [vmem:[%s5617_s2 + $0x20] sm:$0xff] }
   0x5   :  { %3559 = vmatprep.subr.bf16.mxu0 %v3797_v0  ;;  %v54_v17 = vld [vmem:[%s5617_s2 + $0x18] sm:$0xff]  ;;  %v3566_v19 = vpack.c.bf16 %v49_v15, %v48_v14  ;;  %v56_v21 = vld [vmem:[%s5617_s2 + $0x28] sm:$0xff]  ;;  %v29_v23 = vld [vmem:[%s5618_s0] sm:$0xff] }
   0x6   :  { %3570 = vmatpush3.bf16.msra.mxu1 %v3569_v16  ;;  %v3572_v18 = vpack.c.bf16 %v54_v17, %v53_v13  ;;  %v3575_v22 = vpack.c.bf16 %v56_v21, %v55_v20  ;;  %v30_v24 = vld [vmem:[%s5618_s0 + $0x8] sm:$0xff]  ;;  %v31_v25 = vld [vmem:[%s5618_s0 + $0x10] sm:$0xff]  ;;  %v32_v26 = vld [vmem:[%s5618_s0 + $0x18] sm:$0xff] }
   0x7   :  { %3571 = vmatprep.subr.bf16.mxu1 %v3797_v0  ;;  %v33_v27 = vld [vmem:[%s5618_s0 + $0x20] sm:$0xff]  ;;  %v34_v28 = vld [vmem:[%s5618_s0 + $0x28] sm:$0xff]  ;;  %v35_v29 = vld [vmem:[%s5618_s0 + $0x30] sm:$0xff] }
   0x8   :  { %3561 = vmatpush3.bf16.msra.mxu0 %v3560_v7  ;;  %v36_v30 = vld [vmem:[%s5618_s0 + $0x38] sm:$0xff]  ;;  %v37_v31 = vld [vmem:[%s5618_s0 + $0x40] sm:$0xff]  ;;  %v38_v32 = vld [vmem:[%s5618_s0 + $0x48] sm:$0xff] }
   0x9   :  { %3562 = vmatprep.subr.bf16.mxu0 %v3797_v0  ;;  %v39_v33 = vld [vmem:[%s5618_s0 + $0x50] sm:$0xff]  ;;  %v40_v34 = vld [vmem:[%s5618_s0 + $0x58] sm:$0xff]  ;;  %v41_v35 = vld [vmem:[%s5618_s0 + $0x60] sm:$0xf] }
   0xa   :  { %3573 = vmatpush3.bf16.msra.mxu1 %v3572_v18  ;;  %v57_v36 = vld [vmem:[%s5617_s2 + $0x30] sm:$0xff]  ;;  %v58_v37 = vld [vmem:[%s5617_s2 + $0x38] sm:$0xff]  ;;  %v2940_v39 = vld [vmem:[%s5619_s3] ss:$0 sm:$0xff] }
   0xb   :  { %3574 = vmatprep.subr.bf16.mxu1 %v3797_v0  ;;  %v3578_v38 = vpack.c.bf16 %v58_v37, %v57_v36  ;;  %v4034_v17 = vld [vmem:[%s5619_s3 + $0x1] ss:$0 sm:$0xff]  ;;  %s3800_s3 = smov 64   ;;  %vm4206_vm6 = vmpackc.low %vm907_vm4, %vm3802_vm5 }
   0xc   :  { %3564 = vmatpush3.bf16.msra.mxu0 %v3563_v10 }
   0xd   :  { %3565 = vmatprep.subr.bf16.mxu0 %v3797_v0 }
   0xe   :  { %3576 = vmatpush3.bf16.msra.mxu1 %v3575_v22 }
   0xf   :  { %3577 = vmatprep.subr.bf16.mxu1 %v3797_v0 }
  0x10   :  { %3567 = vmatpush3.bf16.msra.mxu0 %v3566_v19 }
  0x12   :  { %3579 = vmatpush3.bf16.msra.mxu1 %v3578_v38 }
  0x13   :  { %3239 = vmatmul.mubr.msk.f32.vlgmr.msra.gmra.mrb[0].mxu0 %vm86_vm1, %v29_v23 }
  0x14   :  { %3241 = vmatprep.mubr.msk.f32.mxu0 %vm3798_vm0, %v3799_v4 }
  0x17   :  { %3242 = vmatmul.mubr.msk.f32.gmra.mrb[2].mxu0 %vm86_vm1, %v30_v24 }
  0x18   :  { %3244 = vmatprep.mubr.msk.f32.mxu0 %vm3798_vm0, %v3799_v4 }
  0x1b   :  { %3245 = vmatmul.mubr.msk.f32.gmra.mrb[4].mxu0 %vm86_vm1, %v31_v25 }
  0x1c   :  { %3247 = vmatprep.mubr.msk.f32.mxu0 %vm3798_vm0, %v3799_v4 }
  0x1f   :  { %3248 = vmatmul.mubr.msk.f32.gmra.mrb[6].mxu0 %vm86_vm1, %v32_v26 }
  0x20   :  { %3250 = vmatprep.mubr.msk.f32.mxu0 %vm3798_vm0, %v3799_v4 }
  0x23   :  { %3251 = vmatmul.mubr.msk.f32.gmra.mrb[8].mxu0 %vm86_vm1, %v33_v27 }
  0x24   :  { %3253 = vmatprep.mubr.msk.f32.mxu0 %vm3798_vm0, %v3799_v4 }
  0x27   :  { %3254 = vmatmul.mubr.msk.f32.gmra.mrb[10].mxu0 %vm86_vm1, %v34_v28 }
  0x28   :  { %3256 = vmatprep.mubr.msk.f32.mxu0 %vm3798_vm0, %v3799_v4 }
  0x2b   :  { %3257 = vmatmul.mubr.msk.f32.gmra.mrb[12].mxu0 %vm86_vm1, %v35_v29 }
  0x2c   :  { %3259 = vmatprep.mubr.msk.f32.mxu0 %vm3798_vm0, %v3799_v4 }
  0x2f   :  { %3260 = vmatmul.mubr.msk.f32.gmra.mrb[14].mxu0 %vm86_vm1, %v36_v30 }
  0x30   :  { %3262 = vmatprep.mubr.msk.f32.mxu0 %vm3798_vm0, %v3799_v4 }
  0x33   :  { %3263 = vmatmul.mubr.msk.f32.gmra.mrb[16].mxu0 %vm86_vm1, %v37_v31 }
  0x34   :  { %3265 = vmatprep.mubr.msk.f32.mxu0 %vm3798_vm0, %v3799_v4 }
  0x37   :  { %3266 = vmatmul.mubr.msk.f32.gmra.mrb[18].mxu0 %vm86_vm1, %v38_v32 }
  0x38   :  { %3268 = vmatprep.mubr.msk.f32.mxu0 %vm3798_vm0, %v3799_v4 }
  0x3b   :  { %3269 = vmatmul.mubr.msk.f32.gmra.mrb[20].mxu0 %vm86_vm1, %v39_v33 }
  0x3c   :  { %3271 = vmatprep.mubr.msk.f32.mxu0 %vm3798_vm0, %v3799_v4 }
  0x3f   :  { %3272 = vmatmul.mubr.msk.f32.gmra.mrb[22].mxu0 %vm86_vm1, %v40_v34 }
  0x40   :  { %3274 = vmatprep.mubr.msk.f32.mxu0 %vm3798_vm0, %v3799_v4 }
  0x43   :  { %3275 = vmatmul.mubr.msk.f32.gmra.mrb[24].mxu0 %vm86_vm1, %v41_v35 }
  0xe6   :  { %v192_v40 = vpop.f32.mrb[0].mxu0 }
  0xe7   :  { %v193_v41 = vadd.f32 %v2940_v39, %v192_v40  ;;  %v3240_v42 = vpop.f32.mrb[1].mxu0 }
  0xe9   :  { %3294 = vmatmul.mubr.msk.f32.vlgmr.msra.gmra.mrb[0].mxu1 %vm86_vm1, %v193_v41 }
  0xea   :  { %v197_v43 = vpop.f32.mrb[2].mxu0  ;;  %3296 = vmatprep.mubr.msk.f32.mxu1 %vm3798_vm0, %v3799_v4 }
  0xeb   :  { %v198_v44 = vadd.f32 %v2940_v39, %v197_v43  ;;  %v3243_v45 = vpop.f32.mrb[3].mxu0 }
  0xed   :  { %3297 = vmatmul.mubr.msk.f32.gmra.mrb[2].mxu1 %vm86_vm1, %v198_v44 }
  0xee   :  { %v202_v46 = vpop.f32.mrb[4].mxu0  ;;  %3299 = vmatprep.mubr.msk.f32.mxu1 %vm3798_vm0, %v3799_v4 }
  0xef   :  { %v203_v47 = vadd.f32 %v2940_v39, %v202_v46  ;;  %v3246_v48 = vpop.f32.mrb[5].mxu0 }
  0xf1   :  { %3300 = vmatmul.mubr.msk.f32.gmra.mrb[4].mxu1 %vm86_vm1, %v203_v47 }
  0xf2   :  { %v207_v49 = vpop.f32.mrb[6].mxu0  ;;  %3302 = vmatprep.mubr.msk.f32.mxu1 %vm3798_vm0, %v3799_v4 }
  0xf3   :  { %v208_v50 = vadd.f32 %v2940_v39, %v207_v49  ;;  %v3249_v51 = vpop.f32.mrb[7].mxu0 }
  0xf5   :  { %3303 = vmatmul.mubr.msk.f32.gmra.mrb[6].mxu1 %vm86_vm1, %v208_v50 }
  0xf6   :  { %v212_v52 = vpop.f32.mrb[8].mxu0  ;;  %3305 = vmatprep.mubr.msk.f32.mxu1 %vm3798_vm0, %v3799_v4 }
  0xf7   :  { %v213_v53 = vadd.f32 %v2940_v39, %v212_v52  ;;  %v3252_v54 = vpop.f32.mrb[9].mxu0 }
  0xf9   :  { %3306 = vmatmul.mubr.msk.f32.gmra.mrb[8].mxu1 %vm86_vm1, %v213_v53 }
  0xfa   :  { %v217_v55 = vpop.f32.mrb[10].mxu0  ;;  %3308 = vmatprep.mubr.msk.f32.mxu1 %vm3798_vm0, %v3799_v4 }
  0xfb   :  { %v218_v56 = vadd.f32 %v2940_v39, %v217_v55  ;;  %v3255_v57 = vpop.f32.mrb[11].mxu0 }
  0xfd   :  { %3309 = vmatmul.mubr.msk.f32.gmra.mrb[10].mxu1 %vm86_vm1, %v218_v56 }
  0xfe   :  { %v222_v58 = vpop.f32.mrb[12].mxu0  ;;  %3311 = vmatprep.mubr.msk.f32.mxu1 %vm3798_vm0, %v3799_v4 }
  0xff   :  { %v223_v59 = vadd.f32 %v2940_v39, %v222_v58  ;;  %v3258_v60 = vpop.f32.mrb[13].mxu0 }
 0x101   :  { %3312 = vmatmul.mubr.msk.f32.gmra.mrb[12].mxu1 %vm86_vm1, %v223_v59 }
 0x102   :  { %v227_v61 = vpop.f32.mrb[14].mxu0  ;;  %3314 = vmatprep.mubr.msk.f32.mxu1 %vm3798_vm0, %v3799_v4 }
 0x103   :  { %v228_v62 = vadd.f32 %v2940_v39, %v227_v61  ;;  %v3261_v63 = vpop.f32.mrb[15].mxu0 }
 0x105   :  { %3315 = vmatmul.mubr.msk.f32.gmra.mrb[14].mxu1 %vm86_vm1, %v228_v62 }
 0x106   :  { %v232_v1 = vpop.f32.mrb[16].mxu0  ;;  %3317 = vmatprep.mubr.msk.f32.mxu1 %vm3798_vm0, %v3799_v4 }
 0x107   :  { %v233_v2 = vadd.f32 %v2940_v39, %v232_v1  ;;  %v3264_v3 = vpop.f32.mrb[17].mxu0 }
 0x109   :  { %3318 = vmatmul.mubr.msk.f32.gmra.mrb[16].mxu1 %vm86_vm1, %v233_v2 }
 0x10a   :  { %v237_v5 = vpop.f32.mrb[18].mxu0  ;;  %3320 = vmatprep.mubr.msk.f32.mxu1 %vm3798_vm0, %v3799_v4 }
 0x10b   :  { %v238_v6 = vadd.f32 %v2940_v39, %v237_v5  ;;  %v3267_v7 = vpop.f32.mrb[19].mxu0 }
 0x10d   :  { %3321 = vmatmul.mubr.msk.f32.gmra.mrb[18].mxu1 %vm86_vm1, %v238_v6 }
 0x10e   :  { %v242_v8 = vpop.f32.mrb[20].mxu0  ;;  %3323 = vmatprep.mubr.msk.f32.mxu1 %vm3798_vm0, %v3799_v4 }
 0x10f   :  { %v243_v9 = vadd.f32 %v2940_v39, %v242_v8  ;;  %v3270_v10 = vpop.f32.mrb[21].mxu0 }
 0x111   :  { %3324 = vmatmul.mubr.msk.f32.gmra.mrb[20].mxu1 %vm86_vm1, %v243_v9  ;;  %v64_v9 = vld [vmem:[%s5620_s5] sm:$0xff] }
 0x112   :  { %v247_v11 = vpop.f32.mrb[22].mxu0  ;;  %3326 = vmatprep.mubr.msk.f32.mxu1 %vm3798_vm0, %v3799_v4  ;;  %3358 = vmatprep.mubr.msk.f32.mxu0 %vm507_vm2, %v64_v9 }
 0x113   :  { %v248_v12 = vadd.f32 %v2940_v39, %v247_v11  ;;  %v3273_v13 = vpop.f32.mrb[23].mxu0 }
 0x115   :  { %3327 = vmatmul.mubr.msk.f32.gmra.mrb[22].mxu1 %vm86_vm1, %v248_v12 }
 0x116   :  { %v252_v14 = vpop.f32.mrb[24].mxu0  ;;  %3329 = vmatprep.mubr.msk.f32.mxu1 %vm3798_vm0, %v3799_v4 }
 0x117   :  { %v253_v15 = vadd.f32 %v2940_v39, %v252_v14  ;;  %v3276_v16 = vpop.f32.mrb[25].mxu0  ;;  %v66_v14 = vld [vmem:[%s5620_s5 + $0x10] sm:$0xff] }
 0x119   :  { %3330 = vmatmul.mubr.msk.f32.gmra.mrb[24].mxu1 %vm86_vm1, %v253_v15 }
 0x11a   :  { %3361 = vmatprep.mubr.msk.f32.mxu1 %vm507_vm2, %v66_v14 }
 0x1bc   :  { %v365_v18 = vpop.f32.mrb[0].mxu1 }
 0x1bd   :  { %v3295_v19 = vpop.f32.mrb[1].mxu1  ;;  %v4037_v20 = vadd.f32 %v4034_v17, %v365_v18 }
 0x1bf   :  { %v429_v24 = vmul.f32 %v4037_v20, %v4037_v20 }
 0x1c0   :  { %v370_v21 = vpop.f32.mrb[2].mxu1 }
 0x1c1   :  { %v4040_v22 = vadd.f32 %v4034_v17, %v370_v21  ;;  %v3298_v23 = vpop.f32.mrb[3].mxu1 }
 0x1c3   :  { %v430_v25 = vmul.f32 %v4040_v22, %v4040_v22 }
 0x1c4   :  { %v375_v26 = vpop.f32.mrb[4].mxu1 }
 0x1c5   :  { %v3301_v27 = vpop.f32.mrb[5].mxu1  ;;  %v3697_v28 = vpack.i.bf16 %v430_v25, %v429_v24  ;;  %v4047_v29 = vadd.f32 %v4034_v17, %v375_v26 }
 0x1c7   :  { %3698 = vrot.lane.b32.xlu0 %v3697_v28, %s3800_s3  ;;  %v431_v33 = vmul.f32 %v4047_v29, %v4047_v29 }
 0x1c8   :  { %v380_v30 = vpop.f32.mrb[6].mxu1 }
 0x1c9   :  { %v4051_v31 = vadd.f32 %v4034_v17, %v380_v30  ;;  %v3304_v32 = vpop.f32.mrb[7].mxu1 }
 0x1cb   :  { %v432_v34 = vmul.f32 %v4051_v31, %v4051_v31 }
 0x1cc   :  { %v385_v35 = vpop.f32.mrb[8].mxu1 }
 0x1cd   :  { %v3307_v36 = vpop.f32.mrb[9].mxu1  ;;  %v3702_v37 = vpack.i.bf16 %v432_v34, %v431_v33  ;;  %v4058_v38 = vadd.f32 %v4034_v17, %v385_v35 }
 0x1cf   :  { %3703 = vrot.lane.b32.xlu0 %v3702_v37, %s3800_s3  ;;  %v433_v42 = vmul.f32 %v4058_v38, %v4058_v38 }
 0x1d0   :  { %v390_v39 = vpop.f32.mrb[10].mxu1 }
 0x1d1   :  { %v4062_v40 = vadd.f32 %v4034_v17, %v390_v39  ;;  %v3310_v41 = vpop.f32.mrb[11].mxu1 }
 0x1d3   :  { %v434_v43 = vmul.f32 %v4062_v40, %v4062_v40 }
 0x1d4   :  { %v395_v44 = vpop.f32.mrb[12].mxu1 }
 0x1d5   :  { %v3313_v45 = vpop.f32.mrb[13].mxu1  ;;  %v3707_v46 = vpack.i.bf16 %v434_v43, %v433_v42  ;;  %v4069_v47 = vadd.f32 %v4034_v17, %v395_v44 }
 0x1d7   :  { %3708 = vrot.lane.b32.xlu1 %v3707_v46, %s3800_s3  ;;  %v435_v51 = vmul.f32 %v4069_v47, %v4069_v47 }
 0x1d8   :  { %v400_v48 = vpop.f32.mrb[14].mxu1 }
 0x1d9   :  { %v4073_v49 = vadd.f32 %v4034_v17, %v400_v48  ;;  %v3316_v50 = vpop.f32.mrb[15].mxu1 }
 0x1db   :  { %v436_v52 = vmul.f32 %v4073_v49, %v4073_v49 }
 0x1dc   :  { %v405_v53 = vpop.f32.mrb[16].mxu1 }
 0x1dd   :  { %v3319_v54 = vpop.f32.mrb[17].mxu1  ;;  %v3712_v55 = vpack.i.bf16 %v436_v52, %v435_v51  ;;  %v4080_v56 = vadd.f32 %v4034_v17, %v405_v53 }
 0x1df   :  { %3713 = vrot.lane.b32.xlu1 %v3712_v55, %s3800_s3  ;;  %v437_v60 = vmul.f32 %v4080_v56, %v4080_v56 }
 0x1e0   :  { %v410_v57 = vpop.f32.mrb[18].mxu1 }
 0x1e1   :  { %v4084_v58 = vadd.f32 %v4034_v17, %v410_v57  ;;  %v3322_v59 = vpop.f32.mrb[19].mxu1 }
 0x1e3   :  { %v438_v61 = vmul.f32 %v4084_v58, %v4084_v58 }
 0x1e4   :  { %v415_v62 = vpop.f32.mrb[20].mxu1 }
 0x1e5   :  { %v3325_v63 = vpop.f32.mrb[21].mxu1  ;;  %v3717_v1 = vpack.i.bf16 %v438_v61, %v437_v60  ;;  %v4091_v2 = vadd.f32 %v4034_v17, %v415_v62 }
 0x1e7   :  { %3718 = vrot.lane.b32.xlu0 %v3717_v1, %s3800_s3  ;;  %v439_v7 = vmul.f32 %v4091_v2, %v4091_v2  ;;  %v65_v1 = vld [vmem:[%s5620_s5 + $0x8] sm:$0xff] }
 0x1e8   :  { %v420_v3 = vpop.f32.mrb[22].mxu1 }
 0x1e9   :  { %v4095_v5 = vadd.f32 %v4034_v17, %v420_v3  ;;  %v3328_v6 = vpop.f32.mrb[23].mxu1  ;;  %v67_v3 = vld [vmem:[%s5620_s5 + $0x18] sm:$0x1] }
 0x1ea   :  { %v4151_v6 = vld [vmem:[%s5621_s7] sm:$0x3] }
 0x1eb   :  { %v440_v8 = vmul.f32 %v4095_v5, %v4095_v5 }
 0x1ec   :  { %v425_v10 = vpop.f32.mrb[24].mxu1 }
 0x1ed   :  { %v4106_v11 = vadd.f32 %v4034_v17, %v425_v10  ;;  %v3722_v12 = vpack.i.bf16 %v440_v8, %v439_v7  ;;  %v3331_v13 = vpop.f32.mrb[25].mxu1 }
 0x1ef   :  { %3723 = vrot.lane.b32.xlu1 %v3722_v12, %s3800_s3  ;;  %v441_v15 = vmul.f32 %v4106_v11, %v4106_v11 }
 0x1f1   :  { %479 = vrot.lane.b32.xlu0 %v441_v15, %s3800_s3 }
 0x239   :  { %v3699_v16 = vpop.permute.xlu0 %3698 }
 0x23a   :  { %v3701_v18 = vunpack.i.h.bf16 %v3699_v16  ;;  %v3700_v19 = vunpack.i.l.bf16 %v3699_v16 }
 0x23c   :  { %v495_v17 = vsel %vm86_vm1, %v4040_v22, %v3701_v18  ;;  %v494_v21 = vsel %vm86_vm1, %v4037_v20, %v3700_v19 }
 0x23d   :  { %v3580_v23 = vpack.c.bf16 %v495_v17, %v494_v21 }
 0x23f   :  { %3581 = vmatprep.subr.bf16.mxu0 %v3580_v23  ;;  %3618 = vmatprep.subr.bf16.mxu1 %v3580_v23 }
 0x240   :  { %3583 = vmatpush3.bf16.msra.mxu0 %v3580_v23  ;;  %3625 = vmatpush3.bf16.msra.mxu1 %v3580_v23 }
 0x241   :  { %v3704_v24 = vpop.permute.xlu0 %3703 }
 0x242   :  { %v3706_v25 = vunpack.i.h.bf16 %v3704_v24  ;;  %v3705_v26 = vunpack.i.l.bf16 %v3704_v24 }
 0x244   :  { %v497_v27 = vsel %vm86_vm1, %v4051_v31, %v3706_v25  ;;  %v496_v28 = vsel %vm86_vm1, %v4047_v29, %v3705_v26 }
 0x245   :  { %v3584_v30 = vpack.c.bf16 %v497_v27, %v496_v28 }
 0x247   :  { %3585 = vmatprep.subr.bf16.mxu0 %v3584_v30  ;;  %3619 = vmatprep.subr.bf16.mxu1 %v3584_v30 }
 0x248   :  { %3587 = vmatpush3.bf16.msra.mxu0 %v3584_v30  ;;  %3626 = vmatpush3.bf16.msra.mxu1 %v3584_v30 }
 0x249   :  { %v3709_v32 = vpop.permute.xlu1 %3708 }
 0x24a   :  { %v3711_v33 = vunpack.i.h.bf16 %v3709_v32  ;;  %v3710_v34 = vunpack.i.l.bf16 %v3709_v32 }
 0x24c   :  { %v499_v35 = vsel %vm86_vm1, %v4062_v40, %v3711_v33  ;;  %v498_v36 = vsel %vm86_vm1, %v4058_v38, %v3710_v34 }
 0x24d   :  { %v3588_v37 = vpack.c.bf16 %v499_v35, %v498_v36 }
 0x24f   :  { %3589 = vmatprep.subr.bf16.mxu0 %v3588_v37  ;;  %3620 = vmatprep.subr.bf16.mxu1 %v3588_v37 }
 0x250   :  { %3591 = vmatpush3.bf16.msra.mxu0 %v3588_v37  ;;  %3627 = vmatpush3.bf16.msra.mxu1 %v3588_v37 }
 0x251   :  { %v3714_v39 = vpop.permute.xlu1 %3713 }
 0x252   :  { %v3716_v41 = vunpack.i.h.bf16 %v3714_v39  ;;  %v3715_v42 = vunpack.i.l.bf16 %v3714_v39 }
 0x254   :  { %v501_v43 = vsel %vm86_vm1, %v4073_v49, %v3716_v41  ;;  %v500_v44 = vsel %vm86_vm1, %v4069_v47, %v3715_v42 }
 0x255   :  { %v3592_v45 = vpack.c.bf16 %v501_v43, %v500_v44 }
 0x257   :  { %3593 = vmatprep.subr.bf16.mxu0 %v3592_v45  ;;  %3621 = vmatprep.subr.bf16.mxu1 %v3592_v45 }
 0x258   :  { %3595 = vmatpush3.bf16.msra.mxu0 %v3592_v45  ;;  %3628 = vmatpush3.bf16.msra.mxu1 %v3592_v45 }
 0x259   :  { %v3719_v46 = vpop.permute.xlu0 %3718 }
 0x25a   :  { %v3721_v48 = vunpack.i.h.bf16 %v3719_v46  ;;  %v3720_v50 = vunpack.i.l.bf16 %v3719_v46 }
 0x25c   :  { %v503_v51 = vsel %vm86_vm1, %v4084_v58, %v3721_v48  ;;  %v502_v52 = vsel %vm86_vm1, %v4080_v56, %v3720_v50 }
 0x25d   :  { %v3596_v53 = vpack.c.bf16 %v503_v51, %v502_v52 }
 0x25f   :  { %3597 = vmatprep.subr.bf16.mxu0 %v3596_v53  ;;  %3622 = vmatprep.subr.bf16.mxu1 %v3596_v53 }
 0x260   :  { %3599 = vmatpush3.bf16.msra.mxu0 %v3596_v53  ;;  %3629 = vmatpush3.bf16.msra.mxu1 %v3596_v53 }
 0x261   :  { %v3724_v54 = vpop.permute.xlu1 %3723 }
 0x262   :  { %v3726_v55 = vunpack.i.h.bf16 %v3724_v54  ;;  %v3725_v57 = vunpack.i.l.bf16 %v3724_v54 }
 0x263   :  { %v480_v62 = vpop.permute.xlu0 %479 }
 0x264   :  { %v505_v59 = vsel %vm86_vm1, %v4095_v5, %v3726_v55  ;;  %v504_v60 = vsel %vm86_vm1, %v4091_v2, %v3725_v57  ;;  %v506_v63 = vsel %vm86_vm1, %v4106_v11, %v480_v62  ;;  %v4184_v57 = vld [vmem:[%s5622_s4 + $0x8] sm:$0xff] }
 0x265   :  { %v3600_v61 = vpack.c.bf16 %v505_v59, %v504_v60  ;;  %v4189_v59 = vld [vmem:[%s5622_s4] sm:$0xff] }
 0x267   :  { %3601 = vmatprep.subr.bf16.mxu0 %v3600_v61  ;;  %3623 = vmatprep.subr.bf16.mxu1 %v3600_v61 }
 0x268   :  { %3603 = vmatpush3.bf16.msra.mxu0 %v3600_v61  ;;  %3630 = vmatpush3.bf16.msra.mxu1 %v3600_v61 }
 0x269   :  { %3356 = vmatprep.subr.msk.mxu0 %vm520_vm3, %v506_v63  ;;  %3624 = vmatprep.subr.msk.mxu1 %vm520_vm3, %v506_v63 }
 0x26c   :  { %3357 = vmatpush3.msk.msra.mxu0 %vm520_vm3, %v506_v63  ;;  %3631 = vmatpush3.msk.msra.mxu1 %vm520_vm3, %v506_v63 }
 0x26d   :  { %3359 = vmatmul.mubr.msk.f32.vlgmr.msra.gmra.mrb[26].mxu0 %vm507_vm2, %v65_v1  ;;  %3362 = vmatmul.mubr.msk.f32.vlgmr.msra.gmra.mrb[26].mxu1 %vm507_vm2, %v67_v3  ;;  %v4196_v1 = vld [vmem:[%s5622_s4 + $0x18] sm:$0x1] }
 0x26e   :  { %3364 = vmatprep.subr.msk.mxu1 %vm86_vm1, %v4151_v6  ;;  %3372 = vmatprep.subr.msk.mxu0 %vm86_vm1, %v4151_v6 }
 0x273   :  { %3365 = vmatpush3.xpose.msk.msra.mxu1 %vm86_vm1, %v4151_v6  ;;  %3373 = vmatpush3.xpose.msk.msra.mxu0 %vm86_vm1, %v4151_v6 }
 0x274   :  { %3604 = vmatprep.subr.bf16.mxu1 %v3797_v0  ;;  %3427 = vmatprep.subr.mxu0 %v3799_v4 }
 0x340   :  { %v3360_v7 = vpop.f32.mrb[26].mxu0  ;;  %v3363_v8 = vpop.f32.mrb[26].mxu1 }
 0x341   :  { %711 = vrot.lane.b32.xlu0 %v3360_v7, %s3800_s3  ;;  %v590_v9 = vpop.f32.mrb[27].mxu0  ;;  %v600_v10 = vpop.f32.mrb[27].mxu1 }
 0x342   :  { %709 = vrot.lane.b32.xlu1 %v590_v9, %s3800_s3  ;;  %3366 = vmatprep.mubr.msk.f32.mxu1 %vm86_vm1, %v590_v9 }
 0x343   :  { %3367 = vmatmul.mubr.msk.f32.vlgmr.msra.gmra.mrb[28].mxu1 %vm86_vm1, %v3360_v7  ;;  %v4201_v7 = vld [vmem:[%s5622_s4 + $0x10] sm:$0xff] }
 0x344   :  { %3369 = vmatprep.mubr.msk.f32.mxu1 %vm86_vm1, %v600_v10 }
 0x345   :  { %715 = vrot.lane.b32.xlu0 %v3363_v8, %s3800_s3 }
 0x346   :  { %713 = vrot.lane.b32.xlu1 %v600_v10, %s3800_s3 }
 0x347   :  { %3370 = vmatmul.mubr.msk.f32.gmra.mrb[30].mxu1 %vm86_vm1, %v3363_v8 }
 0x348   :  { %3388 = vmatprep.mubr.msk.f32.mxu1 %vm3798_vm0, %v3799_v4 }
 0x3b3   :  { %v712_v12 = vpop.permute.xlu0 %711 }
 0x3b4   :  { %v710_v13 = vpop.permute.xlu1 %709 }
 0x3b5   :  { %3374 = vmatprep.mubr.msk.f32.mxu0 %vm86_vm1, %v710_v13 }
 0x3b6   :  { %3375 = vmatmul.mubr.msk.f32.vlgmr.msra.gmra.mrb[28].mxu0 %vm86_vm1, %v712_v12 }
 0x3b7   :  { %v716_v15 = vpop.permute.xlu0 %715  ;;  %3428 = vmatpush3.msk.msra.mxu0 %vm1081_vm8, %v4151_v6 }
 0x3b8   :  { %v714_v14 = vpop.permute.xlu1 %713  ;;  %3515 = vmatprep.subr.mxu0 %v3799_v4 }
 0x3b9   :  { %3377 = vmatprep.mubr.msk.f32.mxu0 %vm86_vm1, %v714_v14 }
 0x3ba   :  { %3378 = vmatmul.mubr.msk.f32.gmra.mrb[30].mxu0 %vm86_vm1, %v716_v15 }
 0x3bb   :  { %3429 = vmatprep.mubr.msk.f32.mxu0 %vm3798_vm0, %v3799_v4 }
 0x416   :  { %v3368_v16 = vpop.f32.mrb[28].mxu1 }
 0x417   :  { %v690_v18 = vpop.f32.mrb[29].mxu1  ;;  %v812_v21 = vmul.f32 0.0078125, %v3368_v16 }
 0x418   :  { %v811_v23 = vmul.f32 0.0078125, %v690_v18 }
 0x419   :  { %v820_v25 = vmul.f32 %v812_v21, %v812_v21 }
 0x41a   :  { %v3371_v19 = vpop.f32.mrb[30].mxu1  ;;  %v819_v30 = vmul.f32 %v811_v23, %v811_v23 }
 0x41b   :  { %v700_v17 = vpop.f32.mrb[31].mxu1  ;;  %v814_v26 = vmul.f32 0.0078125, %v3371_v19 }
 0x41c   :  { %v813_v32 = vmul.f32 0.0078125, %v700_v17  ;;  %v4215_v17 = vld [vmem:[%s5623_s6] sm:$0xff] }
 0x41d   :  { %v822_v37 = vmul.f32 %v814_v26, %v814_v26 }
 0x41e   :  { %v821_v43 = vmul.f32 %v813_v32, %v813_v32 }
 0x489   :  { %v3376_v24 = vpop.f32.mrb[28].mxu0 }
 0x48a   :  { %v816_v27 = vmul.f32 0.0078125, %v3376_v24  ;;  %v791_v28 = vpop.f32.mrb[29].mxu0  ;;  %v4243_v24 = vld [vmem:[%s5623_s6 + $0x18] sm:$0xff] }
 0x48b   :  { %v815_v33 = vmul.f32 0.0078125, %v791_v28  ;;  %v4279_v28 = vld [vmem:[%s5623_s6 + $0x38] sm:$0xff] }
 0x48c   :  { %v824_v34 = vsub.f32 %v816_v27, %v820_v25  ;;  %v4252_v25 = vld [vmem:[%s5623_s6 + $0x20] sm:$0xff]  ;;  %v4270_v27 = vld [vmem:[%s5623_s6 + $0x30] sm:$0xff] }
 0x48d   :  { %v823_v35 = vsub.f32 %v815_v33, %v819_v30  ;;  %v3379_v36 = vpop.f32.mrb[30].mxu0  ;;  %v4288_v30 = vld [vmem:[%s5623_s6 + $0x40] sm:$0xff]  ;;  %v4306_v33 = vld [vmem:[%s5623_s6 + $0x50] sm:$0xff] }
 0x48e   :  { %v828_v39 = vmax.f32 %v824_v34, 0.0  ;;  %v818_v41 = vmul.f32 0.0078125, %v3379_v36  ;;  %v801_v42 = vpop.f32.mrb[31].mxu0  ;;  %v4315_v34 = vld [vmem:[%s5623_s6 + $0x58] sm:$0xff] }
 0x48f   :  { %v827_v44 = vmax.f32 %v823_v35, 0.0  ;;  %v817_v45 = vmul.f32 0.0078125, %v801_v42  ;;  %v4324_v35 = vld [vmem:[%s5623_s6 + $0x60] sm:$0xf] }
 0x490   :  { %v832_v46 = vadd.f32 1e-05, %v828_v39  ;;  %v826_v48 = vsub.f32 %v818_v41, %v822_v37 }
 0x491   :  { %v831_v50 = vadd.f32 1e-05, %v827_v44  ;;  %v825_v51 = vsub.f32 %v817_v45, %v821_v43 }
 0x492   :  { %3737 = vrsqrt.f32 %v832_v46  ;;  %v830_v52 = vmax.f32 %v826_v48, 0.0 }
 0x493   :  { %3739 = vrsqrt.f32 %v831_v50  ;;  %v829_v53 = vmax.f32 %v825_v51, 0.0 }
 0x494   :  { %v834_v54 = vadd.f32 1e-05, %v830_v52 }
 0x495   :  { %v833_v55 = vadd.f32 1e-05, %v829_v53 }
 0x496   :  { %3741 = vrsqrt.f32 %v834_v54 }
 0x497   :  { %3743 = vrsqrt.f32 %v833_v55 }
 0x49c   :  { %v3738_v60 = vpop.eup %3737 }
 0x49d   :  { %v3740_v61 = vpop.eup %3739  ;;  %v840_v62 = vmul.f32 %v3738_v60, %v4184_v57 }
 0x49e   :  { %v839_v63 = vmul.f32 %v3740_v61, %v4189_v59 }
 0x49f   :  { %v844_v3 = vmul.f32 %v840_v62, %v812_v21  ;;  %v4225_v21 = vld [vmem:[%s5623_s6 + $0x8] sm:$0xff] }
 0x4a0   :  { %v3742_v8 = vpop.eup %3741  ;;  %v3605_v9 = vpack.c.bf16 %v840_v62, %v839_v63  ;;  %v843_v10 = vmul.f32 %v839_v63, %v811_v23  ;;  %v4234_v23 = vld [vmem:[%s5623_s6 + $0x10] sm:$0xff] }
 0x4a1   :  { %v3744_v12 = vpop.eup %3743  ;;  %853 = vrot.lane.b32.xlu0 %v844_v3, %s3801_s12  ;;  %v842_v13 = vmul.f32 %v3742_v8, %v4196_v1 }
 0x4a2   :  { %3606 = vmatpush3.bf16.msra.mxu1 %v3605_v9  ;;  %851 = vrot.lane.b32.xlu1 %v843_v10, %s3801_s12  ;;  %v841_v14 = vmul.f32 %v3744_v12, %v4201_v7 }
 0x4a3   :  { %3607 = vmatprep.subr.bf16.mxu1 %v3797_v0  ;;  %v846_v15 = vmul.f32 %v842_v13, %v814_v26  ;;  %v4261_v26 = vld [vmem:[%s5623_s6 + $0x28] sm:$0xff] }
 0x4a4   :  { %v3608_v18 = vpack.c.bf16 %v842_v13, %v841_v14  ;;  %v845_v19 = vmul.f32 %v841_v14, %v813_v32  ;;  %v4297_v32 = vld [vmem:[%s5623_s6 + $0x48] sm:$0xff]  ;;  %s3803_s6 = smov 126  }
 0x4a5   :  { %857 = vrot.lane.b32.xlu0 %v846_v15, %s3801_s12 }
 0x4a6   :  { %3610 = vmatpush3.bf16.msk.msra.mxu1 %vm4206_vm6, %v3608_v18  ;;  %855 = vrot.lane.b32.xlu1 %v845_v19, %s3801_s12 }
 0x4a7   :  { %3611 = vmatprep.subr.bf16.mxu1 %v3797_v0 }
 0x4a9   :  { %3389 = vmatmul.mubr.msk.f32.vlgmr.msra.gmra.mrb[32].mxu1 %vm867_vm7, %v4215_v17 }
 0x4aa   :  { %3391 = vmatprep.mubr.msk.f32.mxu1 %vm3798_vm0, %v3799_v4 }
 0x4ad   :  { %3392 = vmatmul.mubr.msk.f32.gmra.mrb[34].mxu1 %vm867_vm7, %v4225_v21 }
 0x4ae   :  { %3394 = vmatprep.mubr.msk.f32.mxu1 %vm3798_vm0, %v3799_v4 }
 0x4b1   :  { %3395 = vmatmul.mubr.msk.f32.gmra.mrb[36].mxu1 %vm867_vm7, %v4234_v23 }
 0x4b2   :  { %3397 = vmatprep.mubr.msk.f32.mxu1 %vm3798_vm0, %v3799_v4 }
 0x4b5   :  { %3398 = vmatmul.mubr.msk.f32.gmra.mrb[38].mxu1 %vm867_vm7, %v4243_v24 }
 0x4b6   :  { %3400 = vmatprep.mubr.msk.f32.mxu1 %vm3798_vm0, %v3799_v4 }
 0x4b9   :  { %3401 = vmatmul.mubr.msk.f32.gmra.mrb[40].mxu1 %vm867_vm7, %v4252_v25 }
 0x4ba   :  { %3403 = vmatprep.mubr.msk.f32.mxu1 %vm3798_vm0, %v3799_v4 }
 0x4bd   :  { %3404 = vmatmul.mubr.msk.f32.gmra.mrb[42].mxu1 %vm867_vm7, %v4261_v26 }
 0x4be   :  { %3406 = vmatprep.mubr.msk.f32.mxu1 %vm3798_vm0, %v3799_v4 }
 0x4c1   :  { %3407 = vmatmul.mubr.msk.f32.gmra.mrb[44].mxu1 %vm867_vm7, %v4270_v27 }
 0x4c2   :  { %3409 = vmatprep.mubr.msk.f32.mxu1 %vm3798_vm0, %v3799_v4 }
 0x4c5   :  { %3410 = vmatmul.mubr.msk.f32.gmra.mrb[46].mxu1 %vm867_vm7, %v4279_v28 }
 0x4c6   :  { %3412 = vmatprep.mubr.msk.f32.mxu1 %vm3798_vm0, %v3799_v4 }
 0x4c9   :  { %3413 = vmatmul.mubr.msk.f32.gmra.mrb[48].mxu1 %vm867_vm7, %v4288_v30 }
 0x4ca   :  { %3415 = vmatprep.mubr.msk.f32.mxu1 %vm3798_vm0, %v3799_v4 }
 0x4cd   :  { %3416 = vmatmul.mubr.msk.f32.gmra.mrb[50].mxu1 %vm867_vm7, %v4297_v32 }
 0x4ce   :  { %3418 = vmatprep.mubr.msk.f32.mxu1 %vm3798_vm0, %v3799_v4 }
 0x4d1   :  { %3419 = vmatmul.mubr.msk.f32.gmra.mrb[52].mxu1 %vm867_vm7, %v4306_v33 }
 0x4d2   :  { %3421 = vmatprep.mubr.msk.f32.mxu1 %vm3798_vm0, %v3799_v4 }
 0x4d5   :  { %3422 = vmatmul.mubr.msk.f32.gmra.mrb[54].mxu1 %vm867_vm7, %v4315_v34 }
 0x4d6   :  { %3424 = vmatprep.mubr.msk.f32.mxu1 %vm3798_vm0, %v3799_v4 }
 0x4d9   :  { %3425 = vmatmul.mubr.msk.f32.gmra.mrb[56].mxu1 %vm867_vm7, %v4324_v35 }
 0x4da   :  { %3476 = vmatprep.mubr.msk.f32.mxu1 %vm3798_vm0, %v3799_v4 }
 0x513   :  { %v854_v36 = vpop.permute.xlu0 %853 }
 0x514   :  { %v864_v37 = vsub.f32 %v4184_v57, %v854_v36  ;;  %v852_v39 = vpop.permute.xlu1 %851 }
 0x515   :  { %v863_v41 = vsub.f32 %v4189_v59, %v852_v39 }
 0x517   :  { %v3727_v42 = vpack.i.bf16 %v864_v37, %v863_v41  ;;  %v858_v43 = vpop.permute.xlu0 %857 }
 0x518   :  { %v866_v44 = vsub.f32 %v4196_v1, %v858_v43  ;;  %v856_v45 = vpop.permute.xlu1 %855 }
 0x519   :  { %v865_v46 = vsub.f32 %v4201_v7, %v856_v45  ;;  %3728 = vrot.lane.b32.xlu1 %v3727_v42, %s3803_s6 }
 0x51b   :  { %v3732_v48 = vpack.i.bf16 %v866_v44, %v865_v46 }
 0x51d   :  { %3733 = vrot.lane.b32.xlu0 %v3732_v48, %s3803_s6 }
 0x57c   :  { %v977_v50 = vpop.f32.mrb[32].mxu1 }
 0x57d   :  { %3430 = vmatmul.mubr.msk.f32.vlgmr.msra.gmra.mrb[32].mxu0 %vm1041_vm9, %v977_v50  ;;  %v3390_v51 = vpop.f32.mrb[33].mxu1 }
 0x57e   :  { %3432 = vmatprep.mubr.msk.f32.mxu0 %vm3798_vm0, %v3799_v4  ;;  %3516 = vmatpush3.msk.msra.mxu0 %vm1081_vm8, %v4151_v6 }
 0x580   :  { %v982_v52 = vpop.f32.mrb[34].mxu1 }
 0x581   :  { %3433 = vmatmul.mubr.msk.f32.gmra.mrb[34].mxu0 %vm1041_vm9, %v982_v52  ;;  %v3393_v53 = vpop.f32.mrb[35].mxu1 }
 0x582   :  { %3435 = vmatprep.mubr.msk.f32.mxu0 %vm3798_vm0, %v3799_v4 }
 0x584   :  { %v987_v54 = vpop.f32.mrb[36].mxu1 }
 0x585   :  { %3436 = vmatmul.mubr.msk.f32.gmra.mrb[36].mxu0 %vm1041_vm9, %v987_v54  ;;  %v3396_v55 = vpop.f32.mrb[37].mxu1 }
 0x586   :  { %3438 = vmatprep.mubr.msk.f32.mxu0 %vm3798_vm0, %v3799_v4 }
 0x588   :  { %v992_v57 = vpop.f32.mrb[38].mxu1 }
 0x589   :  { %3439 = vmatmul.mubr.msk.f32.gmra.mrb[38].mxu0 %vm1041_vm9, %v992_v57  ;;  %v3399_v59 = vpop.f32.mrb[39].mxu1 }
 0x58a   :  { %3441 = vmatprep.mubr.msk.f32.mxu0 %vm3798_vm0, %v3799_v4 }
 0x58b   :  { %v3729_v6 = vpop.permute.xlu1 %3728 }
 0x58c   :  { %v3731_v60 = vunpack.i.h.bf16 %v3729_v6  ;;  %v3730_v61 = vunpack.i.l.bf16 %v3729_v6  ;;  %v997_v62 = vpop.f32.mrb[40].mxu1 }
 0x58d   :  { %3442 = vmatmul.mubr.msk.f32.gmra.mrb[40].mxu0 %vm1041_vm9, %v997_v62  ;;  %v3402_v63 = vpop.f32.mrb[41].mxu1 }
 0x58e   :  { %v3612_v1 = vpack.c.bf16 %v3731_v60, %v3730_v61  ;;  %3444 = vmatprep.mubr.msk.f32.mxu0 %vm3798_vm0, %v3799_v4 }
 0x58f   :  { %v3734_v3 = vpop.permute.xlu0 %3733 }
 0x590   :  { %v3736_v7 = vunpack.i.h.bf16 %v3734_v3  ;;  %v3735_v8 = vunpack.i.l.bf16 %v3734_v3  ;;  %v1002_v9 = vpop.f32.mrb[42].mxu1  ;;  %3613 = vmatpush3.bf16.msra.mxu1 %v3612_v1 }
 0x591   :  { %3445 = vmatmul.mubr.msk.f32.gmra.mrb[42].mxu0 %vm1041_vm9, %v1002_v9  ;;  %v3405_v10 = vpop.f32.mrb[43].mxu1  ;;  %3614 = vmatprep.subr.bf16.mxu1 %v3797_v0 }
 0x592   :  { %v3615_v12 = vpack.c.bf16 %v3736_v7, %v3735_v8  ;;  %3447 = vmatprep.mubr.msk.f32.mxu0 %vm3798_vm0, %v3799_v4 }
 0x594   :  { %v1007_v13 = vpop.f32.mrb[44].mxu1  ;;  %3617 = vmatpush3.bf16.msk.msra.mxu1 %vm4206_vm6, %v3615_v12 }
 0x595   :  { %3448 = vmatmul.mubr.msk.f32.gmra.mrb[44].mxu0 %vm1041_vm9, %v1007_v13  ;;  %v3408_v14 = vpop.f32.mrb[45].mxu1 }
 0x596   :  { %3450 = vmatprep.mubr.msk.f32.mxu0 %vm3798_vm0, %v3799_v4 }
 0x597   :  { %3477 = vmatmul.mubr.msk.f32.vlgmr.msra.gmra.mrb[58].mxu1 %vm867_vm7, %v4215_v17 }
 0x598   :  { %v1012_v15 = vpop.f32.mrb[46].mxu1  ;;  %3479 = vmatprep.mubr.msk.f32.mxu1 %vm3798_vm0, %v3799_v4 }
 0x599   :  { %3451 = vmatmul.mubr.msk.f32.gmra.mrb[46].mxu0 %vm1041_vm9, %v1012_v15  ;;  %v3411_v0 = vpop.f32.mrb[47].mxu1 }
 0x59a   :  { %3453 = vmatprep.mubr.msk.f32.mxu0 %vm3798_vm0, %v3799_v4 }
 0x59b   :  { %3480 = vmatmul.mubr.msk.f32.gmra.mrb[60].mxu1 %vm867_vm7, %v4225_v21 }
 0x59c   :  { %v1017_v16 = vpop.f32.mrb[48].mxu1  ;;  %3482 = vmatprep.mubr.msk.f32.mxu1 %vm3798_vm0, %v3799_v4 }
 0x59d   :  { %3454 = vmatmul.mubr.msk.f32.gmra.mrb[48].mxu0 %vm1041_vm9, %v1017_v16  ;;  %v3414_v18 = vpop.f32.mrb[49].mxu1 }
 0x59e   :  { %3456 = vmatprep.mubr.msk.f32.mxu0 %vm3798_vm0, %v3799_v4 }
 0x59f   :  { %3483 = vmatmul.mubr.msk.f32.gmra.mrb[62].mxu1 %vm867_vm7, %v4234_v23 }
 0x5a0   :  { %v1022_v19 = vpop.f32.mrb[50].mxu1  ;;  %3485 = vmatprep.mubr.msk.f32.mxu1 %vm3798_vm0, %v3799_v4 }
 0x5a1   :  { %3457 = vmatmul.mubr.msk.f32.gmra.mrb[50].mxu0 %vm1041_vm9, %v1022_v19  ;;  %v3417_v17 = vpop.f32.mrb[51].mxu1 }
 0x5a2   :  { %3459 = vmatprep.mubr.msk.f32.mxu0 %vm3798_vm0, %v3799_v4 }
 0x5a3   :  { %3486 = vmatmul.mubr.msk.f32.gmra.mrb[64].mxu1 %vm867_vm7, %v4243_v24 }
 0x5a4   :  { %v1027_v21 = vpop.f32.mrb[52].mxu1  ;;  %3488 = vmatprep.mubr.msk.f32.mxu1 %vm3798_vm0, %v3799_v4 }
 0x5a5   :  { %3460 = vmatmul.mubr.msk.f32.gmra.mrb[52].mxu0 %vm1041_vm9, %v1027_v21  ;;  %v3420_v23 = vpop.f32.mrb[53].mxu1 }
 0x5a6   :  { %3462 = vmatprep.mubr.msk.f32.mxu0 %vm3798_vm0, %v3799_v4 }
 0x5a7   :  { %3489 = vmatmul.mubr.msk.f32.gmra.mrb[66].mxu1 %vm867_vm7, %v4252_v25 }
 0x5a8   :  { %v1032_v36 = vpop.f32.mrb[54].mxu1  ;;  %3491 = vmatprep.mubr.msk.f32.mxu1 %vm3798_vm0, %v3799_v4 }
 0x5a9   :  { %3463 = vmatmul.mubr.msk.f32.gmra.mrb[54].mxu0 %vm1041_vm9, %v1032_v36  ;;  %v3423_v24 = vpop.f32.mrb[55].mxu1 }
 0x5aa   :  { %3465 = vmatprep.mubr.msk.f32.mxu0 %vm3798_vm0, %v3799_v4 }
 0x5ab   :  { %3492 = vmatmul.mubr.msk.f32.gmra.mrb[68].mxu1 %vm867_vm7, %v4261_v26 }
 0x5ac   :  { %v1037_v37 = vpop.f32.mrb[56].mxu1  ;;  %3494 = vmatprep.mubr.msk.f32.mxu1 %vm3798_vm0, %v3799_v4 }
 0x5ad   :  { %3466 = vmatmul.mubr.msk.f32.gmra.mrb[56].mxu0 %vm1041_vm9, %v1037_v37  ;;  %v3426_v25 = vpop.f32.mrb[57].mxu1 }
 0x5ae   :  { %3517 = vmatprep.mubr.msk.f32.mxu0 %vm3798_vm0, %v3799_v4 }
 0x5af   :  { %3495 = vmatmul.mubr.msk.f32.gmra.mrb[70].mxu1 %vm867_vm7, %v4270_v27 }
 0x5b0   :  { %3497 = vmatprep.mubr.msk.f32.mxu1 %vm3798_vm0, %v3799_v4 }
 0x5b3   :  { %3498 = vmatmul.mubr.msk.f32.gmra.mrb[72].mxu1 %vm867_vm7, %v4279_v28 }
 0x5b4   :  { %3500 = vmatprep.mubr.msk.f32.mxu1 %vm3798_vm0, %v3799_v4 }
 0x5b7   :  { %3501 = vmatmul.mubr.msk.f32.gmra.mrb[74].mxu1 %vm867_vm7, %v4288_v30 }
 0x5b8   :  { %3503 = vmatprep.mubr.msk.f32.mxu1 %vm3798_vm0, %v3799_v4 }
 0x5bb   :  { %3504 = vmatmul.mubr.msk.f32.gmra.mrb[76].mxu1 %vm867_vm7, %v4297_v32 }
 0x5bc   :  { %3506 = vmatprep.mubr.msk.f32.mxu1 %vm3798_vm0, %v3799_v4 }
 0x5bf   :  { %3507 = vmatmul.mubr.msk.f32.gmra.mrb[78].mxu1 %vm867_vm7, %v4306_v33 }
 0x5c0   :  { %3509 = vmatprep.mubr.msk.f32.mxu1 %vm3798_vm0, %v3799_v4 }
 0x5c3   :  { %3510 = vmatmul.mubr.msk.f32.gmra.mrb[80].mxu1 %vm867_vm7, %v4315_v34 }
 0x5c4   :  { %3512 = vmatprep.mubr.msk.f32.mxu1 %vm3798_vm0, %v3799_v4 }
 0x5c7   :  { %3513 = vmatmul.mubr.msk.f32.gmra.mrb[82].mxu1 %vm867_vm7, %v4324_v35 }
 0x650   :  { %v4431_v26 = vpop.f32.mrb[32].mxu0 }
 0x651   :  { %v3431_v27 = vpop.f32.mrb[33].mxu0 }
 0x654   :  { %v4433_v28 = vpop.f32.mrb[34].mxu0 }
 0x655   :  { %v3434_v30 = vpop.f32.mrb[35].mxu0 }
 0x658   :  { %v4435_v32 = vpop.f32.mrb[36].mxu0 }
 0x659   :  { %v3437_v33 = vpop.f32.mrb[37].mxu0 }
 0x65a   :  { %v1530_v33 = vmul.f32 %v4431_v26, %v4037_v20 }
 0x65c   :  { %v4437_v39 = vpop.f32.mrb[38].mxu0 }
 0x65d   :  { %v3440_v41 = vpop.f32.mrb[39].mxu0 }
 0x660   :  { %v4439_v42 = vpop.f32.mrb[40].mxu0 }
 0x661   :  { %v3443_v34 = vpop.f32.mrb[41].mxu0 }
 0x664   :  { %v4441_v43 = vpop.f32.mrb[42].mxu0 }
 0x665   :  { %v3446_v44 = vpop.f32.mrb[43].mxu0 }
 0x668   :  { %v4443_v45 = vpop.f32.mrb[44].mxu0 }
 0x669   :  { %v3449_v35 = vpop.f32.mrb[45].mxu0 }
 0x66a   :  { %v1297_v46 = vpop.f32.mrb[58].mxu1  ;;  %v1531_v35 = vmul.f32 %v4433_v28, %v4040_v22 }
 0x66b   :  { %3518 = vmatmul.mubr.msk.f32.vlgmr.msra.gmra.mrb[58].mxu0 %vm1041_vm9, %v1297_v46  ;;  %v3478_v48 = vpop.f32.mrb[59].mxu1 }
 0x66c   :  { %v4446_v50 = vpop.f32.mrb[46].mxu0  ;;  %3520 = vmatprep.mubr.msk.f32.mxu0 %vm3798_vm0, %v3799_v4 }
 0x66d   :  { %v3452_v51 = vpop.f32.mrb[47].mxu0 }
 0x66e   :  { %v1302_v52 = vpop.f32.mrb[60].mxu1 }
 0x66f   :  { %3521 = vmatmul.mubr.msk.f32.gmra.mrb[60].mxu0 %vm1041_vm9, %v1302_v52  ;;  %v3481_v53 = vpop.f32.mrb[61].mxu1 }
 0x670   :  { %v4451_v54 = vpop.f32.mrb[48].mxu0  ;;  %3523 = vmatprep.mubr.msk.f32.mxu0 %vm3798_vm0, %v3799_v4 }
 0x671   :  { %v3455_v55 = vpop.f32.mrb[49].mxu0 }
 0x672   :  { %v1307_v57 = vpop.f32.mrb[62].mxu1 }
 0x673   :  { %3524 = vmatmul.mubr.msk.f32.gmra.mrb[62].mxu0 %vm1041_vm9, %v1307_v57  ;;  %v3484_v59 = vpop.f32.mrb[63].mxu1  ;;  %v1532_v57 = vmul.f32 %v4435_v32, %v4047_v29 }
 0x674   :  { %v4456_v6 = vpop.f32.mrb[50].mxu0  ;;  %3526 = vmatprep.mubr.msk.f32.mxu0 %vm3798_vm0, %v3799_v4 }
 0x675   :  { %v3458_v60 = vpop.f32.mrb[51].mxu0 }
 0x676   :  { %v1312_v61 = vpop.f32.mrb[64].mxu1 }
 0x677   :  { %3527 = vmatmul.mubr.msk.f32.gmra.mrb[64].mxu0 %vm1041_vm9, %v1312_v61  ;;  %v3487_v62 = vpop.f32.mrb[65].mxu1 }
 0x678   :  { %v4461_v63 = vpop.f32.mrb[52].mxu0  ;;  %3529 = vmatprep.mubr.msk.f32.mxu0 %vm3798_vm0, %v3799_v4 }
 0x679   :  { %v3461_v1 = vpop.f32.mrb[53].mxu0 }
 0x67a   :  { %v1317_v3 = vpop.f32.mrb[66].mxu1 }
 0x67b   :  { %3530 = vmatmul.mubr.msk.f32.gmra.mrb[66].mxu0 %vm1041_vm9, %v1317_v3  ;;  %v3490_v7 = vpop.f32.mrb[67].mxu1 }
 0x67c   :  { %v4466_v8 = vpop.f32.mrb[54].mxu0  ;;  %3532 = vmatprep.mubr.msk.f32.mxu0 %vm3798_vm0, %v3799_v4  ;;  %v4518_v7 = vmul.f32 %v4437_v39, %v4051_v31  ;;  %v3804_v31 = vmov 683565275  }
 0x67d   :  { %v3464_v9 = vpop.f32.mrb[55].mxu0 }
 0x67e   :  { %v1322_v10 = vpop.f32.mrb[68].mxu1 }
 0x67f   :  { %3533 = vmatmul.mubr.msk.f32.gmra.mrb[68].mxu0 %vm1041_vm9, %v1322_v10  ;;  %v3493_v12 = vpop.f32.mrb[69].mxu1  ;;  %v4524_v10 = vmul.f32 %v4439_v42, %v4058_v38  ;;  %v3807_v42 = vmov 2102212464  }
 0x680   :  { %v4471_v13 = vpop.f32.mrb[56].mxu0  ;;  %3535 = vmatprep.mubr.msk.f32.mxu0 %vm3798_vm0, %v3799_v4 }
 0x681   :  { %v3467_v14 = vpop.f32.mrb[57].mxu0 }
 0x682   :  { %v1327_v15 = vpop.f32.mrb[70].mxu1 }
 0x683   :  { %3536 = vmatmul.mubr.msk.f32.gmra.mrb[70].mxu0 %vm1041_vm9, %v1327_v15  ;;  %v3496_v0 = vpop.f32.mrb[71].mxu1 }
 0x684   :  { %3538 = vmatprep.mubr.msk.f32.mxu0 %vm3798_vm0, %v3799_v4 }
 0x686   :  { %v1332_v16 = vpop.f32.mrb[72].mxu1 }
 0x687   :  { %3539 = vmatmul.mubr.msk.f32.gmra.mrb[72].mxu0 %vm1041_vm9, %v1332_v16  ;;  %v3499_v18 = vpop.f32.mrb[73].mxu1 }
 0x688   :  { %3541 = vmatprep.mubr.msk.f32.mxu0 %vm3798_vm0, %v3799_v4 }
 0x68a   :  { %v1337_v19 = vpop.f32.mrb[74].mxu1 }
 0x68b   :  { %3542 = vmatmul.mubr.msk.f32.gmra.mrb[74].mxu0 %vm1041_vm9, %v1337_v19  ;;  %v3502_v17 = vpop.f32.mrb[75].mxu1 }
 0x68c   :  { %3544 = vmatprep.mubr.msk.f32.mxu0 %vm3798_vm0, %v3799_v4  ;;  %v3805_v17 = vmov 2475754826  }
 0x68e   :  { %v1342_v21 = vpop.f32.mrb[76].mxu1 }
 0x68f   :  { %3545 = vmatmul.mubr.msk.f32.gmra.mrb[76].mxu0 %vm1041_vm9, %v1342_v21  ;;  %v3505_v23 = vpop.f32.mrb[77].mxu1 }
 0x690   :  { %3547 = vmatprep.mubr.msk.f32.mxu0 %vm3798_vm0, %v3799_v4 }
 0x692   :  { %v1347_v36 = vpop.f32.mrb[78].mxu1 }
 0x693   :  { %3548 = vmatmul.mubr.msk.f32.gmra.mrb[78].mxu0 %vm1041_vm9, %v1347_v36  ;;  %v3508_v24 = vpop.f32.mrb[79].mxu1  ;;  %v3806_v36 = vmov 2131351028  }
 0x694   :  { %3550 = vmatprep.mubr.msk.f32.mxu0 %vm3798_vm0, %v3799_v4 }
 0x696   :  { %v1352_v37 = vpop.f32.mrb[80].mxu1 }
 0x697   :  { %3551 = vmatmul.mubr.msk.f32.gmra.mrb[80].mxu0 %vm1041_vm9, %v1352_v37  ;;  %v3511_v25 = vpop.f32.mrb[81].mxu1  ;;  %v3808_v37 = vmov 920167782  }
 0x698   :  { %3553 = vmatprep.mubr.msk.f32.mxu0 %vm3798_vm0, %v3799_v4 }
 0x69a   :  { %v1357_v27 = vpop.f32.mrb[82].mxu1 }
 0x69b   :  { %3554 = vmatmul.mubr.msk.f32.gmra.mrb[82].mxu0 %vm1041_vm9, %v1357_v27  ;;  %v3514_v30 = vpop.f32.mrb[83].mxu1 }
 0x73e   :  { %v1466_v41 = vpop.f32.mrb[58].mxu0 }
 0x73f   :  { %v4496_v34 = vadd.f32 %v1530_v33, %v1466_v41  ;;  %v3519_v44 = vpop.f32.mrb[59].mxu0 }
 0x741   :  { %v1556_v46 = vand.u32 2147483647, %v4496_v34  ;;  %v1559_v48 = vand.u32 2139095040, %v4496_v34 }
 0x742   :  { %v1471_v51 = vpop.f32.mrb[60].mxu0 }
 0x743   :  { %v1560_v4 = vshrl.u32 %v1559_v48, 23  ;;  %v4502_v52 = vadd.f32 %v1531_v35, %v1471_v51  ;;  %v3522_v53 = vpop.f32.mrb[61].mxu0  ;;  %v1563_v55 = vand.u32 8388607, %v1556_v46  ;;  %v3809_v51 = vmov 1326507024  }
 0x745   :  { %v3039_v20 = vadd.s32 4294967169, %v1560_v4  ;;  %v1659_v26 = vand.u32 2147483647, %v4502_v52  ;;  %v1662_v22 = vand.u32 2139095040, %v4502_v52  ;;  %v1564_v60 = vor.u32 8388608, %v1563_v55 }
 0x746   :  { %v1476_v28 = vpop.f32.mrb[62].mxu0 }
 0x747   :  { %v1566_v59 = vadd.s32 1, %v3039_v20  ;;  %v1663_v61 = vshrl.u32 %v1662_v22, 23  ;;  %v4512_v62 = vand.u32 8388607, %v1659_v26  ;;  %v4514_v1 = vadd.f32 %v1532_v57, %v1476_v28  ;;  %v3525_v3 = vpop.f32.mrb[63].mxu0 }
 0x748   :  { %v4526_v0 = vshll.u32 %v1564_v60, 8 }
 0x749   :  { %vm1567_vm10 = vcmp.gt.s32.totalorder %v1566_v59, 0  ;;  %v3043_v29 = vadd.s32 4294967169, %v1663_v61  ;;  %v1667_v16 = vor.u32 8388608, %v4512_v62  ;;  %v1765_v18 = vand.u32 2139095040, %v4514_v1 }
 0x74a   :  { %v1568_v9 = vsel %vm1567_vm10, %v1566_v59, 0  ;;  %v4520_v32 = vpop.f32.mrb[64].mxu0  ;;  %vm1558_vm10 = vcmp.lt.s32.totalorder %v4496_v34, 0 }
 0x74b   :  { %v1569_v12 = vshrl.u32 %v1568_v9, 5  ;;  %v1570_v14 = vand.u32 31, %v1568_v9  ;;  %v3528_v15 = vpop.f32.mrb[65].mxu0  ;;  %v1669_v23 = vadd.s32 1, %v3043_v29 }
 0x74d   :  { %v1571_v19 = vsub.s32 32, %v1570_v14  ;;  %v1573_v39 = vshll.u32 %v3804_v31, %v1570_v14  ;;  %v1576_v21 = vshll.u32 %v3805_v17, %v1570_v14  ;;  %v1579_v38 = vshll.u32 %v3806_v36, %v1570_v14 }
 0x74e   :  { %v1582_v24 = vshll.u32 %v3807_v42, %v1570_v14  ;;  %v1585_v25 = vshll.u32 %v3808_v37, %v1570_v14  ;;  %vm1588_vm11 = vcmp.lt.s32.totalorder %v1569_v12, 1  ;;  %v4535_v27 = vpop.f32.mrb[66].mxu0  ;;  %vm1589_vm12 = vcmp.lt.s32.totalorder %v1569_v12, 2 }
 0x74f   :  { %v1574_v30 = vshrl.u32 %v3805_v17, %v1571_v19  ;;  %v1577_v33 = vshrl.u32 %v3806_v36, %v1571_v19  ;;  %v1580_v41 = vshrl.u32 %v3807_v42, %v1571_v19  ;;  %v3531_v44 = vpop.f32.mrb[67].mxu0  ;;  %v1572_v35 = vshrl.u32 %v3804_v31, %v1571_v19 }
 0x750   :  { %v1583_v48 = vshrl.u32 %v3808_v37, %v1571_v19  ;;  %v1586_v4 = vshrl.u32 %v3809_v51, %v1571_v19  ;;  %vm1590_vm13 = vcmp.lt.s32.totalorder %v1569_v12, 3  ;;  %vm1670_vm14 = vcmp.gt.s32.totalorder %v1669_v23, 0 }
 0x751   :  { %v1575_v53 = vor.u32 %v1574_v30, %v1573_v39  ;;  %v1578_v55 = vor.u32 %v1577_v33, %v1576_v21  ;;  %v1581_v20 = vor.u32 %v1580_v41, %v1579_v38  ;;  %vm1591_vm15 = vcmp.lt.s32.totalorder %v1569_v12, 4 }
 0x752   :  { %v1584_v57 = vor.u32 %v1583_v48, %v1582_v24  ;;  %v1587_v22 = vor.u32 %v1586_v4, %v1585_v25  ;;  %v1671_v28 = vsel %vm1670_vm14, %v1669_v23, 0  ;;  %v4543_v59 = vpop.f32.mrb[68].mxu0  ;;  %v4556_v24 = vmul.f32 %v4441_v43, %v4062_v40 }
 0x753   :  { %v1592_v60 = vsel %vm1588_vm11, %v1572_v35, %v1575_v53  ;;  %v1593_v61 = vsel %vm1591_vm15, %v1581_v20, 2102212464  ;;  %v1596_v62 = vsel %vm1588_vm11, %v1575_v53, %v1578_v55  ;;  %v1600_v3 = vsel %vm1588_vm11, %v1578_v55, %v1581_v20  ;;  %v3534_v9 = vpop.f32.mrb[69].mxu0 }
 0x754   :  { %v1594_v29 = vsel %vm1590_vm13, %v1578_v55, %v1593_v61  ;;  %v1597_v14 = vsel %vm1591_vm15, %v1584_v57, 920167782  ;;  %v1601_v15 = vsel %vm1591_vm15, %v1587_v22, 1326507024  ;;  %v4549_v19 = vshrl.u32 %v1671_v28, 5 }
 0x755   :  { %v1595_v39 = vsel %vm1589_vm12, %v1592_v60, %v1594_v29  ;;  %v1598_v21 = vsel %vm1590_vm13, %v1581_v20, %v1597_v14  ;;  %v1602_v23 = vsel %vm1590_vm13, %v1584_v57, %v1601_v15  ;;  %v1673_v38 = vand.u32 31, %v1671_v28 }
 0x756   :  { %v1599_v25 = vsel %vm1589_vm12, %v1596_v62, %v1598_v21  ;;  %v1603_v30 = vsel %vm1589_vm12, %v1600_v3, %v1602_v23  ;;  %v5625_v33 = vand.u32 2147483647, %v4514_v1  ;;  %v4561_v41 = vpop.f32.mrb[70].mxu0  ;;  %v1611_v40 = vmul.u32 %v4526_v0, %v1595_v39 }
 0x757   :  { %v4564_v44 = vmul.u32.u64.low %v4526_v0, %v1603_v30  ;;  %v4565_v35 = vmul.u32.u64.high %v4526_v0, %v1603_v30, %v4564_v44  ;;  %v4568_v48 = vmul.u32.u64.low %v4526_v0, %v1599_v25  ;;  %v4569_v4 = vmul.u32.u64.high %v4526_v0, %v1599_v25, %v4568_v48  ;;  %v3537_v53 = vpop.f32.mrb[71].mxu0 }
 0x758   :  { %v1674_v43 = vsub.s32 32, %v1673_v38  ;;  %v4573_v55 = vshll.u32 %v1667_v16, 8  ;;  %v1766_v12 = vshrl.u32 %v1765_v18, 23  ;;  %v1676_v20 = vshll.u32 %v3804_v31, %v1673_v38 }
 0x759   :  { %v1679_v57 = vshll.u32 %v3805_v17, %v1673_v38  ;;  %v1682_v22 = vshll.u32 %v3806_v36, %v1673_v38  ;;  %vm1691_vm0 = vcmp.lt.s32.totalorder %v4549_v19, 1  ;;  %v1685_v0 = vshll.u32 %v3807_v42, %v1673_v38 }
 0x75a   :  { %v1677_v28 = vshrl.u32 %v3805_v17, %v1674_v43  ;;  %v1680_v60 = vshrl.u32 %v3806_v36, %v1674_v43  ;;  %v1683_v61 = vshrl.u32 %v3807_v42, %v1674_v43  ;;  %v4583_v62 = vpop.f32.mrb[72].mxu0  ;;  %vm1613_vm2 = vc.u32 %v4565_v35, %v4568_v48 }
 0x75b   :  { %v1614_v16 = vadd.s32 1, %v4569_v4  ;;  %v1686_v18 = vshrl.u32 %v3808_v37, %v1674_v43  ;;  %v1688_v3 = vshll.u32 %v3808_v37, %v1673_v38  ;;  %v3540_v9 = vpop.f32.mrb[73].mxu0  ;;  %v1689_v39 = vshrl.u32 %v3809_v51, %v1674_v43 }
 0x75c   :  { %v1678_v29 = vor.u32 %v1677_v28, %v1676_v20  ;;  %v1681_v14 = vor.u32 %v1680_v60, %v1679_v57  ;;  %v1684_v15 = vor.u32 %v1683_v61, %v1682_v22  ;;  %vm1693_vm3 = vcmp.lt.s32.totalorder %v4549_v19, 3 }
 0x75d   :  { %v1615_v21 = vsel %vm1613_vm2, %v1614_v16, %v4569_v4  ;;  %v1687_v23 = vor.u32 %v1686_v18, %v1685_v0  ;;  %vm1694_vm4 = vcmp.lt.s32.totalorder %v4549_v19, 4  ;;  %v1675_v30 = vshrl.u32 %v3804_v31, %v1674_v43 }
 0x75e   :  { %v1616_v25 = vadd.s32 %v1615_v21, %v1611_v40  ;;  %v1690_v44 = vor.u32 %v1689_v39, %v1688_v3  ;;  %v1696_v53 = vsel %vm1694_vm4, %v1684_v15, 2102212464  ;;  %v1699_v38 = vsel %vm1691_vm0, %v1678_v29, %v1681_v14 }
 0x75f   :  { %v1700_v20 = vsel %vm1694_vm4, %v1687_v23, 920167782  ;;  %v1703_v57 = vsel %vm1691_vm0, %v1681_v14, %v1684_v15  ;;  %v3047_v22 = vadd.s32 4294967169, %v1766_v12  ;;  %vm1692_vm5 = vcmp.lt.s32.totalorder %v4549_v19, 2 }
 0x760   :  { %v1617_v28 = vadd.s32 536870912, %v1616_v25  ;;  %v1701_v4 = vsel %vm1693_vm3, %v1684_v15, %v1700_v20  ;;  %v1704_v60 = vsel %vm1694_vm4, %v1690_v44, 1326507024  ;;  %v1695_v40 = vsel %vm1691_vm0, %v1675_v30, %v1678_v29 }
 0x761   :  { %v1697_v43 = vsel %vm1693_vm3, %v1681_v14, %v1696_v53  ;;  %v1702_v61 = vsel %vm1692_vm5, %v1699_v38, %v1701_v4  ;;  %v1705_v0 = vsel %vm1693_vm3, %v1687_v23, %v1704_v60  ;;  %v1536_v9 = vmul.f32 %v4443_v45, %v4069_v47 }
 0x762   :  { %v4608_v16 = vshrl.u32 %v1617_v28, 30  ;;  %v1706_v12 = vsel %vm1692_vm5, %v1703_v57, %v1705_v0  ;;  %v4611_v18 = vmul.u32.u64.low %v4573_v55, %v1702_v61  ;;  %v4612_v3 = vmul.u32.u64.high %v4573_v55, %v1702_v61, %v4611_v18  ;;  %v4644_v57 = vpop.f32.mrb[74].mxu0 }
 0x763   :  { %v4618_v29 = vmul.u32.u64.low %v4573_v55, %v1706_v12  ;;  %v4619_v15 = vmul.u32.u64.high %v4573_v55, %v1706_v12, %v4618_v29  ;;  %v1772_v14 = vadd.s32 1, %v3047_v22  ;;  %v1698_v19 = vsel %vm1692_vm5, %v1695_v40, %v1697_v43 }
 0x764   :  { %v1619_v39 = vshll.u32 %v4608_v16, 30  ;;  %v1769_v21 = vand.u32 8388607, %v5625_v33  ;;  %v4626_v23 = vadd.f32 %v4518_v7, %v4520_v32  ;;  %v4630_v30 = vadd.f32 %v4524_v10, %v4535_v27 }
 0x765   :  { %vm1773_vm6 = vcmp.gt.s32.totalorder %v1772_v14, 0  ;;  %v4634_v47 = vadd.f32 %v4556_v24, %v4543_v59  ;;  %v4637_v45 = vadd.f32 %v1536_v9, %v4561_v41  ;;  %v1717_v53 = vadd.s32 1, %v4612_v3  ;;  %v3543_v41 = vpop.f32.mrb[75].mxu0 }
 0x766   :  { %v1620_v44 = vsub.s32 %v1616_v25, %v1619_v39  ;;  %v1774_v38 = vsel %vm1773_vm6, %v1772_v14, 0  ;;  %v1714_v20 = vmul.u32 %v4573_v55, %v1698_v19  ;;  %vm1716_vm7 = vc.u32 %v4619_v15, %v4611_v18 }
 0x767   :  { %v1718_v32 = vsel %vm1716_vm7, %v1717_v53, %v4612_v3  ;;  %v1770_v10 = vor.u32 8388608, %v1769_v21  ;;  %v1776_v27 = vand.u32 31, %v1774_v38  ;;  %v1775_v24 = vshrl.u32 %v1774_v38, 5 }
 0x768   :  { %v1622_v7 = vsub.s32 0, %v1620_v44  ;;  %v1719_v59 = vadd.s32 %v1718_v32, %v1714_v20  ;;  %v1612_v4 = vadd.s32 %v4568_v48, %v4565_v35  ;;  %v1642_v60 = vsub.s32 4, %v4608_v16 }
 0x769   :  { %v1777_v28 = vsub.s32 32, %v1776_v27  ;;  %v4649_v40 = vshll.u32 %v1770_v10, 8  ;;  %vm1794_vm8 = vcmp.lt.s32.totalorder %v1775_v24, 1  ;;  %v1785_v3 = vshll.u32 %v3806_v36, %v1776_v27 }
 0x76a   :  { %v3040_v22 = vmin.u32 %v1622_v7, %v1620_v44  ;;  %v1720_v25 = vadd.s32 536870912, %v1719_v59  ;;  %v1779_v48 = vshll.u32 %v3804_v31, %v1776_v27  ;;  %v1782_v14 = vshll.u32 %v3805_v17, %v1776_v27 }
 0x76b   :  { %v1780_v61 = vshrl.u32 %v3805_v17, %v1777_v28  ;;  %v1783_v0 = vshrl.u32 %v3806_v36, %v1777_v28  ;;  %v1786_v9 = vshrl.u32 %v3807_v42, %v1777_v28  ;;  %v1789_v29 = vshrl.u32 %v3808_v37, %v1777_v28 }
 0x76c   :  { %v1624_v55 = vclz %v3040_v22  ;;  %v4651_v43 = vshrl.u32 %v1720_v25, 30  ;;  %v1792_v39 = vshrl.u32 %v3809_v51, %v1777_v28  ;;  %v1788_v21 = vshll.u32 %v3807_v42, %v1776_v27 }
 0x76d   :  { %v1787_v19 = vor.u32 %v1786_v9, %v1785_v3  ;;  %v1791_v53 = vshll.u32 %v3808_v37, %v1776_v27  ;;  %v1781_v7 = vor.u32 %v1780_v61, %v1779_v48  ;;  %v1784_v32 = vor.u32 %v1783_v0, %v1782_v14 }
 0x76e   :  { %v3041_v12 = vadd.s32 4294967294, %v1624_v55  ;;  %v1722_v35 = vshll.u32 %v4651_v43, 30  ;;  %v1790_v22 = vor.u32 %v1789_v29, %v1788_v21  ;;  %vm1797_vm11 = vcmp.lt.s32.totalorder %v1775_v24, 4 }
 0x76f   :  { %v1778_v55 = vshrl.u32 %v3804_v31, %v1777_v28  ;;  %v1793_v3 = vor.u32 %v1792_v39, %v1791_v53  ;;  %v1799_v9 = vsel %vm1797_vm11, %v1787_v19, 2102212464  ;;  %vm1796_vm12 = vcmp.lt.s32.totalorder %v1775_v24, 3 }
 0x770   :  { %vm3042_vm9 = vcmp.lt.s32.totalorder %v3041_v12, 0  ;;  %v4664_v20 = vsub.s32 %v1719_v59, %v1722_v35  ;;  %v1800_v0 = vsel %vm1796_vm12, %v1784_v32, %v1799_v9  ;;  %v1802_v29 = vsel %vm1794_vm8, %v1781_v7, %v1784_v32 }
 0x771   :  { %v1627_v38 = vsel %vm3042_vm9, 0, %v3041_v12  ;;  %v1798_v61 = vsel %vm1794_vm8, %v1778_v55, %v1781_v7  ;;  %vm1795_vm13 = vcmp.lt.s32.totalorder %v1775_v24, 2  ;;  %v1803_v28 = vsel %vm1797_vm11, %v1790_v22, 920167782 }
 0x772   :  { %v1628_v10 = vsub.s32 32, %v1627_v38  ;;  %v1632_v41 = vsub.s32 4294967266, %v1627_v38  ;;  %v1725_v25 = vsub.s32 0, %v4664_v20  ;;  %v1629_v33 = vshll.u32 %v1620_v44, %v1627_v38 }
 0x773   :  { %v1804_v39 = vsel %vm1796_vm12, %v1787_v19, %v1803_v28  ;;  %v1806_v44 = vsel %vm1794_vm8, %v1784_v32, %v1787_v19  ;;  %v1801_v53 = vsel %vm1795_vm13, %v1798_v61, %v1800_v0  ;;  %vm4690_vm14 = vcmp.le.f32.partialorder %v1556_v46, 0.7853982 }
 0x774   :  { %v1630_v27 = vshrl.u32 %v1612_v4, %v1628_v10  ;;  %v1633_v12 = vadd.s32 127, %v1632_v41  ;;  %v3044_v59 = vmin.u32 %v1725_v25, %v4664_v20  ;;  %v1807_v4 = vsel %vm1797_vm11, %v1793_v3, 1326507024 }
 0x775   :  { %v1805_v38 = vsel %vm1795_vm13, %v1802_v29, %v1804_v39  ;;  %v1808_v10 = vsel %vm1796_vm12, %v1790_v22, %v1807_v4  ;;  %v1643_v24 = vsel %vm1558_vm10, %v1642_v60, %v4608_v16  ;;  %v1868_v32 = vand.u32 2139095040, %v4626_v23 }
 0x776   :  { %v1631_v35 = vor.u32 %v1630_v27, %v1629_v33  ;;  %v1634_v48 = vshll.u32 %v1633_v12, 23  ;;  %v1727_v14 = vclz %v3044_v59  ;;  %v1809_v25 = vsel %vm1795_vm13, %v1806_v44, %v1808_v10 }
 0x777   :  { %v4680_v33 = vmul.u32.u64.low %v4649_v40, %v1805_v38  ;;  %v4681_v7 = vmul.u32.u64.high %v4649_v40, %v1805_v38, %v4680_v33  ;;  %v4685_v27 = vmul.u32.u64.low %v4649_v40, %v1809_v25  ;;  %v4686_v12 = vmul.u32.u64.high %v4649_v40, %v1809_v25, %v4685_v27  ;;  %v4715_v38 = vpop.f32.mrb[76].mxu0 }
 0x778   :  { %v1635_v21 = vor.u32 4788187, %v1634_v48  ;;  %v3045_v41 = vadd.s32 4294967294, %v1727_v14  ;;  %v1638_v9 = vcvt.s32.f32 %v1631_v35  ;;  %v1715_v3 = vadd.s32 %v4611_v18, %v4619_v15  ;;  %v3546_v25 = vpop.f32.mrb[77].mxu0 }
 0x779   :  { %v1745_v61 = vsub.s32 4, %v4651_v43  ;;  %v1817_v46 = vmul.u32 %v4649_v40, %v1801_v53  ;;  %v1820_v35 = vadd.s32 1, %v4681_v7  ;;  %vm1819_vm0 = vc.u32 %v4686_v12, %v4680_v33 }
 0x77a   :  { %v1636_v55 = vand.u32 2147483647, %v1635_v21  ;;  %vm3046_vm15 = vcmp.lt.s32.totalorder %v3045_v41, 0  ;;  %v5626_v16 = vand.u32 2147483647, %v4626_v23  ;;  %v1869_v15 = vshrl.u32 %v1868_v32, 23 }
 0x77b   :  { %v1730_v59 = vsel %vm3046_vm15, 0, %v3045_v41  ;;  %v1821_v18 = vsel %vm1819_vm0, %v1820_v35, %v4681_v7  ;;  %v1645_v40 = vsel %vm4690_vm14, 0, %v1643_v24  ;;  %vm1661_vm2 = vcmp.lt.s32.totalorder %v4502_v52, 0 }
 0x77c   :  { %v1639_v22 = vmul.f32 %v1638_v9, %v1636_v55  ;;  %v1731_v0 = vsub.s32 32, %v1730_v59  ;;  %v1735_v29 = vsub.s32 4294967266, %v1730_v59  ;;  %v1732_v28 = vshll.u32 %v4664_v20, %v1730_v59 }
 0x77d   :  { %v1822_v44 = vadd.s32 %v1821_v18, %v1817_v46  ;;  %v3051_v53 = vadd.s32 4294967169, %v1869_v15  ;;  %v1872_v41 = vand.u32 8388607, %v5626_v16  ;;  %v1746_v55 = vsel %vm1661_vm2, %v1745_v61, %v4651_v43 }
 0x77e   :  { %v1640_v48 = vxor.u32 2147483648, %v1639_v22  ;;  %v1733_v60 = vshrl.u32 %v1715_v3, %v1731_v0  ;;  %v1736_v14 = vadd.s32 127, %v1735_v29  ;;  %v1649_v27 = vand.u32 3, %v1645_v40 }
 0x77f   :  { %v1823_v10 = vadd.s32 536870912, %v1822_v44  ;;  %v1875_v9 = vadd.s32 1, %v3051_v53  ;;  %v2895_v19 = vmax.f32 %v4496_v34, 0.0  ;;  %v1971_v32 = vand.u32 2139095040, %v4630_v30 }
 0x780   :  { %v1641_v39 = vsel %vm1558_vm10, %v1640_v48, %v1639_v22  ;;  %v1734_v4 = vor.u32 %v1733_v60, %v1732_v28  ;;  %v1737_v21 = vshll.u32 %v1736_v14, 23  ;;  %vm4729_vm3 = vcmp.le.f32.partialorder %v1659_v26, 0.7853982 }
 0x781   :  { %v1644_v20 = vsel %vm4690_vm14, %v4496_v34, %v1641_v39  ;;  %v4724_v24 = vshrl.u32 %v1823_v10, 30  ;;  %vm1876_vm4 = vcmp.gt.s32.totalorder %v1875_v9, 0  ;;  %v1748_v43 = vsel %vm4729_vm3, 0, %v1746_v55 }
 0x782   :  { %3745 = vcosq.f32 %v1644_v20  ;;  %v1738_v7 = vor.u32 4788187, %v1737_v21  ;;  %v1741_v59 = vcvt.s32.f32 %v1734_v4  ;;  %v1873_v0 = vor.u32 8388608, %v1872_v41 }
 0x783   :  { %3747 = vsinq.f32 %v1644_v20  ;;  %v1825_v61 = vshll.u32 %v4724_v24, 30  ;;  %v1877_v29 = vsel %vm1876_vm4, %v1875_v9, 0  ;;  %v2896_v35 = vmax.f32 %v4502_v52, 0.0 }
 0x784   :  { %v1739_v3 = vand.u32 2147483647, %v1738_v7  ;;  %v1879_v48 = vand.u32 31, %v1877_v29  ;;  %v1972_v28 = vshrl.u32 %v1971_v32, 23  ;;  %vm1650_vm5 = vcmp.lt.s32.totalorder %v1649_v27, 2 }
 0x785   :  { %vm1651_vm6 = vcmp.eq.s32.totalorder %v1649_v27, 0  ;;  %vm1654_vm7 = vcmp.eq.s32.totalorder %v1649_v27, 2  ;;  %vm2908_vm8 = vcmask 261120   ;;  %v4737_v26 = vsub.s32 %v1822_v44, %v1825_v61 }
 0x786   :  { %v1742_v46 = vmul.f32 %v1741_v59, %v1739_v3  ;;  %vm1648_vm9 = vweird.f32 %v4496_v34  ;;  %v4740_v14 = vand.u32 3, %v1748_v43  ;;  %v1818_v18 = vadd.s32 %v4680_v33, %v4686_v12 }
 0x787   :  { %v1880_v15 = vsub.s32 32, %v1879_v48  ;;  %v1828_v39 = vsub.s32 0, %v4737_v26  ;;  %v4745_v40 = vshrl.u32 %v1877_v29, 5  ;;  %v4747_v20 = vshll.u32 %v1873_v0, 8 }
 0x788   :  { %v1743_v60 = vxor.u32 2147483648, %v1742_v46  ;;  %v1968_v4 = vand.u32 2147483647, %v4630_v30  ;;  %v1882_v21 = vshll.u32 %v3804_v31, %v1879_v48  ;;  %v3055_v10 = vadd.s32 4294967169, %v1972_v28 }
 0x789   :  { %v1883_v53 = vshrl.u32 %v3805_v17, %v1880_v15  ;;  %v3048_v12 = vmin.u32 %v1828_v39, %v4737_v26  ;;  %v1885_v25 = vshll.u32 %v3805_v17, %v1879_v48  ;;  %v1888_v7 = vshll.u32 %v3806_v36, %v1879_v48 }
 0x78a   :  { %v1744_v44 = vsel %vm1661_vm2, %v1743_v60, %v1742_v46  ;;  %v1881_v32 = vshrl.u32 %v3804_v31, %v1880_v15  ;;  %v1886_v3 = vshrl.u32 %v3806_v36, %v1880_v15  ;;  %v1889_v0 = vshrl.u32 %v3807_v42, %v1880_v15 }
 0x78b   :  { %v1747_v33 = vsel %vm4729_vm3, %v4502_v52, %v1744_v44  ;;  %v1830_v43 = vclz %v3048_v12  ;;  %v1884_v61 = vor.u32 %v1883_v53, %v1882_v21  ;;  %v1891_v29 = vshll.u32 %v3807_v42, %v1879_v48 }
 0x78c   :  { %v3746_v41 = vpop.eup %3745  ;;  %3749 = vcosq.f32 %v1747_v33  ;;  %v1892_v46 = vshrl.u32 %v3808_v37, %v1880_v15  ;;  %v1894_v39 = vshll.u32 %v3808_v37, %v1879_v48  ;;  %v1895_v44 = vshrl.u32 %v3809_v51, %v1880_v15 }
 0x78d   :  { %v3748_v55 = vpop.eup %3747  ;;  %v1655_v9 = vxor.u32 2147483648, %v3746_v41  ;;  %3751 = vsinq.f32 %v1747_v33  ;;  %v3049_v60 = vadd.s32 4294967294, %v1830_v43  ;;  %vm1757_vm10 = vcmp.eq.s32.totalorder %v4740_v14, 2 }
 0x78e   :  { %v1652_v59 = vxor.u32 2147483648, %v3748_v55  ;;  %v1887_v21 = vor.u32 %v1886_v3, %v1885_v25  ;;  %v1890_v53 = vor.u32 %v1889_v0, %v1888_v7  ;;  %v1893_v33 = vor.u32 %v1892_v46, %v1891_v29 }
 0x78f   :  { %v1656_v22 = vsel %vm1654_vm7, %v1655_v9, %v3748_v55  ;;  %vm1754_vm11 = vcmp.eq.s32.totalorder %v4740_v14, 0  ;;  %vm3050_vm12 = vcmp.lt.s32.totalorder %v3049_v60, 0  ;;  %v1896_v55 = vor.u32 %v1895_v44, %v1894_v39  ;;  %v4802_v39 = vpop.f32.mrb[78].mxu0 }
 0x790   :  { %v1653_v28 = vsel %vm1651_vm6, %v3746_v41, %v1652_v59  ;;  %vm1897_vm13 = vcmp.lt.s32.totalorder %v4745_v40, 1  ;;  %vm1753_vm14 = vcmp.lt.s32.totalorder %v4740_v14, 2  ;;  %v1833_v27 = vsel %vm3050_vm12, 0, %v3049_v60 }
 0x791   :  { %v1657_v16 = vsel %vm1650_vm5, %v1653_v28, %v1656_v22  ;;  %vm1898_vm15 = vcmp.lt.s32.totalorder %v4745_v40, 2  ;;  %vm1899_vm0 = vcmp.lt.s32.totalorder %v4745_v40, 3  ;;  %vm1751_vm2 = vweird.f32 %v4502_v52 }
 0x792   :  { %v1658_v12 = vsel %vm1648_vm9, nan, %v1657_v16  ;;  %v1834_v16 = vsub.s32 32, %v1833_v27  ;;  %v1835_v15 = vshll.u32 %v4737_v26, %v1833_v27  ;;  %v1838_v34 = vsub.s32 4294967266, %v1833_v27 }
 0x793   :  { %v2909_v48 = vsel %vm2908_vm8, %v1658_v12, %v2895_v19  ;;  %vm1900_vm3 = vcmp.lt.s32.totalorder %v4745_v40, 4  ;;  %v1901_v19 = vsel %vm1897_vm13, %v1881_v32, %v1884_v61  ;;  %v1905_v25 = vsel %vm1897_vm13, %v1884_v61, %v1887_v21 }
 0x794   :  { %2922 = vst.msk [vmem:[%s5624_s8] sm:$0xff] %vm86_vm1, %v2909_v48  ;;  %v1902_v41 = vsel %vm1900_vm3, %v1890_v53, 2102212464  ;;  %v1906_v7 = vsel %vm1900_vm3, %v1893_v33, 920167782  ;;  %v1836_v9 = vshrl.u32 %v1818_v18, %v1834_v16  ;;  %v1839_v3 = vadd.s32 127, %v1838_v34 }
 0x795   :  { %v1907_v59 = vsel %vm1899_vm0, %v1890_v53, %v1906_v7  ;;  %v1909_v43 = vsel %vm1897_vm13, %v1887_v21, %v1890_v53  ;;  %v1903_v22 = vsel %vm1899_vm0, %v1887_v21, %v1902_v41  ;;  %v1910_v0 = vsel %vm1900_vm3, %v1896_v55, 1326507024  ;;  %v3549_v55 = vpop.f32.mrb[79].mxu0 }
 0x796   :  { %v3750_v26 = vpop.eup %3749  ;;  %v1908_v32 = vsel %vm1898_vm15, %v1905_v25, %v1907_v59  ;;  %v1978_v29 = vadd.s32 1, %v3055_v10  ;;  %v1837_v28 = vor.u32 %v1836_v9, %v1835_v15  ;;  %v1840_v18 = vshll.u32 %v1839_v3, 23 }
 0x797   :  { %v3752_v46 = vpop.eup %3751  ;;  %v1758_v61 = vxor.u32 2147483648, %v3750_v26  ;;  %v1911_v60 = vsel %vm1899_vm0, %v1893_v33, %v1910_v0  ;;  %v4807_v21 = vmul.u32.u64.low %v4747_v20, %v1908_v32  ;;  %v4808_v12 = vmul.u32.u64.high %v4747_v20, %v1908_v32, %v4807_v21 }
 0x798   :  { %v1755_v44 = vxor.u32 2147483648, %v3752_v46  ;;  %v1912_v53 = vsel %vm1898_vm15, %v1909_v43, %v1911_v60  ;;  %v1841_v48 = vor.u32 4788187, %v1840_v18  ;;  %v1848_v27 = vsub.s32 4, %v4724_v24 }
 0x799   :  { %v1759_v10 = vsel %vm1757_vm10, %v1758_v61, %v3752_v46  ;;  %v1904_v33 = vsel %vm1898_vm15, %v1901_v19, %v1903_v22  ;;  %v4819_v15 = vmul.u32.u64.low %v4747_v20, %v1912_v53  ;;  %v4820_v34 = vmul.u32.u64.high %v4747_v20, %v1912_v53, %v4819_v15 }
 0x79a   :  { %v1756_v16 = vsel %vm1754_vm11, %v3750_v26, %v1755_v44  ;;  %vm1979_vm4 = vcmp.gt.s32.totalorder %v1978_v29, 0  ;;  %v1842_v25 = vand.u32 2147483647, %v1841_v48  ;;  %v1844_v7 = vcvt.s32.f32 %v1837_v28 }
 0x79b   :  { %v1760_v41 = vsel %vm1753_vm14, %v1756_v16, %v1759_v10  ;;  %v1980_v9 = vsel %vm1979_vm4, %v1978_v29, 0  ;;  %vm1764_vm5 = vcmp.lt.s32.totalorder %v4514_v1, 0  ;;  %v1923_v40 = vadd.s32 1, %v4808_v12 }
 0x79c   :  { %v1761_v3 = vsel %vm1751_vm2, nan, %v1760_v41  ;;  %v1982_v19 = vand.u32 31, %v1980_v9  ;;  %v5633_v43 = vand.u32 2147483647, %v4514_v1  ;;  %v1845_v26 = vmul.f32 %v1844_v7, %v1842_v25 }
 0x79d   :  { %v2910_v59 = vsel %vm2908_vm8, %v1761_v3, %v2896_v35  ;;  %v1975_v22 = vand.u32 8388607, %v1968_v4  ;;  %v1849_v52 = vsel %vm1764_vm5, %v1848_v27, %v4724_v24  ;;  %v1920_v35 = vmul.u32 %v4747_v20, %v1904_v33 }
 0x79e   :  { %vm4833_vm6 = vcmp.le.f32.partialorder %v5633_v43, 0.7853982  ;;  %2923 = vst.msk [vmem:[%s5624_s8 + $0x8] sm:$0xff] %vm86_vm1, %v2910_v59  ;;  %vm1922_vm7 = vc.u32 %v4820_v34, %v4807_v21  ;;  %v1983_v32 = vsub.s32 32, %v1982_v19  ;;  %v1846_v0 = vxor.u32 2147483648, %v1845_v26 }
 0x79f   :  { %v1924_v29 = vsel %vm1922_vm7, %v1923_v40, %v4808_v12  ;;  %v1985_v46 = vshll.u32 %v3804_v31, %v1982_v19  ;;  %v1988_v61 = vshll.u32 %v3805_v17, %v1982_v19  ;;  %v1991_v24 = vshll.u32 %v3806_v36, %v1982_v19 }
 0x7a0   :  { %v1925_v28 = vadd.s32 %v1924_v29, %v1920_v35  ;;  %v1986_v18 = vshrl.u32 %v3805_v17, %v1983_v32  ;;  %v1989_v60 = vshrl.u32 %v3806_v36, %v1983_v32  ;;  %v1847_v20 = vsel %vm1764_vm5, %v1846_v0, %v1845_v26 }
 0x7a1   :  { %v1992_v44 = vshrl.u32 %v3807_v42, %v1983_v32  ;;  %v1994_v53 = vshll.u32 %v3807_v42, %v1982_v19  ;;  %v1995_v12 = vshrl.u32 %v3808_v37, %v1983_v32  ;;  %v1850_v55 = vsel %vm4833_vm6, %v4514_v1, %v1847_v20 }
 0x7a2   :  { %v1926_v10 = vadd.s32 536870912, %v1925_v28  ;;  %v1981_v48 = vshrl.u32 %v1980_v9, 5  ;;  %v1987_v27 = vor.u32 %v1986_v18, %v1985_v46  ;;  %3753 = vcosq.f32 %v1850_v55 }
 0x7a3   :  { %v1990_v33 = vor.u32 %v1989_v60, %v1988_v61  ;;  %v1993_v16 = vor.u32 %v1992_v44, %v1991_v24  ;;  %v1996_v15 = vor.u32 %v1995_v12, %v1994_v53  ;;  %3755 = vsinq.f32 %v1850_v55 }
 0x7a4   :  { %v4863_v41 = vshrl.u32 %v1926_v10, 30  ;;  %v1997_v25 = vshll.u32 %v3808_v37, %v1982_v19  ;;  %v1998_v7 = vshrl.u32 %v3809_v51, %v1983_v32  ;;  %v1851_v3 = vsel %vm4833_vm6, 0, %v1849_v52 }
 0x7a5   :  { %v1976_v40 = vor.u32 8388608, %v1975_v22  ;;  %v1984_v59 = vshrl.u32 %v3804_v31, %v1983_v32  ;;  %vm2000_vm9 = vcmp.lt.s32.totalorder %v1981_v48, 1  ;;  %vm2003_vm10 = vcmp.lt.s32.totalorder %v1981_v48, 4 }
 0x7a6   :  { %v1928_v9 = vshll.u32 %v4863_v41, 30  ;;  %v1999_v43 = vor.u32 %v1998_v7, %v1997_v25  ;;  %vm2002_vm11 = vcmp.lt.s32.totalorder %v1981_v48, 3  ;;  %v2005_v26 = vsel %vm2003_vm10, %v1993_v16, 2102212464 }
 0x7a7   :  { %v2008_v35 = vsel %vm2000_vm9, %v1987_v27, %v1990_v33  ;;  %v2009_v0 = vsel %vm2003_vm10, %v1996_v15, 920167782  ;;  %vm2001_vm12 = vcmp.lt.s32.totalorder %v1981_v48, 2  ;;  %v2012_v46 = vsel %vm2000_vm9, %v1990_v33, %v1993_v16 }
 0x7a8   :  { %v4871_v29 = vsub.s32 %v1925_v28, %v1928_v9  ;;  %v2010_v19 = vsel %vm2002_vm11, %v1993_v16, %v2009_v0  ;;  %v1855_v61 = vand.u32 3, %v1851_v3  ;;  %v2013_v22 = vsel %vm2003_vm10, %v1999_v43, 1326507024 }
 0x7a9   :  { %v2011_v14 = vsel %vm2001_vm12, %v2008_v35, %v2010_v19  ;;  %v2016_v52 = vshll.u32 %v1976_v40, 8  ;;  %v2004_v18 = vsel %vm2000_vm9, %v1984_v59, %v1987_v27  ;;  %v2006_v60 = vsel %vm2002_vm11, %v1990_v33, %v2005_v26 }
 0x7aa   :  { %v1931_v32 = vsub.s32 0, %v4871_v29  ;;  %v2014_v24 = vsel %vm2002_vm11, %v1996_v15, %v2013_v22  ;;  %v2074_v28 = vand.u32 2139095040, %v4634_v47  ;;  %vm1854_vm13 = vweird.f32 %v4514_v1 }
 0x7ab   :  { %v2015_v20 = vsel %vm2001_vm12, %v2012_v46, %v2014_v24  ;;  %v4876_v44 = vmul.u32.u64.low %v2016_v52, %v2011_v14  ;;  %v4877_v53 = vmul.u32.u64.high %v2016_v52, %v2011_v14, %v4876_v44  ;;  %v2897_v12 = vmax.f32 %v4514_v1, 0.0 }
 0x7ac   :  { %v3052_v55 = vmin.u32 %v1931_v32, %v4871_v29  ;;  %v3754_v10 = vpop.eup %3753  ;;  %vm1856_vm14 = vcmp.lt.s32.totalorder %v1855_v61, 2  ;;  %v4884_v16 = vmul.u32.u64.low %v2016_v52, %v2015_v20  ;;  %v4885_v27 = vmul.u32.u64.high %v2016_v52, %v2015_v20, %v4884_v16 }
 0x7ad   :  { %v2075_v33 = vshrl.u32 %v2074_v28, 23  ;;  %v3756_v15 = vpop.eup %3755  ;;  %vm1857_vm15 = vcmp.eq.s32.totalorder %v1855_v61, 0  ;;  %v1861_v25 = vxor.u32 2147483648, %v3754_v10  ;;  %v2007_v3 = vsel %vm2001_vm12, %v2004_v18, %v2006_v60 }
 0x7ae   :  { %v1933_v7 = vclz %v3052_v55  ;;  %v1858_v40 = vxor.u32 2147483648, %v3756_v15  ;;  %vm1860_vm0 = vcmp.eq.s32.totalorder %v1855_v61, 2  ;;  %v2026_v59 = vadd.s32 1, %v4877_v53  ;;  %v4901_v61 = vpop.f32.mrb[80].mxu0 }
 0x7af   :  { %v3059_v9 = vadd.s32 4294967169, %v2075_v33  ;;  %v1862_v43 = vsel %vm1860_vm0, %v1861_v25, %v3756_v15  ;;  %v1951_v35 = vsub.s32 4, %v4863_v41  ;;  %v2071_v0 = vand.u32 2147483647, %v4634_v47 }
 0x7b0   :  { %v3053_v26 = vadd.s32 4294967294, %v1933_v7  ;;  %v1859_v19 = vsel %vm1857_vm15, %v3754_v10, %v1858_v40  ;;  %v2023_v46 = vmul.u32 %v2016_v52, %v2007_v3  ;;  %vm2025_vm2 = vc.u32 %v4885_v27, %v4876_v44 }
 0x7b1   :  { %v2081_v14 = vadd.s32 1, %v3059_v9  ;;  %v1863_v48 = vsel %vm1856_vm14, %v1859_v19, %v1862_v43  ;;  %vm1867_vm3 = vcmp.lt.s32.totalorder %v4626_v23, 0  ;;  %v2027_v22 = vsel %vm2025_vm2, %v2026_v59, %v4877_v53 }
 0x7b2   :  { %vm3054_vm4 = vcmp.lt.s32.totalorder %v3053_v26, 0  ;;  %v1864_v32 = vsel %vm1854_vm13, nan, %v1863_v48  ;;  %v2028_v60 = vadd.s32 %v2027_v22, %v2023_v46  ;;  %v1921_v52 = vadd.s32 %v4807_v21, %v4820_v34  ;;  %v3552_v21 = vpop.f32.mrb[81].mxu0 }
 0x7b3   :  { %v1936_v18 = vsel %vm3054_vm4, 0, %v3053_v26  ;;  %vm2082_vm5 = vcmp.gt.s32.totalorder %v2081_v14, 0  ;;  %v2911_v24 = vsel %vm2908_vm8, %v1864_v32, %v2897_v12  ;;  %v4910_v1 = vsel %vm1867_vm3, %v1951_v35, %v4863_v41 }
 0x7b4   :  { %v1937_v20 = vsub.s32 32, %v1936_v18  ;;  %v1941_v28 = vsub.s32 4294967266, %v1936_v18  ;;  %2924 = vst.msk [vmem:[%s5624_s8 + $0x10] sm:$0xff] %vm86_vm1, %v2911_v24  ;;  %v2029_v53 = vadd.s32 536870912, %v2028_v60  ;;  %v2078_v12 = vand.u32 8388607, %v2071_v0 }
 0x7b5   :  { %v2083_v55 = vsel %vm2082_vm5, %v2081_v14, 0  ;;  %v1938_v34 = vshll.u32 %v4871_v29, %v1936_v18  ;;  %v4917_v15 = vmul.f32 %v4446_v50, %v4073_v49  ;;  %v4921_v25 = vmul.f32 %v4451_v54, %v4080_v56 }
 0x7b6   :  { %v1939_v10 = vshrl.u32 %v1921_v52, %v1937_v20  ;;  %v1942_v16 = vadd.s32 127, %v1941_v28  ;;  %v2085_v33 = vand.u32 31, %v2083_v55  ;;  %v4925_v41 = vmul.f32 %v4456_v6, %v4084_v58 }
 0x7b7   :  { %v4927_v7 = vshrl.u32 %v2029_v53, 30  ;;  %v5636_v3 = vand.u32 2147483647, %v4626_v23  ;;  %v2079_v54 = vor.u32 8388608, %v2078_v12  ;;  %v2177_v58 = vand.u32 2139095040, %v4637_v45 }
 0x7b8   :  { %v1940_v40 = vor.u32 %v1939_v10, %v1938_v34  ;;  %v1943_v59 = vshll.u32 %v1942_v16, 23  ;;  %v2086_v49 = vsub.s32 32, %v2085_v33  ;;  %v2088_v9 = vshll.u32 %v3804_v31, %v2085_v33 }
 0x7b9   :  { %vm4931_vm6 = vcmp.le.f32.partialorder %v5636_v3, 0.7853982  ;;  %v2031_v50 = vshll.u32 %v4927_v7, 30  ;;  %v2091_v26 = vshll.u32 %v3805_v17, %v2085_v33  ;;  %v2094_v46 = vshll.u32 %v3806_v36, %v2085_v33 }
 0x7ba   :  { %v1954_v56 = vsel %vm4931_vm6, 0, %v4910_v1  ;;  %v1944_v6 = vor.u32 4788187, %v1943_v59  ;;  %v2089_v43 = vshrl.u32 %v3805_v17, %v2086_v49  ;;  %v2092_v19 = vshrl.u32 %v3806_v36, %v2086_v49 }
 0x7bb   :  { %v4943_v35 = vsub.s32 %v2028_v60, %v2031_v50  ;;  %v2095_v14 = vshrl.u32 %v3807_v42, %v2086_v49  ;;  %v1947_v22 = vcvt.s32.f32 %v1940_v40  ;;  %v2084_v32 = vshrl.u32 %v2083_v55, 5 }
 0x7bc   :  { %v1945_v48 = vand.u32 2147483647, %v1944_v6  ;;  %v2090_v18 = vor.u32 %v2089_v43, %v2088_v9  ;;  %v2093_v52 = vor.u32 %v2092_v19, %v2091_v26  ;;  %v2097_v28 = vshll.u32 %v3807_v42, %v2085_v33 }
 0x7bd   :  { %v2034_v24 = vsub.s32 0, %v4943_v35  ;;  %v2096_v20 = vor.u32 %v2095_v14, %v2094_v46  ;;  %v2098_v60 = vshrl.u32 %v3808_v37, %v2086_v49  ;;  %v2100_v12 = vshll.u32 %v3808_v37, %v2085_v33 }
 0x7be   :  { %v1948_v53 = vmul.f32 %v1947_v22, %v1945_v48  ;;  %v2101_v21 = vshrl.u32 %v3809_v51, %v2086_v49  ;;  %v4954_v10 = vshll.u32 %v2079_v54, 8  ;;  %v2174_v55 = vand.u32 2147483647, %v4637_v45 }
 0x7bf   :  { %v3056_v34 = vmin.u32 %v2034_v24, %v4943_v35  ;;  %v2178_v16 = vshrl.u32 %v2177_v58, 23  ;;  %v2087_v40 = vshrl.u32 %v3804_v31, %v2086_v49  ;;  %v2099_v59 = vor.u32 %v2098_v60, %v2097_v28 }
 0x7c0   :  { %v1949_v3 = vxor.u32 2147483648, %v1948_v53  ;;  %v2102_v50 = vor.u32 %v2101_v21, %v2100_v12  ;;  %vm2103_vm7 = vcmp.lt.s32.totalorder %v2084_v32, 1  ;;  %vm2104_vm9 = vcmp.lt.s32.totalorder %v2084_v32, 2 }
 0x7c1   :  { %v2036_v6 = vclz %v3056_v34  ;;  %vm2106_vm10 = vcmp.lt.s32.totalorder %v2084_v32, 4  ;;  %vm2105_vm11 = vcmp.lt.s32.totalorder %v2084_v32, 3  ;;  %v2111_v54 = vsel %vm2103_vm7, %v2090_v18, %v2093_v52 }
 0x7c2   :  { %v1950_v33 = vsel %vm1867_vm3, %v1949_v3, %v1948_v53  ;;  %v2108_v9 = vsel %vm2106_vm10, %v2096_v20, 2102212464  ;;  %vm1970_vm12 = vcmp.lt.s32.totalorder %v4630_v30, 0  ;;  %v2107_v43 = vsel %vm2103_vm7, %v2087_v40, %v2090_v18 }
 0x7c3   :  { %v1953_v58 = vsel %vm4931_vm6, %v4626_v23, %v1950_v33  ;;  %v3057_v49 = vadd.s32 4294967294, %v2036_v6  ;;  %v2112_v26 = vsel %vm2106_vm10, %v2099_v59, 920167782  ;;  %v2109_v19 = vsel %vm2105_vm11, %v2093_v52, %v2108_v9 }
 0x7c4   :  { %3757 = vcosq.f32 %v1953_v58  ;;  %v2113_v46 = vsel %vm2105_vm11, %v2096_v20, %v2112_v26  ;;  %v2115_v14 = vsel %vm2103_vm7, %v2093_v52, %v2096_v20  ;;  %v2116_v22 = vsel %vm2106_vm10, %v2102_v50, 1326507024 }
 0x7c5   :  { %3759 = vsinq.f32 %v1953_v58  ;;  %vm3058_vm13 = vcmp.lt.s32.totalorder %v3057_v49, 0  ;;  %v2114_v48 = vsel %vm2104_vm9, %v2111_v54, %v2113_v46  ;;  %v2117_v28 = vsel %vm2105_vm11, %v2099_v59, %v2116_v22 }
 0x7c6   :  { %v2039_v24 = vsel %vm3058_vm13, 0, %v3057_v49  ;;  %v4972_v53 = vmul.u32.u64.low %v4954_v10, %v2114_v48  ;;  %v4973_v18 = vmul.u32.u64.high %v4954_v10, %v2114_v48, %v4972_v53  ;;  %v2024_v60 = vadd.s32 %v4876_v44, %v4885_v27  ;;  %v5004_v49 = vpop.f32.mrb[82].mxu0 }
 0x7c7   :  { %v2040_v12 = vsub.s32 32, %v2039_v24  ;;  %v2044_v21 = vsub.s32 4294967266, %v2039_v24  ;;  %v2118_v52 = vsel %vm2104_vm9, %v2115_v14, %v2117_v28  ;;  %v2054_v20 = vsub.s32 4, %v4927_v7  ;;  %v3555_v1 = vpop.f32.mrb[83].mxu0 }
 0x7c8   :  { %v4981_v34 = vmul.u32.u64.low %v4954_v10, %v2118_v52  ;;  %v4982_v3 = vmul.u32.u64.high %v4954_v10, %v2118_v52, %v4981_v34  ;;  %v3063_v40 = vadd.s32 4294967169, %v2178_v16  ;;  %v2041_v59 = vshll.u32 %v4943_v35, %v2039_v24 }
 0x7c9   :  { %v2042_v50 = vshrl.u32 %v2024_v60, %v2040_v12  ;;  %v2045_v6 = vadd.s32 127, %v2044_v21  ;;  %v2110_v33 = vsel %vm2104_vm9, %v2107_v43, %v2109_v19  ;;  %v2129_v9 = vadd.s32 1, %v4973_v18 }
 0x7ca   :  { %v2184_v44 = vadd.s32 1, %v3063_v40  ;;  %v4989_v27 = vadd.f32 %v4917_v15, %v4583_v62  ;;  %v4993_v54 = vadd.f32 %v4921_v25, %v4644_v57  ;;  %vm1957_vm14 = vweird.f32 %v4626_v23 }
 0x7cb   :  { %v1958_v35 = vand.u32 3, %v1954_v56  ;;  %v2043_v32 = vor.u32 %v2042_v50, %v2041_v59  ;;  %v2046_v16 = vshll.u32 %v2045_v6, 23  ;;  %v5002_v58 = vadd.f32 %v4925_v41, %v4715_v38 }
 0x7cc   :  { %v2055_v62 = vsel %vm1970_vm12, %v2054_v20, %v4927_v7  ;;  %v2126_v57 = vmul.u32 %v4954_v10, %v2110_v33  ;;  %vm2128_vm15 = vc.u32 %v4982_v3, %v4972_v53  ;;  %vm2185_vm0 = vcmp.gt.s32.totalorder %v2184_v44, 0 }
 0x7cd   :  { %v2898_v15 = vmax.f32 %v4626_v23, 0.0  ;;  %v2047_v25 = vor.u32 4788187, %v2046_v16  ;;  %v2130_v29 = vsel %vm2128_vm15, %v2129_v9, %v4973_v18  ;;  %v2186_v38 = vsel %vm2185_vm0, %v2184_v44, 0 }
 0x7ce   :  { %v3758_v41 = vpop.eup %3757  ;;  %vm5016_vm2 = vcmp.le.f32.partialorder %v1968_v4, 0.7853982  ;;  %v2131_v7 = vadd.s32 %v2130_v29, %v2126_v57  ;;  %v2181_v10 = vand.u32 8388607, %v2174_v55  ;;  %v2188_v43 = vand.u32 31, %v2186_v38 }
 0x7cf   :  { %v3760_v26 = vpop.eup %3759  ;;  %v1964_v19 = vxor.u32 2147483648, %v3758_v41  ;;  %v2048_v46 = vand.u32 2147483647, %v2047_v25  ;;  %v2050_v14 = vcvt.s32.f32 %v2043_v32  ;;  %v2057_v48 = vsel %vm5016_vm2, 0, %v2055_v62 }
 0x7d0   :  { %v1961_v22 = vxor.u32 2147483648, %v3760_v26  ;;  %vm1963_vm3 = vcmp.eq.s32.totalorder %v1958_v35, 2  ;;  %v2132_v24 = vadd.s32 536870912, %v2131_v7  ;;  %v2189_v28 = vsub.s32 32, %v2188_v43 }
 0x7d1   :  { %vm1959_vm4 = vcmp.lt.s32.totalorder %v1958_v35, 2  ;;  %vm1960_vm5 = vcmp.eq.s32.totalorder %v1958_v35, 0  ;;  %v1965_v4 = vsel %vm1963_vm3, %v1964_v19, %v3760_v26  ;;  %v2051_v18 = vmul.f32 %v2050_v14, %v2048_v46 }
 0x7d2   :  { %v1962_v60 = vsel %vm1960_vm5, %v3758_v41, %v1961_v22  ;;  %v5024_v12 = vand.u32 3, %v2057_v48  ;;  %v5026_v21 = vshrl.u32 %v2132_v24, 30  ;;  %v2192_v52 = vshrl.u32 %v3805_v17, %v2189_v28 }
 0x7d3   :  { %v1966_v20 = vsel %vm1959_vm4, %v1962_v60, %v1965_v4  ;;  %v2052_v34 = vxor.u32 2147483648, %v2051_v18  ;;  %v2182_v40 = vor.u32 8388608, %v2181_v10  ;;  %v2195_v59 = vshrl.u32 %v3806_v36, %v2189_v28 }
 0x7d4   :  { %v1967_v50 = vsel %vm1957_vm14, nan, %v1966_v20  ;;  %v2134_v6 = vshll.u32 %v5026_v21, 30  ;;  %v2191_v33 = vshll.u32 %v3804_v31, %v2188_v43  ;;  %v2198_v9 = vshrl.u32 %v3807_v42, %v2189_v28 }
 0x7d5   :  { %v2912_v44 = vsel %vm2908_vm8, %v1967_v50, %v2898_v15  ;;  %v2053_v35 = vsel %vm1970_vm12, %v2052_v34, %v2051_v18  ;;  %v2187_v32 = vshrl.u32 %v2186_v38, 5  ;;  %v2194_v16 = vshll.u32 %v3805_v17, %v2188_v43 }
 0x7d6   :  { %2925 = vst.msk [vmem:[%s5624_s8 + $0x18] sm:$0xff] %vm86_vm1, %v2912_v44  ;;  %v2056_v23 = vsel %vm5016_vm2, %v4630_v30, %v2053_v35  ;;  %v5046_v62 = vsub.s32 %v2131_v7, %v2134_v6  ;;  %v2193_v57 = vor.u32 %v2192_v52, %v2191_v33  ;;  %v2197_v1 = vshll.u32 %v3806_v36, %v2188_v43 }
 0x7d7   :  { %3761 = vcosq.f32 %v2056_v23  ;;  %v2196_v15 = vor.u32 %v2195_v59, %v2194_v16  ;;  %v2200_v25 = vshll.u32 %v3807_v42, %v2188_v43  ;;  %v2201_v29 = vshrl.u32 %v3808_v37, %v2189_v28 }
 0x7d8   :  { %3763 = vsinq.f32 %v2056_v23  ;;  %v2137_v38 = vsub.s32 0, %v5046_v62  ;;  %v2199_v41 = vor.u32 %v2198_v9, %v2197_v1  ;;  %v2204_v10 = vshrl.u32 %v3809_v51, %v2189_v28 }
 0x7d9   :  { %v2899_v56 = vmax.f32 %v4630_v30, 0.0  ;;  %v2202_v26 = vor.u32 %v2201_v29, %v2200_v25  ;;  %v2203_v7 = vshll.u32 %v3808_v37, %v2188_v43  ;;  %v2280_v19 = vand.u32 2139095040, %v4989_v27 }
 0x7da   :  { %v3060_v46 = vmin.u32 %v2137_v38, %v5046_v62  ;;  %v2190_v14 = vshrl.u32 %v3804_v31, %v2189_v28  ;;  %vm2206_vm6 = vcmp.lt.s32.totalorder %v2187_v32, 1  ;;  %v2222_v48 = vshll.u32 %v2182_v40, 8 }
 0x7db   :  { %v2205_v22 = vor.u32 %v2204_v10, %v2203_v7  ;;  %vm2208_vm7 = vcmp.lt.s32.totalorder %v2187_v32, 3  ;;  %vm2209_vm9 = vcmp.lt.s32.totalorder %v2187_v32, 4  ;;  %v2214_v24 = vsel %vm2206_vm6, %v2193_v57, %v2196_v15 }
 0x7dc   :  { %vm2063_vm10 = vcmp.eq.s32.totalorder %v5024_v12, 0  ;;  %v2139_v4 = vclz %v3060_v46  ;;  %v2211_v18 = vsel %vm2209_vm9, %v2199_v41, 2102212464  ;;  %v2215_v60 = vsel %vm2209_vm9, %v2202_v26, 920167782 }
 0x7dd   :  { %v2218_v43 = vsel %vm2206_vm6, %v2196_v15, %v2199_v41  ;;  %vm2062_vm11 = vcmp.lt.s32.totalorder %v5024_v12, 2  ;;  %vm2207_vm12 = vcmp.lt.s32.totalorder %v2187_v32, 2  ;;  %v2216_v52 = vsel %vm2208_vm7, %v2199_v41, %v2215_v60 }
 0x7de   :  { %v2219_v28 = vsel %vm2209_vm9, %v2205_v22, 1326507024  ;;  %v2281_v20 = vshrl.u32 %v2280_v19, 23  ;;  %vm2060_vm13 = vweird.f32 %v4630_v30  ;;  %v3061_v34 = vadd.s32 4294967294, %v2139_v4 }
 0x7df   :  { %v2210_v40 = vsel %vm2206_vm6, %v2190_v14, %v2193_v57  ;;  %v2217_v59 = vsel %vm2207_vm12, %v2214_v24, %v2216_v52  ;;  %v2220_v50 = vsel %vm2208_vm7, %v2202_v26, %v2219_v28  ;;  %v2212_v6 = vsel %vm2208_vm7, %v2196_v15, %v2211_v18 }
 0x7e0   :  { %v2221_v33 = vsel %vm2207_vm12, %v2218_v43, %v2220_v50  ;;  %v5069_v9 = vmul.u32.u64.low %v2222_v48, %v2217_v59  ;;  %v5070_v44 = vmul.u32.u64.high %v2222_v48, %v2217_v59, %v5069_v9  ;;  %vm3062_vm14 = vcmp.lt.s32.totalorder %v3061_v34, 0 }
 0x7e1   :  { %v5073_v35 = vmul.u32.u64.low %v2222_v48, %v2221_v33  ;;  %v5074_v16 = vmul.u32.u64.high %v2222_v48, %v2221_v33, %v5073_v35  ;;  %v3067_v23 = vadd.s32 4294967169, %v2281_v20  ;;  %v3762_v1 = vpop.eup %3761  ;;  %vm2066_vm15 = vcmp.eq.s32.totalorder %v5024_v12, 2 }
 0x7e2   :  { %v2127_v57 = vadd.s32 %v4972_v53, %v4982_v3  ;;  %v2142_v25 = vsel %vm3062_vm14, 0, %v3061_v34  ;;  %v2277_v15 = vand.u32 2147483647, %v4989_v27  ;;  %v3764_v29 = vpop.eup %3763  ;;  %v2067_v38 = vxor.u32 2147483648, %v3762_v1 }
 0x7e3   :  { %v2143_v41 = vsub.s32 32, %v2142_v25  ;;  %v2147_v10 = vsub.s32 4294967266, %v2142_v25  ;;  %v2213_v26 = vsel %vm2207_vm12, %v2210_v40, %v2212_v6  ;;  %v2064_v7 = vxor.u32 2147483648, %v3764_v29 }
 0x7e4   :  { %v2157_v19 = vsub.s32 4, %v5026_v21  ;;  %v2232_v46 = vadd.s32 1, %v5070_v44  ;;  %v2287_v14 = vadd.s32 1, %v3067_v23  ;;  %v2068_v22 = vsel %vm2066_vm15, %v2067_v38, %v3764_v29 }
 0x7e5   :  { %v2144_v24 = vshll.u32 %v5046_v62, %v2142_v25  ;;  %v2145_v4 = vshrl.u32 %v2127_v57, %v2143_v41  ;;  %v2148_v53 = vadd.s32 127, %v2147_v10  ;;  %v2065_v3 = vsel %vm2063_vm10, %v3762_v1, %v2064_v7 }
 0x7e6   :  { %v2229_v18 = vmul.u32 %v2222_v48, %v2213_v26  ;;  %vm2231_vm0 = vc.u32 %v5074_v16, %v5069_v9  ;;  %vm2288_vm2 = vcmp.gt.s32.totalorder %v2287_v14, 0  ;;  %v2069_v32 = vsel %vm2062_vm11, %v2065_v3, %v2068_v22 }
 0x7e7   :  { %v2146_v60 = vor.u32 %v2145_v4, %v2144_v24  ;;  %v2149_v43 = vshll.u32 %v2148_v53, 23  ;;  %v2233_v52 = vsel %vm2231_vm0, %v2232_v46, %v5070_v44  ;;  %v2070_v62 = vsel %vm2060_vm13, nan, %v2069_v32 }
 0x7e8   :  { %v2234_v28 = vadd.s32 %v2233_v52, %v2229_v18  ;;  %v2289_v20 = vsel %vm2288_vm2, %v2287_v14, 0  ;;  %v2913_v48 = vsel %vm2908_vm8, %v2070_v62, %v2899_v56  ;;  %vm2073_vm3 = vcmp.lt.s32.totalorder %v4634_v47, 0 }
 0x7e9   :  { %v2150_v34 = vor.u32 4788187, %v2149_v43  ;;  %v2284_v12 = vand.u32 8388607, %v2277_v15  ;;  %2926 = vst.msk [vmem:[%s5624_s8 + $0x20] sm:$0xff] %vm86_vm1, %v2913_v48  ;;  %v2158_v40 = vsel %vm2073_vm3, %v2157_v19, %v5026_v21  ;;  %v2291_v50 = vand.u32 31, %v2289_v20 }
 0x7ea   :  { %v2235_v59 = vadd.s32 536870912, %v2234_v28  ;;  %v2153_v6 = vcvt.s32.f32 %v2146_v60  ;;  %vm5108_vm4 = vcmp.le.f32.partialorder %v2071_v0, 0.7853982  ;;  %v2900_v33 = vmax.f32 %v4634_v47, 0.0 }
 0x7eb   :  { %v2151_v30 = vand.u32 2147483647, %v2150_v34  ;;  %v2292_v35 = vsub.s32 32, %v2291_v50  ;;  %v2160_v1 = vsel %vm5108_vm4, 0, %v2158_v40  ;;  %v2285_v21 = vor.u32 8388608, %v2284_v12 }
 0x7ec   :  { %v5113_v44 = vshrl.u32 %v2235_v59, 30  ;;  %v2290_v57 = vshrl.u32 %v2289_v20, 5  ;;  %v2294_v29 = vshll.u32 %v3804_v31, %v2291_v50  ;;  %v2297_v38 = vshll.u32 %v3805_v17, %v2291_v50 }
 0x7ed   :  { %v2154_v23 = vmul.f32 %v2153_v6, %v2151_v30  ;;  %v2295_v0 = vshrl.u32 %v3805_v17, %v2292_v35  ;;  %v2298_v10 = vshrl.u32 %v3806_v36, %v2292_v35  ;;  %v2301_v26 = vshrl.u32 %v3807_v42, %v2292_v35 }
 0x7ee   :  { %v2237_v25 = vshll.u32 %v5113_v44, 30  ;;  %v2304_v7 = vshrl.u32 %v3808_v37, %v2292_v35  ;;  %v2300_v46 = vshll.u32 %v3806_v36, %v2291_v50  ;;  %v2303_v14 = vshll.u32 %v3807_v42, %v2291_v50 }
 0x7ef   :  { %v2155_v41 = vxor.u32 2147483648, %v2154_v23  ;;  %v2307_v22 = vshrl.u32 %v3809_v51, %v2292_v35  ;;  %v2296_v4 = vor.u32 %v2295_v0, %v2294_v29  ;;  %v2299_v53 = vor.u32 %v2298_v10, %v2297_v38 }
 0x7f0   :  { %v5124_v19 = vsub.s32 %v2234_v28, %v2237_v25  ;;  %v2306_v3 = vshll.u32 %v3808_v37, %v2291_v50  ;;  %v2302_v60 = vor.u32 %v2301_v26, %v2300_v46  ;;  %v2305_v43 = vor.u32 %v2304_v7, %v2303_v14 }
 0x7f1   :  { %v2156_v24 = vsel %vm2073_vm3, %v2155_v41, %v2154_v23  ;;  %v5136_v52 = vand.u32 3, %v2160_v1  ;;  %v2325_v28 = vshll.u32 %v2285_v21, 8  ;;  %vm2309_vm5 = vcmp.lt.s32.totalorder %v2290_v57, 1 }
 0x7f2   :  { %v2159_v18 = vsel %vm5108_vm4, %v4634_v47, %v2156_v24  ;;  %v2240_v32 = vsub.s32 0, %v5124_v19  ;;  %v2308_v62 = vor.u32 %v2307_v22, %v2306_v3  ;;  %vm2312_vm6 = vcmp.lt.s32.totalorder %v2290_v57, 4 }
 0x7f3   :  { %3765 = vcosq.f32 %v2159_v18  ;;  %vm2310_vm7 = vcmp.lt.s32.totalorder %v2290_v57, 2  ;;  %vm2311_vm9 = vcmp.lt.s32.totalorder %v2290_v57, 3  ;;  %v2317_v48 = vsel %vm2309_vm5, %v2296_v4, %v2299_v53 }
 0x7f4   :  { %3767 = vsinq.f32 %v2159_v18  ;;  %v3064_v20 = vmin.u32 %v2240_v32, %v5124_v19  ;;  %v2318_v34 = vsel %vm2312_vm6, %v2305_v43, 920167782  ;;  %v2314_v40 = vsel %vm2312_vm6, %v2302_v60, 2102212464 }
 0x7f5   :  { %v2319_v59 = vsel %vm2311_vm9, %v2302_v60, %v2318_v34  ;;  %v2321_v50 = vsel %vm2309_vm5, %v2299_v53, %v2302_v60  ;;  %v2293_v30 = vshrl.u32 %v3804_v31, %v2292_v35  ;;  %v2322_v56 = vsel %vm2312_vm6, %v2308_v62, 1326507024 }
 0x7f6   :  { %v2242_v12 = vclz %v3064_v20  ;;  %v2320_v6 = vsel %vm2310_vm7, %v2317_v48, %v2319_v59  ;;  %v2383_v23 = vand.u32 2139095040, %v4993_v54  ;;  %v2323_v21 = vsel %vm2311_vm9, %v2305_v43, %v2322_v56 }
 0x7f7   :  { %v5144_v25 = vmul.u32.u64.low %v2325_v28, %v2320_v6  ;;  %v5145_v29 = vmul.u32.u64.high %v2325_v28, %v2320_v6, %v5144_v25  ;;  %v2313_v0 = vsel %vm2309_vm5, %v2293_v30, %v2296_v4  ;;  %v2315_v38 = vsel %vm2311_vm9, %v2299_v53, %v2314_v40 }
 0x7f8   :  { %v3065_v1 = vadd.s32 4294967294, %v2242_v12  ;;  %v2324_v41 = vsel %vm2310_vm7, %v2321_v50, %v2323_v21  ;;  %v2384_v10 = vshrl.u32 %v2383_v23, 23  ;;  %vm2163_vm10 = vweird.f32 %v4634_v47 }
 0x7f9   :  { %vm2176_vm11 = vcmp.lt.s32.totalorder %v4637_v45, 0  ;;  %v5152_v35 = vmul.u32.u64.low %v2325_v28, %v2324_v41  ;;  %v5153_v26 = vmul.u32.u64.high %v2325_v28, %v2324_v41, %v5152_v35  ;;  %vm2166_vm13 = vcmp.eq.s32.totalorder %v5136_v52, 0 }
 0x7fa   :  { %vm3066_vm12 = vcmp.lt.s32.totalorder %v3065_v1, 0  ;;  %v2230_v7 = vadd.s32 %v5069_v9, %v5074_v16  ;;  %v3071_v14 = vadd.s32 4294967169, %v2384_v10  ;;  %v2316_v4 = vsel %vm2310_vm7, %v2313_v0, %v2315_v38 }
 0x7fb   :  { %v2245_v46 = vsel %vm3066_vm12, 0, %v3065_v1  ;;  %v2335_v53 = vadd.s32 1, %v5145_v29  ;;  %vm2169_vm14 = vcmp.eq.s32.totalorder %v5136_v52, 2  ;;  %v2260_v18 = vsub.s32 4, %v5113_v44 }
 0x7fc   :  { %v2246_v22 = vsub.s32 32, %v2245_v46  ;;  %v2250_v24 = vsub.s32 4294967266, %v2245_v46  ;;  %v2380_v32 = vand.u32 2147483647, %v4993_v54  ;;  %v2390_v60 = vadd.s32 1, %v3071_v14 }
 0x7fd   :  { %v3766_v3 = vpop.eup %3765  ;;  %v2247_v9 = vshll.u32 %v5124_v19, %v2245_v46  ;;  %v2332_v34 = vmul.u32 %v2325_v28, %v2316_v4  ;;  %vm2334_vm15 = vc.u32 %v5153_v26, %v5144_v25  ;;  %vm2165_vm2 = vcmp.lt.s32.totalorder %v5136_v52, 2 }
 0x7fe   :  { %v3768_v43 = vpop.eup %3767  ;;  %v2170_v62 = vxor.u32 2147483648, %v3766_v3  ;;  %v2248_v16 = vshrl.u32 %v2230_v7, %v2246_v22  ;;  %v2251_v20 = vadd.s32 127, %v2250_v24  ;;  %vm2391_vm0 = vcmp.gt.s32.totalorder %v2390_v60, 0 }
 0x7ff   :  { %v2167_v48 = vxor.u32 2147483648, %v3768_v43  ;;  %v2336_v59 = vsel %vm2334_vm15, %v2335_v53, %v5145_v29  ;;  %v2392_v19 = vsel %vm2391_vm0, %v2390_v60, 0  ;;  %v2261_v28 = vsel %vm2176_vm11, %v2260_v18, %v5113_v44 }
 0x800   :  { %v2171_v57 = vsel %vm2169_vm14, %v2170_v62, %v3768_v43  ;;  %v2249_v12 = vor.u32 %v2248_v16, %v2247_v9  ;;  %v2252_v40 = vshll.u32 %v2251_v20, 23  ;;  %v2337_v30 = vadd.s32 %v2336_v59, %v2332_v34 }
 0x801   :  { %v2168_v50 = vsel %vm2166_vm13, %v3766_v3, %v2167_v48  ;;  %v2387_v23 = vand.u32 8388607, %v2380_v32  ;;  %v5177_v1 = vmul.f32 %v4461_v63, %v4091_v2  ;;  %v2394_v29 = vand.u32 31, %v2392_v19 }
 0x802   :  { %v2172_v6 = vsel %vm2165_vm2, %v2168_v50, %v2171_v57  ;;  %v2253_v56 = vor.u32 4788187, %v2252_v40  ;;  %v2338_v52 = vadd.s32 536870912, %v2337_v30  ;;  %vm5186_vm3 = vcmp.le.f32.partialorder %v2174_v55, 0.7853982 }
 0x803   :  { %v2173_v21 = vsel %vm2163_vm10, nan, %v2172_v6  ;;  %v2256_v41 = vcvt.s32.f32 %v2249_v12  ;;  %v2263_v2 = vsel %vm5186_vm3, 0, %v2261_v28  ;;  %v2901_v63 = vmax.f32 %v4637_v45, 0.0 }
 0x804   :  { %v2914_v0 = vsel %vm2908_vm8, %v2173_v21, %v2900_v33  ;;  %v2254_v38 = vand.u32 2147483647, %v2253_v56  ;;  %v5197_v47 = vshrl.u32 %v2338_v52, 30  ;;  %v2395_v33 = vsub.s32 32, %v2394_v29 }
 0x805   :  { %2927 = vst.msk [vmem:[%s5624_s8 + $0x28] sm:$0xff] %vm86_vm1, %v2914_v0  ;;  %v2388_v55 = vor.u32 8388608, %v2387_v23  ;;  %v5199_v35 = vshrl.u32 %v2392_v19, 5  ;;  %v2486_v7 = vand.u32 2139095040, %v5002_v58  ;;  %v2397_v14 = vshll.u32 %v3804_v31, %v2394_v29 }
 0x806   :  { %v2257_v10 = vmul.f32 %v2256_v41, %v2254_v38  ;;  %v2340_v46 = vshll.u32 %v5197_v47, 30  ;;  %v2398_v22 = vshrl.u32 %v3805_v17, %v2395_v33  ;;  %v2400_v24 = vshll.u32 %v3805_v17, %v2394_v29 }
 0x807   :  { %v2401_v53 = vshrl.u32 %v3806_v36, %v2395_v33  ;;  %v2404_v3 = vshrl.u32 %v3807_v42, %v2395_v33  ;;  %v2407_v18 = vshrl.u32 %v3808_v37, %v2395_v33  ;;  %v2403_v43 = vshll.u32 %v3806_v36, %v2394_v29 }
 0x808   :  { %v2258_v4 = vxor.u32 2147483648, %v2257_v10  ;;  %v5209_v60 = vsub.s32 %v2337_v30, %v2340_v46  ;;  %v2406_v62 = vshll.u32 %v3807_v42, %v2394_v29  ;;  %v2410_v9 = vshrl.u32 %v3809_v51, %v2395_v33 }
 0x809   :  { %v2399_v20 = vor.u32 %v2398_v22, %v2397_v14  ;;  %v2402_v48 = vor.u32 %v2401_v53, %v2400_v24  ;;  %v2409_v34 = vshll.u32 %v3808_v37, %v2394_v29  ;;  %v2405_v40 = vor.u32 %v2404_v3, %v2403_v43 }
 0x80a   :  { %v2259_v16 = vsel %vm2176_vm11, %v2258_v4, %v2257_v10  ;;  %v2343_v12 = vsub.s32 0, %v5209_v60  ;;  %v2408_v59 = vor.u32 %v2407_v18, %v2406_v62  ;;  %v5221_v50 = vand.u32 3, %v2263_v2 }
 0x80b   :  { %v2262_v57 = vsel %vm5186_vm3, %v4637_v45, %v2259_v16  ;;  %v2411_v30 = vor.u32 %v2410_v9, %v2409_v34  ;;  %v2487_v19 = vshrl.u32 %v2486_v7, 23  ;;  %vm2412_vm4 = vcmp.lt.s32.totalorder %v5199_v35, 1 }
 0x80c   :  { %3769 = vcosq.f32 %v2262_v57  ;;  %v3068_v6 = vmin.u32 %v2343_v12, %v5209_v60  ;;  %v2428_v56 = vshll.u32 %v2388_v55, 8  ;;  %v2396_v28 = vshrl.u32 %v3804_v31, %v2395_v33 }
 0x80d   :  { %3771 = vsinq.f32 %v2262_v57  ;;  %vm2414_vm5 = vcmp.lt.s32.totalorder %v5199_v35, 3  ;;  %vm2415_vm6 = vcmp.lt.s32.totalorder %v5199_v35, 4  ;;  %v2420_v23 = vsel %vm2412_vm4, %v2399_v20, %v2402_v48 }
 0x80e   :  { %v2345_v21 = vclz %v3068_v6  ;;  %v2417_v52 = vsel %vm2415_vm6, %v2405_v40, 2102212464  ;;  %v2421_v29 = vsel %vm2415_vm6, %v2408_v59, 920167782  ;;  %v2424_v0 = vsel %vm2412_vm4, %v2402_v48, %v2405_v40 }
 0x80f   :  { %vm2413_vm7 = vcmp.lt.s32.totalorder %v5199_v35, 2  ;;  %v2422_v44 = vsel %vm2414_vm5, %v2405_v40, %v2421_v29  ;;  %v2425_v38 = vsel %vm2415_vm6, %v2411_v30, 1326507024  ;;  %v3075_v41 = vadd.s32 4294967169, %v2487_v19 }
 0x810   :  { %vm2269_vm9 = vcmp.eq.s32.totalorder %v5221_v50, 0  ;;  %v3069_v2 = vadd.s32 4294967294, %v2345_v21  ;;  %v2416_v33 = vsel %vm2412_vm4, %v2396_v28, %v2399_v20  ;;  %v2423_v10 = vsel %vm2413_vm7, %v2420_v23, %v2422_v44 }
 0x811   :  { %v2426_v55 = vsel %vm2414_vm5, %v2408_v59, %v2425_v38  ;;  %vm2279_vm10 = vcmp.lt.s32.totalorder %v4989_v27, 0  ;;  %v2418_v7 = vsel %vm2414_vm5, %v2402_v48, %v2417_v52  ;;  %vm2266_vm11 = vweird.f32 %v4637_v45 }
 0x812   :  { %v2427_v46 = vsel %vm2413_vm7, %v2424_v0, %v2426_v55  ;;  %v5247_v14 = vmul.u32.u64.low %v2428_v56, %v2423_v10  ;;  %v5248_v22 = vmul.u32.u64.high %v2428_v56, %v2423_v10, %v5247_v14  ;;  %vm3070_vm12 = vcmp.lt.s32.totalorder %v3069_v2, 0 }
 0x813   :  { %v5252_v24 = vmul.u32.u64.low %v2428_v56, %v2427_v46  ;;  %v5253_v4 = vmul.u32.u64.high %v2428_v56, %v2427_v46, %v5252_v24  ;;  %v2493_v53 = vadd.s32 1, %v3075_v41  ;;  %vm2272_vm13 = vcmp.eq.s32.totalorder %v5221_v50, 2 }
 0x814   :  { %v2333_v3 = vadd.s32 %v5144_v25, %v5153_v26  ;;  %v2348_v18 = vsel %vm3070_vm12, 0, %v3069_v2  ;;  %v2483_v43 = vand.u32 2147483647, %v5002_v58  ;;  %v2419_v16 = vsel %vm2413_vm7, %v2416_v33, %v2418_v7 }
 0x815   :  { %v2349_v62 = vsub.s32 32, %v2348_v18  ;;  %v2353_v9 = vsub.s32 4294967266, %v2348_v18  ;;  %vm2494_vm14 = vcmp.gt.s32.totalorder %v2493_v53, 0  ;;  %v2363_v48 = vsub.s32 4, %v5197_v47 }
 0x816   :  { %v3770_v20 = vpop.eup %3769  ;;  %v2438_v34 = vadd.s32 1, %v5248_v22  ;;  %v2495_v57 = vsel %vm2494_vm14, %v2493_v53, 0  ;;  %v5265_v12 = vadd.f32 %v5177_v1, %v4802_v39  ;;  %v2350_v40 = vshll.u32 %v5209_v60, %v2348_v18 }
 0x817   :  { %v3772_v25 = vpop.eup %3771  ;;  %v2273_v26 = vxor.u32 2147483648, %v3770_v20  ;;  %v2351_v59 = vshrl.u32 %v2333_v3, %v2349_v62  ;;  %v2354_v30 = vadd.s32 127, %v2353_v9  ;;  %v2435_v35 = vmul.u32 %v2428_v56, %v2419_v16 }
 0x818   :  { %v2270_v19 = vxor.u32 2147483648, %v3772_v25  ;;  %vm2437_vm15 = vc.u32 %v5253_v4, %v5247_v14  ;;  %v2497_v6 = vand.u32 31, %v2495_v57  ;;  %vm2268_vm0 = vcmp.lt.s32.totalorder %v5221_v50, 2 }
 0x819   :  { %v2274_v28 = vsel %vm2272_vm13, %v2273_v26, %v3772_v25  ;;  %v2352_v23 = vor.u32 %v2351_v59, %v2350_v40  ;;  %v2355_v21 = vshll.u32 %v2354_v30, 23  ;;  %v2439_v39 = vsel %vm2437_vm15, %v2438_v34, %v5248_v22 }
 0x81a   :  { %v2271_v1 = vsel %vm2269_vm9, %v3770_v20, %v2270_v19  ;;  %v2440_v60 = vadd.s32 %v2439_v39, %v2435_v35  ;;  %v2498_v52 = vsub.s32 32, %v2497_v6  ;;  %vm5278_vm2 = vcmp.le.f32.partialorder %v2277_v15, 0.7853982 }
 0x81b   :  { %v2275_v29 = vsel %vm2268_vm0, %v2271_v1, %v2274_v28  ;;  %v2356_v0 = vor.u32 4788187, %v2355_v21  ;;  %v2364_v44 = vsel %vm2279_vm10, %v2363_v48, %v5197_v47  ;;  %v2359_v41 = vcvt.s32.f32 %v2352_v23 }
 0x81c   :  { %v2276_v38 = vsel %vm2266_vm11, nan, %v2275_v29  ;;  %v2441_v50 = vadd.s32 536870912, %v2440_v60  ;;  %v2490_v2 = vand.u32 8388607, %v2483_v43  ;;  %v2501_v10 = vshrl.u32 %v3805_v17, %v2498_v52 }
 0x81d   :  { %v2915_v15 = vsel %vm2908_vm8, %v2276_v38, %v2901_v63  ;;  %v2357_v33 = vand.u32 2147483647, %v2356_v0  ;;  %v2504_v55 = vshrl.u32 %v3806_v36, %v2498_v52  ;;  %v2496_v7 = vshrl.u32 %v2495_v57, 5 }
 0x81e   :  { %2928 = vst.msk [vmem:[%s5624_s8 + $0x30] sm:$0xff] %vm86_vm1, %v2915_v15  ;;  %v5298_v47 = vshrl.u32 %v2441_v50, 30  ;;  %v2500_v46 = vshll.u32 %v3804_v31, %v2497_v6  ;;  %v2507_v22 = vshrl.u32 %v3807_v42, %v2498_v52  ;;  %v2503_v63 = vshll.u32 %v3805_v17, %v2497_v6 }
 0x81f   :  { %v2360_v45 = vmul.f32 %v2359_v41, %v2357_v33  ;;  %v2509_v24 = vshll.u32 %v3807_v42, %v2497_v6  ;;  %v2510_v53 = vshrl.u32 %v3808_v37, %v2498_v52  ;;  %v2366_v3 = vsel %vm5278_vm2, 0, %v2364_v44 }
 0x820   :  { %v2443_v18 = vshll.u32 %v5298_v47, 30  ;;  %v2506_v62 = vshll.u32 %v3806_v36, %v2497_v6  ;;  %v2513_v9 = vshrl.u32 %v3809_v51, %v2498_v52  ;;  %v2502_v20 = vor.u32 %v2501_v10, %v2500_v46 }
 0x821   :  { %v2361_v16 = vxor.u32 2147483648, %v2360_v45  ;;  %v2505_v48 = vor.u32 %v2504_v55, %v2503_v63  ;;  %v2511_v34 = vor.u32 %v2510_v53, %v2509_v24  ;;  %v1541_v57 = vmul.f32 %v4466_v8, %v4095_v5 }
 0x822   :  { %v5312_v25 = vsub.s32 %v2440_v60, %v2443_v18  ;;  %v2508_v26 = vor.u32 %v2507_v22, %v2506_v62  ;;  %v2512_v40 = vshll.u32 %v3808_v37, %v2497_v6  ;;  %v5317_v30 = vand.u32 3, %v2366_v3 }
 0x823   :  { %v2362_v59 = vsel %vm2279_vm10, %v2361_v16, %v2360_v45  ;;  %v2491_v19 = vor.u32 8388608, %v2490_v2  ;;  %vm2515_vm3 = vcmp.lt.s32.totalorder %v2496_v7, 1  ;;  %vm2518_vm4 = vcmp.lt.s32.totalorder %v2496_v7, 4 }
 0x824   :  { %v2365_v35 = vsel %vm5278_vm2, %v4989_v27, %v2362_v59  ;;  %v2446_v28 = vsub.s32 0, %v5312_v25  ;;  %v2514_v23 = vor.u32 %v2513_v9, %v2512_v40  ;;  %v2499_v5 = vshrl.u32 %v3804_v31, %v2498_v52 }
 0x825   :  { %3773 = vcosq.f32 %v2365_v35  ;;  %v2523_v8 = vsel %vm2515_vm3, %v2502_v20, %v2505_v48  ;;  %v2524_v6 = vsel %vm2518_vm4, %v2511_v34, 920167782  ;;  %vm2517_vm5 = vcmp.lt.s32.totalorder %v2496_v7, 3 }
 0x826   :  { %3775 = vsinq.f32 %v2365_v35  ;;  %v3072_v21 = vmin.u32 %v2446_v28, %v5312_v25  ;;  %v2520_v39 = vsel %vm2518_vm4, %v2508_v26, 2102212464  ;;  %vm2516_vm6 = vcmp.lt.s32.totalorder %v2496_v7, 2 }
 0x827   :  { %v2525_v1 = vsel %vm2517_vm5, %v2508_v26, %v2524_v6  ;;  %v2527_v60 = vsel %vm2515_vm3, %v2505_v48, %v2508_v26  ;;  %v2531_v29 = vshll.u32 %v2491_v19, 8  ;;  %v2519_v0 = vsel %vm2515_vm3, %v2499_v5, %v2502_v20 }
 0x828   :  { %v2448_v56 = vclz %v3072_v21  ;;  %v2526_v52 = vsel %vm2516_vm6, %v2523_v8, %v2525_v1  ;;  %v2528_v44 = vsel %vm2518_vm4, %v2514_v23, 1326507024  ;;  %v2521_v38 = vsel %vm2517_vm5, %v2505_v48, %v2520_v39 }
 0x829   :  { %v2529_v41 = vsel %vm2517_vm5, %v2511_v34, %v2528_v44  ;;  %v5332_v50 = vmul.u32.u64.low %v2531_v29, %v2526_v52  ;;  %v5333_v2 = vmul.u32.u64.high %v2531_v29, %v2526_v52, %v5332_v50  ;;  %v2902_v15 = vmax.f32 %v4989_v27, 0.0 }
 0x82a   :  { %v3073_v33 = vadd.s32 4294967294, %v2448_v56  ;;  %v2530_v10 = vsel %vm2516_vm6, %v2527_v60, %v2529_v41  ;;  %v2589_v55 = vand.u32 2139095040, %v5265_v12  ;;  %vm5341_vm7 = vcmp.le.f32.partialorder %v2380_v32, 0.7853982 }
 0x82b   :  { %vm2382_vm9 = vcmp.lt.s32.totalorder %v4993_v54, 0  ;;  %v2466_v22 = vsub.s32 4, %v5298_v47  ;;  %v5347_v45 = vmul.u32.u64.low %v2531_v29, %v2530_v10  ;;  %v5348_v63 = vmul.u32.u64.high %v2531_v29, %v2530_v10, %v5347_v45 }
 0x82c   :  { %vm2369_vm10 = vweird.f32 %v4989_v27  ;;  %vm2375_vm11 = vcmp.eq.s32.totalorder %v5317_v30, 2  ;;  %vm3074_vm12 = vcmp.lt.s32.totalorder %v3073_v33, 0  ;;  %v2522_v24 = vsel %vm2516_vm6, %v2519_v0, %v2521_v38 }
 0x82d   :  { %v2590_v53 = vshrl.u32 %v2589_v55, 23  ;;  %v2451_v3 = vsel %vm3074_vm12, 0, %v3073_v33  ;;  %v2541_v32 = vadd.s32 1, %v5333_v2  ;;  %v2586_v18 = vand.u32 2147483647, %v5265_v12 }
 0x82e   :  { %v5356_v62 = vadd.f32 %v1541_v57, %v4901_v61  ;;  %v2436_v9 = vadd.s32 %v5247_v14, %v5253_v4  ;;  %v2452_v16 = vsub.s32 32, %v2451_v3  ;;  %v2456_v20 = vsub.s32 4294967266, %v2451_v3 }
 0x82f   :  { %v3079_v48 = vadd.s32 4294967169, %v2590_v53  ;;  %v3774_v34 = vpop.eup %3773  ;;  %v2453_v26 = vshll.u32 %v5312_v25, %v2451_v3  ;;  %v2467_v7 = vsel %vm2382_vm9, %v2466_v22, %v5298_v47  ;;  %v2538_v40 = vmul.u32 %v2531_v29, %v2522_v24 }
 0x830   :  { %vm2540_vm13 = vc.u32 %v5348_v63, %v5332_v50  ;;  %v3776_v59 = vpop.eup %3775  ;;  %v2376_v61 = vxor.u32 2147483648, %v3774_v34  ;;  %v2454_v57 = vshrl.u32 %v2436_v9, %v2452_v16  ;;  %v2457_v19 = vadd.s32 127, %v2456_v20 }
 0x831   :  { %v2542_v14 = vsel %vm2540_vm13, %v2541_v32, %v5333_v2  ;;  %v2373_v4 = vxor.u32 2147483648, %v3776_v59  ;;  %v2593_v28 = vand.u32 8388607, %v2586_v18  ;;  %v2596_v25 = vadd.s32 1, %v3079_v48 }
 0x832   :  { %v2543_v35 = vadd.s32 %v2542_v14, %v2538_v40  ;;  %vm2372_vm14 = vcmp.eq.s32.totalorder %v5317_v30, 0  ;;  %v2377_v47 = vsel %vm2375_vm11, %v2376_v61, %v3776_v59  ;;  %v2455_v23 = vor.u32 %v2454_v57, %v2453_v26 }
 0x833   :  { %v2458_v5 = vshll.u32 %v2457_v19, 23  ;;  %vm2371_vm15 = vcmp.lt.s32.totalorder %v5317_v30, 2  ;;  %v2374_v8 = vsel %vm2372_vm14, %v3774_v34, %v2373_v4  ;;  %vm2597_vm0 = vcmp.gt.s32.totalorder %v2596_v25, 0 }
 0x834   :  { %v2544_v6 = vadd.s32 536870912, %v2543_v35  ;;  %v2378_v21 = vsel %vm2371_vm15, %v2374_v8, %v2377_v47  ;;  %v2469_v1 = vsel %vm5341_vm7, 0, %v2467_v7  ;;  %v2598_v60 = vsel %vm2597_vm0, %v2596_v25, 0 }
 0x835   :  { %v2459_v39 = vor.u32 4788187, %v2458_v5  ;;  %v2379_v29 = vsel %vm2369_vm10, nan, %v2378_v21  ;;  %v2594_v0 = vor.u32 8388608, %v2593_v28  ;;  %v2600_v52 = vand.u32 31, %v2598_v60 }
 0x836   :  { %v5377_v56 = vshrl.u32 %v2544_v6, 30  ;;  %v2916_v44 = vsel %vm2908_vm8, %v2379_v29, %v2902_v15  ;;  %v2462_v30 = vcvt.s32.f32 %v2455_v23  ;;  %v5382_v41 = vmul.f32 %v4471_v13, %v4106_v11 }
 0x837   :  { %v2460_v38 = vand.u32 2147483647, %v2459_v39  ;;  %2929 = vst.msk [vmem:[%s5624_s8 + $0x38] sm:$0xff] %vm86_vm1, %v2916_v44  ;;  %v2601_v2 = vsub.s32 32, %v2600_v52  ;;  %v5389_v10 = vand.u32 3, %v2469_v1  ;;  %v2903_v55 = vmax.f32 %v4993_v54, 0.0 }
 0x838   :  { %v2546_v27 = vshll.u32 %v5377_v56, 30  ;;  %v2692_v15 = vand.u32 2139095040, %v5356_v62  ;;  %v2599_v45 = vshrl.u32 %v2598_v60, 5  ;;  %v5396_v13 = vshll.u32 %v2594_v0, 8 }
 0x839   :  { %v2463_v33 = vmul.f32 %v2462_v30, %v2460_v38  ;;  %v2604_v11 = vshrl.u32 %v3805_v17, %v2601_v2  ;;  %v2603_v53 = vshll.u32 %v3804_v31, %v2600_v52  ;;  %v2607_v3 = vshrl.u32 %v3806_v36, %v2601_v2 }
 0x83a   :  { %v5393_v22 = vsub.s32 %v2543_v35, %v2546_v27  ;;  %v2610_v32 = vshrl.u32 %v3807_v42, %v2601_v2  ;;  %v2606_v16 = vshll.u32 %v3805_v17, %v2600_v52  ;;  %v2609_v20 = vshll.u32 %v3806_v36, %v2600_v52 }
 0x83b   :  { %v2464_v24 = vxor.u32 2147483648, %v2463_v33  ;;  %v2613_v48 = vshrl.u32 %v3808_v37, %v2601_v2  ;;  %v2605_v26 = vor.u32 %v2604_v11, %v2603_v53  ;;  %v2612_v7 = vshll.u32 %v3807_v42, %v2600_v52 }
 0x83c   :  { %v2549_v9 = vsub.s32 0, %v5393_v22  ;;  %v2693_v40 = vshrl.u32 %v2692_v15, 23  ;;  %v2608_v57 = vor.u32 %v2607_v3, %v2606_v16  ;;  %v2611_v19 = vor.u32 %v2610_v32, %v2609_v20 }
 0x83d   :  { %v2465_v34 = vsel %vm2382_vm9, %v2464_v24, %v2463_v33  ;;  %v2614_v14 = vor.u32 %v2613_v48, %v2612_v7  ;;  %v2615_v4 = vshll.u32 %v3808_v37, %v2600_v52  ;;  %v2616_v35 = vshrl.u32 %v3809_v51, %v2601_v2 }
 0x83e   :  { %v2468_v59 = vsel %vm5341_vm7, %v4993_v54, %v2465_v34  ;;  %v3076_v61 = vmin.u32 %v2549_v9, %v5393_v22  ;;  %v2602_v25 = vshrl.u32 %v3804_v31, %v2601_v2  ;;  %vm2618_vm2 = vcmp.lt.s32.totalorder %v2599_v45, 1 }
 0x83f   :  { %3777 = vcosq.f32 %v2468_v59  ;;  %v2617_v47 = vor.u32 %v2616_v35, %v2615_v4  ;;  %vm2619_vm3 = vcmp.lt.s32.totalorder %v2599_v45, 2  ;;  %vm2620_vm4 = vcmp.lt.s32.totalorder %v2599_v45, 3 }
 0x840   :  { %3779 = vsinq.f32 %v2468_v59  ;;  %v2551_v28 = vclz %v3076_v61  ;;  %vm2621_vm5 = vcmp.lt.s32.totalorder %v2599_v45, 4  ;;  %v2626_v5 = vsel %vm2618_vm2, %v2605_v26, %v2608_v57 }
 0x841   :  { %v2623_v23 = vsel %vm2621_vm5, %v2611_v19, 2102212464  ;;  %v2627_v8 = vsel %vm2621_vm5, %v2614_v14, 920167782  ;;  %v2622_v6 = vsel %vm2618_vm2, %v2602_v25, %v2605_v26  ;;  %v2630_v39 = vsel %vm2618_vm2, %v2608_v57, %v2611_v19 }
 0x842   :  { %v3077_v46 = vadd.s32 4294967294, %v2551_v28  ;;  %v2628_v21 = vsel %vm2620_vm4, %v2611_v19, %v2627_v8  ;;  %v2631_v1 = vsel %vm2621_vm5, %v2617_v47, 1326507024  ;;  %vm2485_vm6 = vcmp.lt.s32.totalorder %v5002_v58, 0 }
 0x843   :  { %v2624_v60 = vsel %vm2620_vm4, %v2608_v57, %v2623_v23  ;;  %v2629_v29 = vsel %vm2619_vm3, %v2626_v5, %v2628_v21  ;;  %v2632_v0 = vsel %vm2620_vm4, %v2614_v14, %v2631_v1  ;;  %vm2474_vm9 = vcmp.lt.s32.totalorder %v5389_v10, 2 }
 0x844   :  { %vm3078_vm7 = vcmp.lt.s32.totalorder %v3077_v46, 0  ;;  %v2633_v44 = vsel %vm2619_vm3, %v2630_v39, %v2632_v0  ;;  %v5420_v38 = vmul.u32.u64.low %v5396_v13, %v2629_v29  ;;  %v5421_v30 = vmul.u32.u64.high %v5396_v13, %v2629_v29, %v5420_v38 }
 0x845   :  { %v2554_v52 = vsel %vm3078_vm7, 0, %v3077_v46  ;;  %vm2472_vm10 = vweird.f32 %v4993_v54  ;;  %vm2475_vm11 = vcmp.eq.s32.totalorder %v5389_v10, 0  ;;  %v2539_v27 = vadd.s32 %v5332_v50, %v5348_v63 }
 0x846   :  { %v2555_v2 = vsub.s32 32, %v2554_v52  ;;  %v2559_v33 = vsub.s32 4294967266, %v2554_v52  ;;  %v5429_v15 = vmul.u32.u64.low %v5396_v13, %v2633_v44  ;;  %v5430_v11 = vmul.u32.u64.high %v5396_v13, %v2633_v44, %v5429_v15 }
 0x847   :  { %v2689_v24 = vand.u32 2147483647, %v5356_v62  ;;  %v3083_v53 = vadd.s32 4294967169, %v2693_v40  ;;  %v2556_v3 = vshll.u32 %v5393_v22, %v2554_v52  ;;  %v2625_v16 = vsel %vm2619_vm3, %v2622_v6, %v2624_v60 }
 0x848   :  { %v2557_v32 = vshrl.u32 %v2539_v27, %v2555_v2  ;;  %v2560_v9 = vadd.s32 127, %v2559_v33  ;;  %v2569_v48 = vsub.s32 4, %v5377_v56  ;;  %v2644_v50 = vadd.s32 1, %v5421_v30 }
 0x849   :  { %v3778_v20 = vpop.eup %3777  ;;  %v2699_v63 = vadd.s32 1, %v3083_v53  ;;  %v5439_v34 = vadd.f32 %v5382_v41, %v5004_v49  ;;  %vm2478_vm12 = vcmp.eq.s32.totalorder %v5389_v10, 2  ;;  %v2641_v45 = vmul.u32 %v5396_v13, %v2625_v16 }
 0x84a   :  { %v3780_v26 = vpop.eup %3779  ;;  %v2479_v7 = vxor.u32 2147483648, %v3778_v20  ;;  %v2558_v40 = vor.u32 %v2557_v32, %v2556_v3  ;;  %v2561_v22 = vshll.u32 %v2560_v9, 23  ;;  %vm2643_vm13 = vc.u32 %v5430_v11, %v5420_v38 }
 0x84b   :  { %v2476_v59 = vxor.u32 2147483648, %v3780_v26  ;;  %vm2700_vm14 = vcmp.gt.s32.totalorder %v2699_v63, 0  ;;  %v2645_v19 = vsel %vm2643_vm13, %v2644_v50, %v5421_v30  ;;  %v2696_v49 = vand.u32 8388607, %v2689_v24 }
 0x84c   :  { %v2480_v61 = vsel %vm2478_vm12, %v2479_v7, %v3780_v26  ;;  %v2562_v57 = vor.u32 4788187, %v2561_v22  ;;  %v2570_v14 = vsel %vm2485_vm6, %v2569_v48, %v5377_v56  ;;  %v2646_v4 = vadd.s32 %v2645_v19, %v2641_v45 }
 0x84d   :  { %v2477_v41 = vsel %vm2475_vm11, %v3778_v20, %v2476_v59  ;;  %v2701_v13 = vsel %vm2700_vm14, %v2699_v63, 0  ;;  %v2565_v25 = vcvt.s32.f32 %v2558_v40  ;;  %vm5462_vm15 = vcmp.le.f32.partialorder %v2483_v43, 0.7853982 }
 0x84e   :  { %v2481_v35 = vsel %vm2474_vm9, %v2477_v41, %v2480_v61  ;;  %v2563_v28 = vand.u32 2147483647, %v2562_v57  ;;  %v2703_v47 = vand.u32 31, %v2701_v13  ;;  %v2647_v23 = vadd.s32 536870912, %v2646_v4 }
 0x84f   :  { %v2482_v46 = vsel %vm2472_vm10, nan, %v2481_v35  ;;  %v2572_v6 = vsel %vm5462_vm15, 0, %v2570_v14  ;;  %v2697_v54 = vor.u32 8388608, %v2696_v49  ;;  %v2702_v30 = vshrl.u32 %v2701_v13, 5 }
 0x850   :  { %v2917_v5 = vsel %vm2908_vm8, %v2482_v46, %v2903_v55  ;;  %v2566_v8 = vmul.f32 %v2565_v25, %v2563_v28  ;;  %v2704_v10 = vsub.s32 32, %v2703_v47  ;;  %v5472_v21 = vshrl.u32 %v2647_v23, 30 }
 0x851   :  { %2930 = vst.msk [vmem:[%s5624_s8 + $0x40] sm:$0xff] %vm86_vm1, %v2917_v5  ;;  %v2706_v39 = vshll.u32 %v3804_v31, %v2703_v47  ;;  %v2709_v29 = vshll.u32 %v3805_v17, %v2703_v47  ;;  %v2712_v27 = vshll.u32 %v3806_v36, %v2703_v47  ;;  %v2715_v2 = vshll.u32 %v3807_v42, %v2703_v47 }
 0x852   :  { %v2567_v55 = vxor.u32 2147483648, %v2566_v8  ;;  %v2707_v43 = vshrl.u32 %v3805_v17, %v2704_v10  ;;  %v2710_v1 = vshrl.u32 %v3806_v36, %v2704_v10  ;;  %v2649_v60 = vshll.u32 %v5472_v21, 30 }
 0x853   :  { %v2713_v0 = vshrl.u32 %v3807_v42, %v2704_v10  ;;  %v2716_v52 = vshrl.u32 %v3808_v37, %v2704_v10  ;;  %v2718_v9 = vshll.u32 %v3808_v37, %v2703_v47  ;;  %v2719_v16 = vshrl.u32 %v3809_v51, %v2704_v10 }
 0x854   :  { %v2568_v44 = vsel %vm2485_vm6, %v2567_v55, %v2566_v8  ;;  %v5488_v15 = vsub.s32 %v2646_v4, %v2649_v60  ;;  %v2708_v53 = vor.u32 %v2707_v43, %v2706_v39  ;;  %v2711_v3 = vor.u32 %v2710_v1, %v2709_v29 }
 0x855   :  { %v2571_v33 = vsel %vm5462_vm15, %v5002_v58, %v2568_v44  ;;  %v2717_v32 = vor.u32 %v2716_v52, %v2715_v2  ;;  %v2714_v48 = vor.u32 %v2713_v0, %v2712_v27  ;;  %v2576_v50 = vand.u32 3, %v2572_v6 }
 0x856   :  { %3781 = vcosq.f32 %v2571_v33  ;;  %v2652_v20 = vsub.s32 0, %v5488_v15  ;;  %v2904_v63 = vmax.f32 %v5002_v58, 0.0  ;;  %v2720_v26 = vor.u32 %v2719_v16, %v2718_v9 }
 0x857   :  { %3783 = vsinq.f32 %v2571_v33  ;;  %vm2721_vm0 = vcmp.lt.s32.totalorder %v2702_v30, 1  ;;  %vm2724_vm2 = vcmp.lt.s32.totalorder %v2702_v30, 4  ;;  %v2737_v40 = vshll.u32 %v2697_v54, 8 }
 0x858   :  { %v3080_v7 = vmin.u32 %v2652_v20, %v5488_v15  ;;  %vm2722_vm3 = vcmp.lt.s32.totalorder %v2702_v30, 2  ;;  %vm2723_vm4 = vcmp.lt.s32.totalorder %v2702_v30, 3  ;;  %v2729_v22 = vsel %vm2721_vm0, %v2708_v53, %v2711_v3 }
 0x859   :  { %v2730_v59 = vsel %vm2724_vm2, %v2717_v32, 920167782  ;;  %v2726_v61 = vsel %vm2724_vm2, %v2714_v48, 2102212464  ;;  %v2733_v19 = vsel %vm2721_vm0, %v2711_v3, %v2714_v48  ;;  %vm2577_vm5 = vcmp.lt.s32.totalorder %v2576_v50, 2 }
 0x85a   :  { %v2654_v45 = vclz %v3080_v7  ;;  %v2731_v57 = vsel %vm2723_vm4, %v2714_v48, %v2730_v59  ;;  %v2705_v49 = vshrl.u32 %v3804_v31, %v2704_v10  ;;  %v2734_v14 = vsel %vm2724_vm2, %v2720_v26, 1326507024 }
 0x85b   :  { %v2732_v41 = vsel %vm2722_vm3, %v2729_v22, %v2731_v57  ;;  %v2795_v4 = vand.u32 2139095040, %v5439_v34  ;;  %vm2575_vm6 = vweird.f32 %v5002_v58  ;;  %v2735_v35 = vsel %vm2723_vm4, %v2717_v32, %v2734_v14 }
 0x85c   :  { %v3081_v13 = vadd.s32 4294967294, %v2654_v45  ;;  %v5503_v28 = vmul.u32.u64.low %v2737_v40, %v2732_v41  ;;  %v5504_v25 = vmul.u32.u64.high %v2737_v40, %v2732_v41, %v5503_v28  ;;  %v2725_v47 = vsel %vm2721_vm0, %v2705_v49, %v2708_v53 }
 0x85d   :  { %v2727_v46 = vsel %vm2723_vm4, %v2711_v3, %v2726_v61  ;;  %v2736_v23 = vsel %vm2722_vm3, %v2733_v19, %v2735_v35  ;;  %v2796_v5 = vshrl.u32 %v2795_v4, 23  ;;  %vm2578_vm7 = vcmp.eq.s32.totalorder %v2576_v50, 0 }
 0x85e   :  { %vm3082_vm9 = vcmp.lt.s32.totalorder %v3081_v13, 0  ;;  %v5510_v56 = vmul.u32.u64.low %v2737_v40, %v2736_v23  ;;  %v5511_v8 = vmul.u32.u64.high %v2737_v40, %v2736_v23, %v5510_v56  ;;  %vm2581_vm10 = vcmp.eq.s32.totalorder %v2576_v50, 2 }
 0x85f   :  { %v2642_v6 = vadd.s32 %v5420_v38, %v5430_v11  ;;  %v2657_v54 = vsel %vm3082_vm9, 0, %v3081_v13  ;;  %v3087_v55 = vadd.s32 4294967169, %v2796_v5  ;;  %v2728_v29 = vsel %vm2722_vm3, %v2725_v47, %v2727_v46 }
 0x860   :  { %v3782_v10 = vpop.eup %3781  ;;  %v2658_v1 = vsub.s32 32, %v2657_v54  ;;  %v2662_v60 = vsub.s32 4294967266, %v2657_v54  ;;  %v2747_v52 = vadd.s32 1, %v5504_v25  ;;  %v2792_v44 = vand.u32 2147483647, %v5439_v34 }
 0x861   :  { %v3784_v39 = vpop.eup %3783  ;;  %v2582_v43 = vxor.u32 2147483648, %v3782_v10  ;;  %v2802_v27 = vadd.s32 1, %v3087_v55  ;;  %v2659_v33 = vshll.u32 %v5488_v15, %v2657_v54  ;;  %v2744_v11 = vmul.u32 %v2737_v40, %v2728_v29 }
 0x862   :  { %v2579_v0 = vxor.u32 2147483648, %v3784_v39  ;;  %v2660_v53 = vshrl.u32 %v2642_v6, %v2658_v1  ;;  %v2663_v3 = vadd.s32 127, %v2662_v60  ;;  %vm2746_vm11 = vc.u32 %v5511_v8, %v5503_v28 }
 0x863   :  { %v2583_v2 = vsel %vm2581_vm10, %v2582_v43, %v3784_v39  ;;  %vm2803_vm12 = vcmp.gt.s32.totalorder %v2802_v27, 0  ;;  %v2748_v16 = vsel %vm2746_vm11, %v2747_v52, %v5504_v25  ;;  %v2672_v40 = vsub.s32 4, %v5472_v21 }
 0x864   :  { %v2580_v38 = vsel %vm2578_vm7, %v3782_v10, %v2579_v0  ;;  %v2661_v32 = vor.u32 %v2660_v53, %v2659_v33  ;;  %v2664_v9 = vshll.u32 %v2663_v3, 23  ;;  %v2749_v48 = vadd.s32 %v2748_v16, %v2744_v11 }
 0x865   :  { %v2584_v30 = vsel %vm2577_vm5, %v2580_v38, %v2583_v2  ;;  %v2804_v15 = vsel %vm2803_vm12, %v2802_v27, 0  ;;  %v2799_v22 = vand.u32 8388607, %v2792_v44  ;;  %vm5536_vm13 = vcmp.le.f32.partialorder %v2586_v18, 0.7853982 }
 0x866   :  { %v2585_v20 = vsel %vm2575_vm6, nan, %v2584_v30  ;;  %v2665_v7 = vor.u32 4788187, %v2664_v9  ;;  %v2750_v50 = vadd.s32 536870912, %v2749_v48  ;;  %v2806_v59 = vand.u32 31, %v2804_v15 }
 0x867   :  { %v2918_v26 = vsel %vm2908_vm8, %v2585_v20, %v2904_v63  ;;  %v2668_v58 = vcvt.s32.f32 %v2661_v32  ;;  %vm2588_vm14 = vcmp.lt.s32.totalorder %v5265_v12, 0  ;;  %v2800_v41 = vor.u32 8388608, %v2799_v22 }
 0x868   :  { %2931 = vst.msk [vmem:[%s5624_s8 + $0x48] sm:$0xff] %vm86_vm1, %v2918_v26  ;;  %v2666_v45 = vand.u32 2147483647, %v2665_v7  ;;  %v5541_v63 = vshrl.u32 %v2750_v50, 30  ;;  %v2807_v57 = vsub.s32 32, %v2806_v59  ;;  %v2673_v49 = vsel %vm2588_vm14, %v2672_v40, %v5472_v21 }
 0x869   :  { %v2805_v14 = vshrl.u32 %v2804_v15, 5  ;;  %v2809_v13 = vshll.u32 %v3804_v31, %v2806_v59  ;;  %v2812_v35 = vshll.u32 %v3805_v17, %v2806_v59  ;;  %v2815_v21 = vshll.u32 %v3806_v36, %v2806_v59 }
 0x86a   :  { %v2669_v19 = vmul.f32 %v2668_v58, %v2666_v45  ;;  %v2752_v4 = vshll.u32 %v5541_v63, 30  ;;  %v2810_v18 = vshrl.u32 %v3805_v17, %v2807_v57  ;;  %v2813_v47 = vshrl.u32 %v3806_v36, %v2807_v57 }
 0x86b   :  { %v2816_v46 = vshrl.u32 %v3807_v42, %v2807_v57  ;;  %v2819_v23 = vshrl.u32 %v3808_v37, %v2807_v57  ;;  %v2818_v56 = vshll.u32 %v3807_v42, %v2806_v59  ;;  %v2822_v10 = vshrl.u32 %v3809_v51, %v2807_v57 }
 0x86c   :  { %v2670_v25 = vxor.u32 2147483648, %v2669_v19  ;;  %v2753_v5 = vsub.s32 %v2749_v48, %v2752_v4  ;;  %v2811_v54 = vor.u32 %v2810_v18, %v2809_v13  ;;  %v2814_v55 = vor.u32 %v2813_v47, %v2812_v35 }
 0x86d   :  { %v2821_v17 = vshll.u32 %v3808_v37, %v2806_v59  ;;  %v2817_v1 = vor.u32 %v2816_v46, %v2815_v21  ;;  %v2820_v60 = vor.u32 %v2819_v23, %v2818_v56  ;;  %v2675_v36 = vsel %vm5536_vm13, 0, %v2673_v49 }
 0x86e   :  { %v2671_v6 = vsel %vm2588_vm14, %v2670_v25, %v2669_v19  ;;  %v2755_v43 = vsub.s32 0, %v2753_v5  ;;  %v2840_v51 = vshll.u32 %v2800_v41, 8  ;;  %vm2824_vm15 = vcmp.lt.s32.totalorder %v2805_v14, 1 }
 0x86f   :  { %v2674_v39 = vsel %vm5536_vm13, %v5265_v12, %v2671_v6  ;;  %v2823_v42 = vor.u32 %v2822_v10, %v2821_v17  ;;  %vm2827_vm0 = vcmp.lt.s32.totalorder %v2805_v14, 4  ;;  %vm2825_vm2 = vcmp.lt.s32.totalorder %v2805_v14, 2 }
 0x870   :  { %3785 = vcosq.f32 %v2674_v39  ;;  %v3084_v29 = vmin.u32 %v2755_v43, %v2753_v5  ;;  %vm2826_vm3 = vcmp.lt.s32.totalorder %v2805_v14, 3  ;;  %v2832_v37 = vsel %vm2824_vm15, %v2811_v54, %v2814_v55 }
 0x871   :  { %3787 = vsinq.f32 %v2674_v39  ;;  %v2833_v0 = vsel %vm2827_vm0, %v2820_v60, 920167782  ;;  %v2829_v27 = vsel %vm2827_vm0, %v2817_v1, 2102212464  ;;  %v2836_v33 = vsel %vm2824_vm15, %v2814_v55, %v2817_v1 }
 0x872   :  { %v2757_v52 = vclz %v3084_v29  ;;  %v2834_v2 = vsel %vm2826_vm3, %v2817_v1, %v2833_v0  ;;  %v2808_v53 = vshrl.u32 %v3804_v31, %v2807_v57  ;;  %v2837_v38 = vsel %vm2827_vm0, %v2823_v42, 1326507024 }
 0x873   :  { %v2835_v3 = vsel %vm2825_vm2, %v2832_v37, %v2834_v2  ;;  %v2838_v30 = vsel %vm2826_vm3, %v2820_v60, %v2837_v38  ;;  %v2679_v16 = vand.u32 3, %v2675_v36  ;;  %v2830_v48 = vsel %vm2826_vm3, %v2814_v55, %v2829_v27 }
 0x874   :  { %v3085_v11 = vadd.s32 4294967294, %v2757_v52  ;;  %v5568_v32 = vmul.u32.u64.low %v2840_v51, %v2835_v3  ;;  %v5569_v9 = vmul.u32.u64.high %v2840_v51, %v2835_v3, %v5568_v32  ;;  %v2828_v20 = vsel %vm2824_vm15, %v2808_v53, %v2811_v54 }
 0x875   :  { %v2839_v15 = vsel %vm2825_vm2, %v2836_v33, %v2838_v30  ;;  %v2745_v31 = vadd.s32 %v5503_v28, %v5511_v8  ;;  %v2831_v59 = vsel %vm2825_vm2, %v2828_v20, %v2830_v48  ;;  %vm2681_vm5 = vcmp.eq.s32.totalorder %v2679_v16, 0 }
 0x876   :  { %vm3086_vm4 = vcmp.lt.s32.totalorder %v3085_v11, 0  ;;  %v5574_v26 = vmul.u32.u64.low %v2840_v51, %v2839_v15  ;;  %v5575_v7 = vmul.u32.u64.high %v2840_v51, %v2839_v15, %v5574_v26  ;;  %v2850_v45 = vadd.s32 1, %v5569_v9 }
 0x877   :  { %v2760_v40 = vsel %vm3086_vm4, 0, %v3085_v11  ;;  %vm2684_vm6 = vcmp.eq.s32.totalorder %v2679_v16, 2  ;;  %v2847_v13 = vmul.u32 %v2840_v51, %v2831_v59  ;;  %vm2680_vm9 = vcmp.lt.s32.totalorder %v2679_v16, 2 }
 0x878   :  { %v2761_v22 = vsub.s32 32, %v2760_v40  ;;  %v2765_v50 = vsub.s32 4294967266, %v2760_v40  ;;  %v2762_v19 = vshll.u32 %v2753_v5, %v2760_v40  ;;  %vm2849_vm7 = vc.u32 %v5575_v7, %v5568_v32 }
 0x879   :  { %v2851_v14 = vsel %vm2849_vm7, %v2850_v45, %v5569_v9  ;;  %vm2678_vm10 = vweird.f32 %v5265_v12  ;;  %v2905_v46 = vmax.f32 %v5265_v12, 0.0  ;;  %vm2691_vm11 = vcmp.lt.s32.totalorder %v5356_v62, 0 }
 0x87a   :  { %v3786_v58 = vpop.eup %3785  ;;  %v2763_v49 = vshrl.u32 %v2745_v31, %v2761_v22  ;;  %v2766_v41 = vadd.s32 127, %v2765_v50  ;;  %v2852_v25 = vadd.s32 %v2851_v14, %v2847_v13  ;;  %vm2690_vm12 = vcmp.le.f32.partialorder %v2689_v24, 0.7853982 }
 0x87b   :  { %v3788_v61 = vpop.eup %3787  ;;  %v2685_v57 = vxor.u32 2147483648, %v3786_v58  ;;  %v2775_v1 = vsub.s32 4, %v5541_v63  ;;  %v2848_v24 = vadd.s32 %v5568_v32, %v5575_v7  ;;  %vm2781_vm2 = vweird.f32 %v5356_v62 }
 0x87c   :  { %v2682_v4 = vxor.u32 2147483648, %v3788_v61  ;;  %v2764_v8 = vor.u32 %v2763_v49, %v2762_v19  ;;  %v2767_v18 = vshll.u32 %v2766_v41, 23  ;;  %v2853_v21 = vadd.s32 536870912, %v2852_v25 }
 0x87d   :  { %v2686_v28 = vsel %vm2684_vm6, %v2685_v57, %v3788_v61  ;;  %v2776_v51 = vsel %vm2691_vm11, %v2775_v1, %v5541_v63  ;;  %v2906_v32 = vmax.f32 %v5356_v62, 0.0  ;;  %vm2794_vm3 = vcmp.lt.s32.totalorder %v5439_v34, 0 }
 0x87e   :  { %v2683_v35 = vsel %vm2681_vm5, %v3786_v58, %v2682_v4  ;;  %v2768_v23 = vor.u32 4788187, %v2767_v18  ;;  %v2771_v6 = vcvt.s32.f32 %v2764_v8  ;;  %v2854_v54 = vshrl.u32 %v2853_v21, 30 }
 0x87f   :  { %v2687_v47 = vsel %vm2680_vm9, %v2683_v35, %v2686_v28  ;;  %v2778_v37 = vsel %vm2690_vm12, 0, %v2776_v51  ;;  %vm2793_vm4 = vcmp.le.f32.partialorder %v2792_v44, 0.7853982  ;;  %vm2884_vm7 = vweird.f32 %v5439_v34 }
 0x880   :  { %v2688_v5 = vsel %vm2678_vm10, nan, %v2687_v47  ;;  %v2769_v10 = vand.u32 2147483647, %v2768_v23  ;;  %v2855_v17 = vshll.u32 %v2854_v54, 30  ;;  %v2782_v52 = vand.u32 3, %v2778_v37 }
 0x881   :  { %v2919_v56 = vsel %vm2908_vm8, %v2688_v5, %v2905_v46  ;;  %v2907_v14 = vmax.f32 %v5439_v34, 0.0  ;;  %vm2934_vm9 = vcmask 519168  }
 0x882   :  { %2932 = vst.msk [vmem:[%s5624_s8 + $0x50] sm:$0xff] %vm86_vm1, %v2919_v56  ;;  %v2772_v55 = vmul.f32 %v2771_v6, %v2769_v10  ;;  %v2856_v43 = vsub.s32 %v2852_v25, %v2855_v17  ;;  %vm2787_vm14 = vcmp.eq.s32.totalorder %v2782_v52, 2  ;;  %vm2784_vm15 = vcmp.eq.s32.totalorder %v2782_v52, 0 }
 0x883   :  { %vm2783_vm0 = vcmp.lt.s32.totalorder %v2782_v52, 2 }
 0x884   :  { %v2773_v39 = vxor.u32 2147483648, %v2772_v55  ;;  %v2858_v36 = vsub.s32 0, %v2856_v43 }
 0x886   :  { %v2774_v12 = vsel %vm2691_vm11, %v2773_v39, %v2772_v55  ;;  %v3088_v42 = vmin.u32 %v2858_v36, %v2856_v43 }
 0x887   :  { %v2777_v60 = vsel %vm2690_vm12, %v5356_v62, %v2774_v12  ;;  %v2878_v62 = vsub.s32 4, %v2854_v54 }
 0x888   :  { %3789 = vcosq.f32 %v2777_v60  ;;  %v2860_v29 = vclz %v3088_v42 }
 0x889   :  { %3791 = vsinq.f32 %v2777_v60  ;;  %v2879_v57 = vsel %vm2794_vm3, %v2878_v62, %v2854_v54 }
 0x88a   :  { %v3089_v0 = vadd.s32 4294967294, %v2860_v29  ;;  %v2881_v19 = vsel %vm2793_vm4, 0, %v2879_v57 }
 0x88b   :  { %v2885_v49 = vand.u32 3, %v2881_v19 }
 0x88c   :  { %vm3090_vm13 = vcmp.lt.s32.totalorder %v3089_v0, 0 }
 0x88d   :  { %v2863_v27 = vsel %vm3090_vm13, 0, %v3089_v0  ;;  %vm2887_vm5 = vcmp.eq.s32.totalorder %v2885_v49, 0  ;;  %vm2886_vm6 = vcmp.lt.s32.totalorder %v2885_v49, 2 }
 0x88e   :  { %v2864_v2 = vsub.s32 32, %v2863_v27  ;;  %v2868_v33 = vsub.s32 4294967266, %v2863_v27  ;;  %v2865_v11 = vshll.u32 %v2856_v43, %v2863_v27 }
 0x890   :  { %v2866_v30 = vshrl.u32 %v2848_v24, %v2864_v2  ;;  %v2869_v9 = vadd.s32 127, %v2868_v33 }
 0x892   :  { %v3790_v53 = vpop.eup %3789  ;;  %v2867_v20 = vor.u32 %v2866_v30, %v2865_v11  ;;  %v2870_v48 = vshll.u32 %v2869_v9, 23 }
 0x893   :  { %v3792_v3 = vpop.eup %3791  ;;  %v2788_v38 = vxor.u32 2147483648, %v3790_v53 }
 0x894   :  { %v2785_v16 = vxor.u32 2147483648, %v3792_v3  ;;  %v2871_v7 = vor.u32 4788187, %v2870_v48  ;;  %v2874_v50 = vcvt.s32.f32 %v2867_v20 }
 0x895   :  { %v2789_v63 = vsel %vm2787_vm14, %v2788_v38, %v3792_v3 }
 0x896   :  { %v2786_v15 = vsel %vm2784_vm15, %v3790_v53, %v2785_v16  ;;  %v2872_v22 = vand.u32 2147483647, %v2871_v7 }
 0x897   :  { %v2790_v26 = vsel %vm2783_vm0, %v2786_v15, %v2789_v63 }
 0x898   :  { %v2791_v31 = vsel %vm2781_vm2, nan, %v2790_v26  ;;  %v2875_v59 = vmul.f32 %v2874_v50, %v2872_v22 }
 0x899   :  { %v2920_v40 = vsel %vm2908_vm8, %v2791_v31, %v2906_v32 }
 0x89a   :  { %2933 = vst.msk [vmem:[%s5624_s8 + $0x58] sm:$0xff] %vm86_vm1, %v2920_v40  ;;  %v2876_v45 = vxor.u32 2147483648, %v2875_v59  ;;  %vm2890_vm1 = vcmp.eq.s32.totalorder %v2885_v49, 2 }
 0x89c   :  { %v2877_v58 = vsel %vm2794_vm3, %v2876_v45, %v2875_v59 }
 0x89d   :  { %v2880_v61 = vsel %vm2793_vm4, %v5439_v34, %v2877_v58 }
 0x89e   :  { %3793 = vcosq.f32 %v2880_v61 }
 0x89f   :  { %3795 = vsinq.f32 %v2880_v61 }
 0x8a8   :  { %v3794_v41 = vpop.eup %3793 }
 0x8a9   :  { %v3796_v4 = vpop.eup %3795  ;;  %v2891_v13 = vxor.u32 2147483648, %v3794_v41 }
 0x8aa   :  { %v2888_v28 = vxor.u32 2147483648, %v3796_v4 }
 0x8ab   :  { %v2892_v8 = vsel %vm2890_vm1, %v2891_v13, %v3796_v4 }
 0x8ac   :  { %v2889_v18 = vsel %vm2887_vm5, %v3794_v41, %v2888_v28 }
 0x8ad   :  { %v2893_v44 = vsel %vm2886_vm6, %v2889_v18, %v2892_v8 }
 0x8ae   :  { %v2894_v35 = vsel %vm2884_vm7, nan, %v2893_v44 }
 0x8af   :  { %v2921_v25 = vsel %vm2908_vm8, %v2894_v35, %v2907_v14 }
 0x8b0   :  { %2935 = vst.msk [vmem:[%s5624_s8 + $0x60] sm:$0xf] %vm2934_vm9, %v2921_v25 }

</bundles_post_ra>
